<compile_context>
chip_gen: v7x
topology: tpu7x:2x2x1
jax: 0.10.0
libtpu: 0.0.40
codegen_flags: <defaults>
</compile_context>

<pallas_src>
import jax
import jax.numpy as jnp
from jax.experimental import pallas as pl
from jax.experimental.pallas import tpu as pltpu

MNIST_INPUT_SIZE = 784
IN_PAD = 896            # 7 * 128 -> lane-dense input/output width
HIDDEN_1 = 512
HIDDEN_2 = 256
LATENT = 2
LATENT_PAD = 128        # lane-aligned latent width (zero-padded)
TB_MAX = 256            # max batch-tile rows per grid step


def _vae_kernel(x_ref, eps_ref,
                ew1_ref, eb1_ref, ew2_ref, eb2_ref, ew34_ref, eb34_ref,
                dw1_ref, db1_ref, dw2_ref, db2_ref, dw3_ref, db3_ref,
                out_ref):
    bf16 = jnp.bfloat16

    x = x_ref[...]                                            # [TB, IN_PAD] bf16

    # ----------------------------- encoder -----------------------------
    h1 = jnp.dot(x, ew1_ref[...], preferred_element_type=jnp.float32) + eb1_ref[...]
    h1 = jnp.maximum(h1, 0.0)
    h2 = jnp.dot(h1.astype(bf16), ew2_ref[...],
                 preferred_element_type=jnp.float32) + eb2_ref[...]
    h2 = jnp.maximum(h2, 0.0)

    # fused mu | log-sigma heads: single [HIDDEN_2, 2*LATENT_PAD] matmul
    heads = jnp.dot(h2.astype(bf16), ew34_ref[...],
                    preferred_element_type=jnp.float32) + eb34_ref[...]
    mu = heads[:, :LATENT_PAD]
    sigma = jnp.exp(heads[:, LATENT_PAD:])                    # EUP
    z = mu + sigma * eps_ref[...]                             # reparameterization

    # ----------------------------- decoder -----------------------------
    d1 = jnp.dot(z.astype(bf16), dw1_ref[...],
                 preferred_element_type=jnp.float32) + db1_ref[...]
    d1 = jnp.maximum(d1, 0.0)
    d2 = jnp.dot(d1.astype(bf16), dw2_ref[...],
                 preferred_element_type=jnp.float32) + db2_ref[...]
    d2 = jnp.maximum(d2, 0.0)
    logits = jnp.dot(d2.astype(bf16), dw3_ref[...],
                     preferred_element_type=jnp.float32) + db3_ref[...]

    # sigmoid(x) = 1 / (1 + exp(-x)); exp + approx reciprocal both use the EUP slot
    out_ref[...] = pl.reciprocal(1.0 + jnp.exp(-logits), approx=True)


def init_params(key):
    """Deterministic nn.Linear-style init: U(-1/sqrt(fan_in), 1/sqrt(fan_in))."""
    def linear(key, fan_in, fan_out):
        kw, kb = jax.random.split(key)
        bound = 1.0 / jnp.sqrt(fan_in)
        w = jax.random.uniform(kw, (fan_in, fan_out), jnp.float32, -bound, bound)
        b = jax.random.uniform(kb, (1, fan_out), jnp.float32, -bound, bound)
        return w, b

    keys = jax.random.split(key, 7)
    p = {}
    p["enc_w1"], p["enc_b1"] = linear(keys[0], MNIST_INPUT_SIZE, HIDDEN_1)
    p["enc_w2"], p["enc_b2"] = linear(keys[1], HIDDEN_1, HIDDEN_2)
    p["enc_w3"], p["enc_b3"] = linear(keys[2], HIDDEN_2, LATENT)   # mu head
    p["enc_w4"], p["enc_b4"] = linear(keys[3], HIDDEN_2, LATENT)   # log-sigma head
    p["dec_w1"], p["dec_b1"] = linear(keys[4], LATENT, HIDDEN_2)
    p["dec_w2"], p["dec_b2"] = linear(keys[5], HIDDEN_2, HIDDEN_1)
    p["dec_w3"], p["dec_b3"] = linear(keys[6], HIDDEN_1, MNIST_INPUT_SIZE)
    return p


def prepare_params(p):
    """One-time (outside the per-call path): pad, fuse heads, cast weights to bf16."""
    def pad_cols(a, n):
        return jnp.pad(a, ((0, 0), (0, n - a.shape[1])))

    def pad_rows(a, n):
        return jnp.pad(a, ((0, n - a.shape[0]), (0, 0)))

    bf16 = jnp.bfloat16
    w34 = jnp.concatenate([pad_cols(p["enc_w3"], LATENT_PAD),
                           pad_cols(p["enc_w4"], LATENT_PAD)], axis=1)   # [256, 256]
    b34 = jnp.concatenate([pad_cols(p["enc_b3"], LATENT_PAD),
                           pad_cols(p["enc_b4"], LATENT_PAD)], axis=1)   # [1, 256]
    prep = {
        "enc_w1": pad_rows(p["enc_w1"], IN_PAD).astype(bf16),     # padded rows -> 0
        "enc_b1": p["enc_b1"],
        "enc_w2": p["enc_w2"].astype(bf16),
        "enc_b2": p["enc_b2"],
        "enc_w34": w34.astype(bf16),                              # padded cols -> 0
        "enc_b34": b34,
        "dec_w1": pad_rows(p["dec_w1"], LATENT_PAD).astype(bf16), # padded rows -> 0
        "dec_b1": p["dec_b1"],
        "dec_w2": p["dec_w2"].astype(bf16),
        "dec_b2": p["dec_b2"],
        "dec_w3": pad_cols(p["dec_w3"], IN_PAD).astype(bf16),     # padded cols -> 0
        "dec_b3": pad_cols(p["dec_b3"], IN_PAD),
    }
    return {k: jnp.asarray(v) for k, v in prep.items()}


@jax.jit
def vae_forward(x, eps, prep):
    """x: [B, 784] f32, eps: [B, LATENT] f32 standard-normal noise, prep: prepare_params()."""
    B = x.shape[0]
    # Adaptive batch tile: don't pad small batches up to a huge tile; cap at TB_MAX.
    tb = min(TB_MAX, ((B + 7) // 8) * 8)
    b_pad = ((B + tb - 1) // tb) * tb

    # Pad batch rows to a multiple of tb and the pixel/latent lanes to 896 / 128.
    x_p = jnp.pad(x.astype(jnp.bfloat16),
                  ((0, b_pad - B), (0, IN_PAD - MNIST_INPUT_SIZE)))
    eps_p = jnp.pad(eps.astype(jnp.float32),
                    ((0, b_pad - B), (0, LATENT_PAD - LATENT)))

    weights = [
        prep["enc_w1"], prep["enc_b1"], prep["enc_w2"], prep["enc_b2"],
        prep["enc_w34"], prep["enc_b34"],
        prep["dec_w1"], prep["dec_b1"], prep["dec_w2"], prep["dec_b2"],
        prep["dec_w3"], prep["dec_b3"],
    ]

    in_specs = (
        [pl.BlockSpec((tb, IN_PAD), lambda b: (b, 0)),        # x: tiled over batch
         pl.BlockSpec((tb, LATENT_PAD), lambda b: (b, 0))]    # eps: tiled over batch
        # weights/biases: constant block -> DMA'd once, resident across grid steps
        + [pl.BlockSpec(w.shape, lambda b: (0, 0)) for w in weights]
    )
    out_spec = pl.BlockSpec((tb, IN_PAD), lambda b: (b, 0))

    out_padded = pl.pallas_call(
        _vae_kernel,
        out_shape=jax.ShapeDtypeStruct((b_pad, IN_PAD), jnp.float32),
        grid_spec=pltpu.PrefetchScalarGridSpec(
            num_scalar_prefetch=0,
            grid=(b_pad // tb,),
            in_specs=in_specs,
            out_specs=out_spec,
        ),
        compiler_params=pltpu.CompilerParams(
            dimension_semantics=("parallel",),
            vmem_limit_bytes=24 << 20,
        ),
    )(x_p, eps_p, *weights)

    return out_padded[:B, :MNIST_INPUT_SIZE]


def vae_forward_ref(x, eps, p):
    """Pure-JAX f32 reference (mirrors the PyTorch forward)."""
    h1 = jax.nn.relu(x @ p["enc_w1"] + p["enc_b1"])
    h2 = jax.nn.relu(h1 @ p["enc_w2"] + p["enc_b2"])
    mu = h2 @ p["enc_w3"] + p["enc_b3"]
    sigma = jnp.exp(h2 @ p["enc_w4"] + p["enc_b4"])
    z = mu + sigma * eps
    d1 = jax.nn.relu(z @ p["dec_w1"] + p["dec_b1"])
    d2 = jax.nn.relu(d1 @ p["dec_w2"] + p["dec_b2"])
    return jax.nn.sigmoid(d2 @ p["dec_w3"] + p["dec_b3"])


def vae_forward_ref_bf16(x, eps, p):
    """Pure-JAX reference with the kernel's precision (bf16 matmul inputs, f32 accum)."""
    bf16 = jnp.bfloat16

    def mm(a, w):
        return jnp.dot(a.astype(bf16), w.astype(bf16),
                       preferred_element_type=jnp.float32)

    h1 = jax.nn.relu(mm(x, p["enc_w1"]) + p["enc_b1"])
    h2 = jax.nn.relu(mm(h1, p["enc_w2"]) + p["enc_b2"])
    mu = mm(h2, p["enc_w3"]) + p["enc_b3"]
    sigma = jnp.exp(mm(h2, p["enc_w4"]) + p["enc_b4"])
    z = mu + sigma * eps
    d1 = jax.nn.relu(mm(z, p["dec_w1"]) + p["dec_b1"])
    d2 = jax.nn.relu(mm(d1, p["dec_w2"]) + p["dec_b2"])
    return jax.nn.sigmoid(mm(d2, p["dec_w3"]) + p["dec_b3"])


if __name__ == "__main__":
    key = jax.random.PRNGKey(0)
    k_param, k_x, k_eps = jax.random.split(key, 3)

    B = 8
    params = init_params(k_param)
    prep = prepare_params(params)     # one-time pad / fuse / bf16 cast (hoisted out of forward)

    x = jax.random.uniform(k_x, (B, MNIST_INPUT_SIZE), jnp.float32)   # MNIST-like pixels in [0,1)
    eps = jax.random.normal(k_eps, (B, LATENT), jnp.float32)          # reparameterization noise

    x_hat = vae_forward(x, eps, prep)
    jax.block_until_ready(x_hat)

    ref16 = vae_forward_ref_bf16(x, eps, params)   # same precision as kernel
    ref32 = vae_forward_ref(x, eps, params)        # full f32 reference

    assert x_hat.shape == (B, MNIST_INPUT_SIZE)
    assert bool(jnp.all(jnp.isfinite(x_hat)))
    assert bool(jnp.allclose(x_hat, ref16, atol=2e-3, rtol=0.0)), \
        float(jnp.max(jnp.abs(x_hat - ref16)))
    assert bool(jnp.allclose(x_hat, ref32, atol=3e-2, rtol=0.0)), \
        float(jnp.max(jnp.abs(x_hat - ref32)))

    print("KERNEL_OK")
</pallas_src>

<mosaic_0001>
module attributes {stable_mosaic.version = 11 : i64} {
  func.func @_vae_kernel(%arg0: i32, %arg1: memref<8x896xbf16, #tpu.memory_space<vmem>>, %arg2: memref<8x128xf32, #tpu.memory_space<vmem>>, %arg3: memref<896x512xbf16, #tpu.memory_space<vmem>>, %arg4: memref<1x512xf32, #tpu.memory_space<vmem>>, %arg5: memref<512x256xbf16, #tpu.memory_space<vmem>>, %arg6: memref<1x256xf32, #tpu.memory_space<vmem>>, %arg7: memref<256x256xbf16, #tpu.memory_space<vmem>>, %arg8: memref<1x256xf32, #tpu.memory_space<vmem>>, %arg9: memref<128x256xbf16, #tpu.memory_space<vmem>>, %arg10: memref<1x256xf32, #tpu.memory_space<vmem>>, %arg11: memref<256x512xbf16, #tpu.memory_space<vmem>>, %arg12: memref<1x512xf32, #tpu.memory_space<vmem>>, %arg13: memref<512x896xbf16, #tpu.memory_space<vmem>>, %arg14: memref<1x896xf32, #tpu.memory_space<vmem>>, %arg15: memref<8x896xf32, #tpu.memory_space<vmem>>) attributes {dimension_semantics = [#tpu.dimension_semantics<parallel>], iteration_bounds = array<i64: 1>, scalar_prefetch = 0 : i64, scratch_operands = 0 : i64, tpu.core_type = #tpu.core_type<tc>, window_params = [{transform_indices = @transform_0, window_bounds = array<i64: 8, 896>}, {transform_indices = @transform_1, window_bounds = array<i64: 8, 128>}, {pipeline_mode = #tpu.pipeline_mode<synchronous>, transform_indices = @transform_2, window_bounds = array<i64: 896, 512>}, {pipeline_mode = #tpu.pipeline_mode<synchronous>, transform_indices = @transform_3, window_bounds = array<i64: 1, 512>}, {pipeline_mode = #tpu.pipeline_mode<synchronous>, transform_indices = @transform_4, window_bounds = array<i64: 512, 256>}, {pipeline_mode = #tpu.pipeline_mode<synchronous>, transform_indices = @transform_5, window_bounds = array<i64: 1, 256>}, {pipeline_mode = #tpu.pipeline_mode<synchronous>, transform_indices = @transform_6, window_bounds = array<i64: 256, 256>}, {pipeline_mode = #tpu.pipeline_mode<synchronous>, transform_indices = @transform_7, window_bounds = array<i64: 1, 256>}, {pipeline_mode = #tpu.pipeline_mode<synchronous>, transform_indices = @transform_8, window_bounds = array<i64: 128, 256>}, {pipeline_mode = #tpu.pipeline_mode<synchronous>, transform_indices = @transform_9, window_bounds = array<i64: 1, 256>}, {pipeline_mode = #tpu.pipeline_mode<synchronous>, transform_indices = @transform_10, window_bounds = array<i64: 256, 512>}, {pipeline_mode = #tpu.pipeline_mode<synchronous>, transform_indices = @transform_11, window_bounds = array<i64: 1, 512>}, {pipeline_mode = #tpu.pipeline_mode<synchronous>, transform_indices = @transform_12, window_bounds = array<i64: 512, 896>}, {pipeline_mode = #tpu.pipeline_mode<synchronous>, transform_indices = @transform_13, window_bounds = array<i64: 1, 896>}, {transform_indices = @transform_14, window_bounds = array<i64: 8, 896>}]} {
    %c0 = arith.constant 0 : index
    %c0_0 = arith.constant 0 : index
    %0 = vector.load %arg1[%c0, %c0_0] : memref<8x896xbf16, #tpu.memory_space<vmem>>, vector<8x896xbf16>
    %c0_1 = arith.constant 0 : index
    %c0_2 = arith.constant 0 : index
    %1 = vector.load %arg3[%c0_1, %c0_2] : memref<896x512xbf16, #tpu.memory_space<vmem>>, vector<896x512xbf16>
    %cst = arith.constant dense<0.000000e+00> : vector<8x512xf32>
    %2 = tpu.matmul %0, %1, %cst {dimension_numbers = #tpu.dot_dimension_numbers<[1], [0], [0], [1], [0, 0, 1, 1], [], []>} : vector<8x896xbf16>, vector<896x512xbf16>, vector<8x512xf32> -> vector<8x512xf32>
    %c0_3 = arith.constant 0 : index
    %c0_4 = arith.constant 0 : index
    %3 = vector.load %arg4[%c0_3, %c0_4] : memref<1x512xf32, #tpu.memory_space<vmem>>, vector<1x512xf32>
    %4 = vector.broadcast %3 : vector<1x512xf32> to vector<8x512xf32>
    %5 = arith.addf %2, %4 : vector<8x512xf32>
    %cst_5 = arith.constant 0.000000e+00 : f32
    %6 = vector.broadcast %cst_5 : f32 to vector<8x512xf32>
    %7 = arith.maximumf %5, %6 : vector<8x512xf32>
    %8 = arith.truncf %7 : vector<8x512xf32> to vector<8x512xbf16>
    %c0_6 = arith.constant 0 : index
    %c0_7 = arith.constant 0 : index
    %9 = vector.load %arg5[%c0_6, %c0_7] : memref<512x256xbf16, #tpu.memory_space<vmem>>, vector<512x256xbf16>
    %cst_8 = arith.constant dense<0.000000e+00> : vector<8x256xf32>
    %10 = tpu.matmul %8, %9, %cst_8 {dimension_numbers = #tpu.dot_dimension_numbers<[1], [0], [0], [1], [0, 0, 1, 1], [], []>} : vector<8x512xbf16>, vector<512x256xbf16>, vector<8x256xf32> -> vector<8x256xf32>
    %c0_9 = arith.constant 0 : index
    %c0_10 = arith.constant 0 : index
    %11 = vector.load %arg6[%c0_9, %c0_10] : memref<1x256xf32, #tpu.memory_space<vmem>>, vector<1x256xf32>
    %12 = vector.broadcast %11 : vector<1x256xf32> to vector<8x256xf32>
    %13 = arith.addf %10, %12 : vector<8x256xf32>
    %cst_11 = arith.constant 0.000000e+00 : f32
    %14 = vector.broadcast %cst_11 : f32 to vector<8x256xf32>
    %15 = arith.maximumf %13, %14 : vector<8x256xf32>
    %16 = arith.truncf %15 : vector<8x256xf32> to vector<8x256xbf16>
    %c0_12 = arith.constant 0 : index
    %c0_13 = arith.constant 0 : index
    %17 = vector.load %arg7[%c0_12, %c0_13] : memref<256x256xbf16, #tpu.memory_space<vmem>>, vector<256x256xbf16>
    %cst_14 = arith.constant dense<0.000000e+00> : vector<8x256xf32>
    %18 = tpu.matmul %16, %17, %cst_14 {dimension_numbers = #tpu.dot_dimension_numbers<[1], [0], [0], [1], [0, 0, 1, 1], [], []>} : vector<8x256xbf16>, vector<256x256xbf16>, vector<8x256xf32> -> vector<8x256xf32>
    %c0_15 = arith.constant 0 : index
    %c0_16 = arith.constant 0 : index
    %19 = vector.load %arg8[%c0_15, %c0_16] : memref<1x256xf32, #tpu.memory_space<vmem>>, vector<1x256xf32>
    %20 = vector.broadcast %19 : vector<1x256xf32> to vector<8x256xf32>
    %21 = arith.addf %18, %20 : vector<8x256xf32>
    %22 = vector.extract_strided_slice %21 {offsets = [0, 0], sizes = [8, 128], strides = [1, 1]} : vector<8x256xf32> to vector<8x128xf32>
    %23 = vector.extract_strided_slice %21 {offsets = [0, 128], sizes = [8, 128], strides = [1, 1]} : vector<8x256xf32> to vector<8x128xf32>
    %24 = math.exp %23 : vector<8x128xf32>
    %c0_17 = arith.constant 0 : index
    %c0_18 = arith.constant 0 : index
    %25 = vector.load %arg2[%c0_17, %c0_18] : memref<8x128xf32, #tpu.memory_space<vmem>>, vector<8x128xf32>
    %26 = arith.mulf %24, %25 : vector<8x128xf32>
    %27 = arith.addf %22, %26 : vector<8x128xf32>
    %28 = arith.truncf %27 : vector<8x128xf32> to vector<8x128xbf16>
    %c0_19 = arith.constant 0 : index
    %c0_20 = arith.constant 0 : index
    %29 = vector.load %arg9[%c0_19, %c0_20] : memref<128x256xbf16, #tpu.memory_space<vmem>>, vector<128x256xbf16>
    %cst_21 = arith.constant dense<0.000000e+00> : vector<8x256xf32>
    %30 = tpu.matmul %28, %29, %cst_21 {dimension_numbers = #tpu.dot_dimension_numbers<[1], [0], [0], [1], [0, 0, 1, 1], [], []>} : vector<8x128xbf16>, vector<128x256xbf16>, vector<8x256xf32> -> vector<8x256xf32>
    %c0_22 = arith.constant 0 : index
    %c0_23 = arith.constant 0 : index
    %31 = vector.load %arg10[%c0_22, %c0_23] : memref<1x256xf32, #tpu.memory_space<vmem>>, vector<1x256xf32>
    %32 = vector.broadcast %31 : vector<1x256xf32> to vector<8x256xf32>
    %33 = arith.addf %30, %32 : vector<8x256xf32>
    %cst_24 = arith.constant 0.000000e+00 : f32
    %34 = vector.broadcast %cst_24 : f32 to vector<8x256xf32>
    %35 = arith.maximumf %33, %34 : vector<8x256xf32>
    %36 = arith.truncf %35 : vector<8x256xf32> to vector<8x256xbf16>
    %c0_25 = arith.constant 0 : index
    %c0_26 = arith.constant 0 : index
    %37 = vector.load %arg11[%c0_25, %c0_26] : memref<256x512xbf16, #tpu.memory_space<vmem>>, vector<256x512xbf16>
    %cst_27 = arith.constant dense<0.000000e+00> : vector<8x512xf32>
    %38 = tpu.matmul %36, %37, %cst_27 {dimension_numbers = #tpu.dot_dimension_numbers<[1], [0], [0], [1], [0, 0, 1, 1], [], []>} : vector<8x256xbf16>, vector<256x512xbf16>, vector<8x512xf32> -> vector<8x512xf32>
    %c0_28 = arith.constant 0 : index
    %c0_29 = arith.constant 0 : index
    %39 = vector.load %arg12[%c0_28, %c0_29] : memref<1x512xf32, #tpu.memory_space<vmem>>, vector<1x512xf32>
    %40 = vector.broadcast %39 : vector<1x512xf32> to vector<8x512xf32>
    %41 = arith.addf %38, %40 : vector<8x512xf32>
    %cst_30 = arith.constant 0.000000e+00 : f32
    %42 = vector.broadcast %cst_30 : f32 to vector<8x512xf32>
    %43 = arith.maximumf %41, %42 : vector<8x512xf32>
    %44 = arith.truncf %43 : vector<8x512xf32> to vector<8x512xbf16>
    %c0_31 = arith.constant 0 : index
    %c0_32 = arith.constant 0 : index
    %45 = vector.load %arg13[%c0_31, %c0_32] : memref<512x896xbf16, #tpu.memory_space<vmem>>, vector<512x896xbf16>
    %cst_33 = arith.constant dense<0.000000e+00> : vector<8x896xf32>
    %46 = tpu.matmul %44, %45, %cst_33 {dimension_numbers = #tpu.dot_dimension_numbers<[1], [0], [0], [1], [0, 0, 1, 1], [], []>} : vector<8x512xbf16>, vector<512x896xbf16>, vector<8x896xf32> -> vector<8x896xf32>
    %c0_34 = arith.constant 0 : index
    %c0_35 = arith.constant 0 : index
    %47 = vector.load %arg14[%c0_34, %c0_35] : memref<1x896xf32, #tpu.memory_space<vmem>>, vector<1x896xf32>
    %48 = vector.broadcast %47 : vector<1x896xf32> to vector<8x896xf32>
    %49 = arith.addf %46, %48 : vector<8x896xf32>
    %cst_36 = arith.constant 0.000000e+00 : f32
    %50 = vector.broadcast %cst_36 : f32 to vector<8x896xf32>
    %51 = arith.subf %50, %49 : vector<8x896xf32>
    %52 = math.exp %51 : vector<8x896xf32>
    %cst_37 = arith.constant 1.000000e+00 : f32
    %53 = vector.broadcast %cst_37 : f32 to vector<8x896xf32>
    %54 = arith.addf %53, %52 : vector<8x896xf32>
    %55 = tpu.reciprocal %54 {approx = true} : vector<8x896xf32> -> vector<8x896xf32>
    %c0_38 = arith.constant 0 : index
    %c0_39 = arith.constant 0 : index
    %56 = vector.load %arg15[%c0_38, %c0_39] : memref<8x896xf32, #tpu.memory_space<vmem>>, vector<8x896xf32>
    tpu.vector_store %arg15[%c0_38, %c0_39], %55 {strides = array<i32>} : memref<8x896xf32, #tpu.memory_space<vmem>>, vector<8x896xf32>,
    return
  }
  func.func @transform_0(%arg0: i32) -> (i32, i32) {
    %c0_i32 = arith.constant 0 : i32
    %c0_i32_0 = arith.constant 0 : i32
    return %arg0, %c0_i32 : i32, i32
  }
  func.func @transform_1(%arg0: i32) -> (i32, i32) {
    %c0_i32 = arith.constant 0 : i32
    %c0_i32_0 = arith.constant 0 : i32
    return %arg0, %c0_i32 : i32, i32
  }
  func.func @transform_2(%arg0: i32) -> (i32, i32) {
    %c0_i32 = arith.constant 0 : i32
    %c0_i32_0 = arith.constant 0 : i32
    %c0_i32_1 = arith.constant 0 : i32
    return %c0_i32, %c0_i32_0 : i32, i32
  }
  func.func @transform_3(%arg0: i32) -> (i32, i32) {
    %c0_i32 = arith.constant 0 : i32
    %c0_i32_0 = arith.constant 0 : i32
    %c0_i32_1 = arith.constant 0 : i32
    return %c0_i32, %c0_i32_0 : i32, i32
  }
  func.func @transform_4(%arg0: i32) -> (i32, i32) {
    %c0_i32 = arith.constant 0 : i32
    %c0_i32_0 = arith.constant 0 : i32
    %c0_i32_1 = arith.constant 0 : i32
    return %c0_i32, %c0_i32_0 : i32, i32
  }
  func.func @transform_5(%arg0: i32) -> (i32, i32) {
    %c0_i32 = arith.constant 0 : i32
    %c0_i32_0 = arith.constant 0 : i32
    %c0_i32_1 = arith.constant 0 : i32
    return %c0_i32, %c0_i32_0 : i32, i32
  }
  func.func @transform_6(%arg0: i32) -> (i32, i32) {
    %c0_i32 = arith.constant 0 : i32
    %c0_i32_0 = arith.constant 0 : i32
    %c0_i32_1 = arith.constant 0 : i32
    return %c0_i32, %c0_i32_0 : i32, i32
  }
  func.func @transform_7(%arg0: i32) -> (i32, i32) {
    %c0_i32 = arith.constant 0 : i32
    %c0_i32_0 = arith.constant 0 : i32
    %c0_i32_1 = arith.constant 0 : i32
    return %c0_i32, %c0_i32_0 : i32, i32
  }
  func.func @transform_8(%arg0: i32) -> (i32, i32) {
    %c0_i32 = arith.constant 0 : i32
    %c0_i32_0 = arith.constant 0 : i32
    %c0_i32_1 = arith.constant 0 : i32
    return %c0_i32, %c0_i32_0 : i32, i32
  }
  func.func @transform_9(%arg0: i32) -> (i32, i32) {
    %c0_i32 = arith.constant 0 : i32
    %c0_i32_0 = arith.constant 0 : i32
    %c0_i32_1 = arith.constant 0 : i32
    return %c0_i32, %c0_i32_0 : i32, i32
  }
  func.func @transform_10(%arg0: i32) -> (i32, i32) {
    %c0_i32 = arith.constant 0 : i32
    %c0_i32_0 = arith.constant 0 : i32
    %c0_i32_1 = arith.constant 0 : i32
    return %c0_i32, %c0_i32_0 : i32, i32
  }
  func.func @transform_11(%arg0: i32) -> (i32, i32) {
    %c0_i32 = arith.constant 0 : i32
    %c0_i32_0 = arith.constant 0 : i32
    %c0_i32_1 = arith.constant 0 : i32
    return %c0_i32, %c0_i32_0 : i32, i32
  }
  func.func @transform_12(%arg0: i32) -> (i32, i32) {
    %c0_i32 = arith.constant 0 : i32
    %c0_i32_0 = arith.constant 0 : i32
    %c0_i32_1 = arith.constant 0 : i32
    return %c0_i32, %c0_i32_0 : i32, i32
  }
  func.func @transform_13(%arg0: i32) -> (i32, i32) {
    %c0_i32 = arith.constant 0 : i32
    %c0_i32_0 = arith.constant 0 : i32
    %c0_i32_1 = arith.constant 0 : i32
    return %c0_i32, %c0_i32_0 : i32, i32
  }
  func.func @transform_14(%arg0: i32) -> (i32, i32) {
    %c0_i32 = arith.constant 0 : i32
    %c0_i32_0 = arith.constant 0 : i32
    return %arg0, %c0_i32 : i32, i32
  }
}

</mosaic_0001>

<bundles_post_ra>
// kernel: vae_forward.1
= control target key start
LH: loop header
LB: loop body
LE: loop exit
PB: predicated region body
PF: predicated region fallthrough
CT: control target
= control target key end

     0   :  { %19 = vsyncpa [#allocation3], 0  ;;  %s7245_s0 = inlined_call_operand.vmem [shape: bf16[8,896], index: 0, kind: input, shape index: {}]   ;;  %s7246_s1 = inlined_call_operand.vmem [shape: f32[8,128], index: 1, kind: input, shape index: {}]   ;;  %s7247_s2 = inlined_call_operand.hbm [shape: bf16[896,512], index: 2, kind: input, shape index: {}]   ;;  %s7248_s3 = inlined_call_operand.vmem [shape: f32[1,512], index: 3, kind: input, shape index: {}]   ;;  %s7249_s4 = inlined_call_operand.hbm [shape: bf16[512,256], index: 4, kind: input, shape index: {}]   ;;  %s7250_s5 = inlined_call_operand.vmem [shape: f32[1,256], index: 5, kind: input, shape index: {}]   ;;  %s7251_s6 = inlined_call_operand.hbm [shape: bf16[256,256], index: 6, kind: input, shape index: {}]   ;;  %s7252_s7 = inlined_call_operand.vmem [shape: f32[1,256], index: 7, kind: input, shape index: {}]   ;;  %s7253_s8 = inlined_call_operand.vmem [shape: bf16[128,256], index: 8, kind: input, shape index: {}]   ;;  %s7254_s9 = inlined_call_operand.vmem [shape: f32[1,256], index: 9, kind: input, shape index: {}]   ;;  %s7255_s10 = inlined_call_operand.hbm [shape: bf16[256,512], index: 10, kind: input, shape index: {}]   ;;  %s7256_s11 = inlined_call_operand.vmem [shape: f32[1,512], index: 11, kind: input, shape index: {}]   ;;  %s7257_s12 = inlined_call_operand.hbm [shape: bf16[512,896], index: 12, kind: input, shape index: {}]   ;;  %s7258_s13 = inlined_call_operand.vmem [shape: f32[1,896], index: 13, kind: input, shape index: {}]   ;;  %s7259_s14 = inlined_call_operand.hbm [shape: f32[8,896], index: 14, kind: output, shape index: {}]  }
   0x1   :  { %20 = vsyncpa [#allocation6], 0 }
   0x2   :  { %21 = vsyncpa [#allocation9], 0 }
   0x3   :  { %22 = vsyncpa [#allocation4], 0  ;;  %s6897_s29 = smov [#allocation5]   ;;  %s6757_s17 = scalar_lea.hbm %s7249_s4, 8192 }
   0x4   :  { %s46_s30 = sshll.u32 %s6897_s29, 4  ;;  %p6758_p0 = scmp.ne.s32.totalorder %s7249_s4, %s6757_s17  ;;  %s47_s30 = int_to_ptr.vmem [resolvable:$true] %s46_s30 }
   0x5   :  { %p6761_p1 = scmp.lt.u32.totalorder %s6757_s17, %s7249_s4 }
   0x7   :  { %p6763_p2 = pnand %p6761_p1, %p6758_p0 }
   0x9   :  { %6766 = shalt.err (!%p6763_p2)
}
   0xa   :  { %s6767_s22 = scalar_lea.vmem %s47_s30, 8192  ;;  %p6772_p4 = scmp.lt.s32.totalorder %s47_s30, %s47_s30 }
   0xb   :  { %p6768_p3 = scmp.ne.s32.totalorder %s47_s30, %s6767_s22  ;;  %p6773_p5 = scmp.lt.s32.totalorder %s6767_s22, %s6767_s22 }
   0xd   :  { %p6774_p6 = por %p6773_p5, %p6772_p4 }
   0xf   :  { %p6775_p7 = pnand %p6774_p6, %p6768_p3 }
  0x11   :  { %6778 = shalt.err (!%p6775_p7)
}
  0x12   :  { %s6898_s23 = smov 128   ;;  %s6899_s24 = smov 8  }
  0x13   :  { %52 = dma.hbm_to_vmem [thread:$0]  %s7249_s4, 8192, %s47_s30, [#allocation6], %s6898_s23, %s6898_s23, %s6899_s24  }
  0x14   :  { %s6900_s27 = smov [#allocation8]   ;;  %s6901_s29 = smov [#allocation2]  }
  0x15   :  { %s78_s28 = sshll.u32 %s6900_s27, 4  ;;  %s32_s15 = sshll.u32 %s6901_s29, 4  ;;  %s79_s28 = int_to_ptr.vmem [resolvable:$true] %s78_s28  ;;  %s33_s15 = int_to_ptr.vmem [resolvable:$true] %s32_s15 }
  0x16   :  { %s6779_s18 = scalar_lea.hbm %s7255_s10, 8192 }
  0x17   :  { %p6780_p8 = scmp.ne.s32.totalorder %s7255_s10, %s6779_s18  ;;  %p6783_p9 = scmp.lt.u32.totalorder %s6779_s18, %s7255_s10 }
  0x19   :  { %p6785_p10 = pnand %p6783_p9, %p6780_p8 }
  0x1b   :  { %6788 = shalt.err (!%p6785_p10)
}
  0x1c   :  { %s6789_s4 = scalar_lea.vmem %s79_s28, 8192  ;;  %p6794_p12 = scmp.lt.s32.totalorder %s79_s28, %s79_s28 }
  0x1d   :  { %p6790_p11 = scmp.ne.s32.totalorder %s79_s28, %s6789_s4  ;;  %p6795_p13 = scmp.lt.s32.totalorder %s6789_s4, %s6789_s4 }
  0x1f   :  { %p6796_p0 = por %p6795_p13, %p6794_p12 }
  0x21   :  { %p6797_p1 = pnand %p6796_p0, %p6790_p11 }
  0x23   :  { %6800 = shalt.err (!%p6797_p1)
}
  0x24   :  { %s6902_s30 = smov 256   ;;  %s6903_s25 = smov 16  }
  0x25   :  { %84 = dma.hbm_to_vmem [thread:$0]  %s7255_s10, 8192, %s79_s28, [#allocation9], %s6902_s30, %s6902_s30, %s6903_s25  }
  0x26   :  { %s6801_s17 = scalar_lea.hbm %s7247_s2, 28672 }
  0x27   :  { %p6802_p2 = scmp.ne.s32.totalorder %s7247_s2, %s6801_s17  ;;  %p6805_p3 = scmp.lt.u32.totalorder %s6801_s17, %s7247_s2 }
  0x29   :  { %p6807_p4 = pnand %p6805_p3, %p6802_p2 }
  0x2b   :  { %6810 = shalt.err (!%p6807_p4)
}
  0x2c   :  { %s6811_s22 = scalar_lea.vmem %s33_s15, 28672  ;;  %p6816_p6 = scmp.lt.s32.totalorder %s33_s15, %s33_s15 }
  0x2d   :  { %p6812_p5 = scmp.ne.s32.totalorder %s33_s15, %s6811_s22  ;;  %p6817_p7 = scmp.lt.s32.totalorder %s6811_s22, %s6811_s22 }
  0x2f   :  { %p6818_p8 = por %p6817_p7, %p6816_p6 }
  0x31   :  { %p6819_p9 = pnand %p6818_p8, %p6812_p5 }
  0x33   :  { %6822 = shalt.err (!%p6819_p9)
}
  0x34   :  { %38 = dma.hbm_to_vmem [thread:$0]  %s7247_s2, 28672, %s33_s15, [#allocation3], %s6902_s30, %s6902_s30, %s6903_s25  }
  0x35   :  { %s6904_s4 = smov [#allocation7]   ;;  %s6905_s27 = smov [#allocation10]  }
  0x36   :  { %s60_s26 = sshll.u32 %s6904_s4, 4  ;;  %s92_s29 = sshll.u32 %s6905_s27, 4  ;;  %s61_s26 = int_to_ptr.vmem [resolvable:$true] %s60_s26  ;;  %s93_s29 = int_to_ptr.vmem [resolvable:$true] %s92_s29 }
  0x37   :  { %s6823_s18 = scalar_lea.hbm %s7251_s6, 4096 }
  0x38   :  { %p6824_p10 = scmp.ne.s32.totalorder %s7251_s6, %s6823_s18  ;;  %p6827_p11 = scmp.lt.u32.totalorder %s6823_s18, %s7251_s6 }
  0x3a   :  { %p6829_p12 = pnand %p6827_p11, %p6824_p10 }
  0x3c   :  { %6832 = shalt.err (!%p6829_p12)
}
  0x3d   :  { %s6833_s2 = scalar_lea.vmem %s61_s26, 4096  ;;  %p6838_p0 = scmp.lt.s32.totalorder %s61_s26, %s61_s26 }
  0x3e   :  { %p6834_p13 = scmp.ne.s32.totalorder %s61_s26, %s6833_s2  ;;  %p6839_p1 = scmp.lt.s32.totalorder %s6833_s2, %s6833_s2 }
  0x40   :  { %p6840_p2 = por %p6839_p1, %p6838_p0 }
  0x42   :  { %p6841_p3 = pnand %p6840_p2, %p6834_p13 }
  0x44   :  { %6844 = shalt.err (!%p6841_p3)
}
  0x45   :  { %66 = dma.hbm_to_vmem [thread:$0]  %s7251_s6, 4096, %s61_s26, [#allocation6], %s6898_s23, %s6898_s23, %s6899_s24  }
  0x46   :  { %s6845_s28 = scalar_lea.hbm %s7257_s12, 28672 }
  0x47   :  { %p6846_p4 = scmp.ne.s32.totalorder %s7257_s12, %s6845_s28  ;;  %p6849_p5 = scmp.lt.u32.totalorder %s6845_s28, %s7257_s12 }
  0x49   :  { %p6851_p6 = pnand %p6849_p5, %p6846_p4 }
  0x4b   :  { %6854 = shalt.err (!%p6851_p6)
}
  0x4c   :  { %s6855_s18 = scalar_lea.vmem %s93_s29, 28672  ;;  %p6860_p8 = scmp.lt.s32.totalorder %s93_s29, %s93_s29 }
  0x4d   :  { %p6856_p7 = scmp.ne.s32.totalorder %s93_s29, %s6855_s18  ;;  %p6861_p9 = scmp.lt.s32.totalorder %s6855_s18, %s6855_s18 }
  0x4f   :  { %p6862_p10 = por %p6861_p9, %p6860_p8 }
  0x51   :  { %p6863_p11 = pnand %p6862_p10, %p6856_p7 }
  0x53   :  { %6866 = shalt.err (!%p6863_p11)
}
  0x54   :  { %s6906_s6 = smov 448   ;;  %s6907_s23 = smov 28  }
  0x55   :  { %98 = dma.hbm_to_vmem [thread:$0]  %s7257_s12, 28672, %s93_s29, [#allocation9], %s6906_s6, %s6906_s6, %s6907_s23  }
  0x56   :  { %6889 = dma.done.wait [#allocation3], 28672  }
  0x57   :  { %6890 = vsyncadd [#allocation3], 4294938624 }
  0x58   :  { %6891 = dma.done.wait [#allocation6], 12288  }
  0x59   :  { %6892 = vsyncadd [#allocation6], 4294955008 }
  0x5a   :  { %6893 = dma.done.wait [#allocation9], 36864  }
  0x5b   :  { %6894 = vsyncadd [#allocation9], 4294930432  ;;  %v5800_v0 = vld [vmem:[#allocation2 + $0x4] ss:$16 sps:$4 sm:$0xff]   ;;  %v5802_v1 = vld [vmem:[#allocation2 + $0xc] ss:$16 sps:$4 sm:$0xff]  }
  0x5c   :  { %1512 = vmatprep.subr.bf16.mxu0 %v5800_v0  ;;  %v5804_v2 = vld [vmem:[#allocation2] ss:$16 sps:$4 sm:$0xff]   ;;  %v5805_v3 = vld [vmem:[#allocation2 + $0x8] ss:$16 sps:$4 sm:$0xff]   ;;  %1676 = vmatprep.subr.bf16.mxu1 %v5802_v1  ;;  %v5806_v4 = vld [vmem:[#allocation2 + $0x24] ss:$16 sps:$4 sm:$0xff]  }
  0x5d   :  { %1513 = vmatpush1.bf16.msra.mxu0 %v5804_v2  ;;  %1677 = vmatpush1.bf16.msra.mxu1 %v5805_v3  ;;  %v5808_v5 = vld [vmem:[#allocation2 + $0x2c] ss:$16 sps:$4 sm:$0xff]   ;;  %v5810_v6 = vld [vmem:[#allocation2 + $0x20] ss:$16 sps:$4 sm:$0xff]   ;;  %v5811_v7 = vld [vmem:[#allocation2 + $0x28] ss:$16 sps:$4 sm:$0xff]  }
  0x5e   :  { %1514 = vmatprep.subr.bf16.mxu0 %v5806_v4  ;;  %1678 = vmatprep.subr.bf16.mxu1 %v5808_v5  ;;  %v5812_v8 = vld [vmem:[#allocation2 + $0x44] ss:$16 sps:$4 sm:$0xff]   ;;  %v5814_v9 = vld [vmem:[#allocation2 + $0x4c] ss:$16 sps:$4 sm:$0xff]   ;;  %v5816_v10 = vld [vmem:[#allocation2 + $0x40] ss:$16 sps:$4 sm:$0xff]  }
  0x5f   :  { %v5817_v11 = vld [vmem:[#allocation2 + $0x48] ss:$16 sps:$4 sm:$0xff]   ;;  %v5818_v12 = vld [vmem:[#allocation2 + $0x64] ss:$16 sps:$4 sm:$0xff]   ;;  %v5820_v13 = vld [vmem:[#allocation2 + $0x6c] ss:$16 sps:$4 sm:$0xff]  }
  0x60   :  { %v5822_v14 = vld [vmem:[#allocation2 + $0x60] ss:$16 sps:$4 sm:$0xff]   ;;  %v5823_v15 = vld [vmem:[#allocation2 + $0x68] ss:$16 sps:$4 sm:$0xff]   ;;  %v5824_v16 = vld [vmem:[#allocation2 + $0x84] ss:$16 sps:$4 sm:$0xff]  }
  0x61   :  { %1515 = vmatpush1.bf16.msra.mxu0 %v5810_v6  ;;  %1679 = vmatpush1.bf16.msra.mxu1 %v5811_v7  ;;  %v5826_v17 = vld [vmem:[#allocation2 + $0x8c] ss:$16 sps:$4 sm:$0xff]   ;;  %v5828_v18 = vld [vmem:[#allocation2 + $0x80] ss:$16 sps:$4 sm:$0xff]   ;;  %v5829_v19 = vld [vmem:[#allocation2 + $0x88] ss:$16 sps:$4 sm:$0xff]  }
  0x62   :  { %1516 = vmatprep.subr.bf16.mxu0 %v5812_v8  ;;  %1680 = vmatprep.subr.bf16.mxu1 %v5814_v9  ;;  %v5830_v20 = vld [vmem:[#allocation2 + $0xa4] ss:$16 sps:$4 sm:$0xff]   ;;  %v5832_v21 = vld [vmem:[#allocation2 + $0xac] ss:$16 sps:$4 sm:$0xff]   ;;  %v5834_v22 = vld [vmem:[#allocation2 + $0xa0] ss:$16 sps:$4 sm:$0xff]  }
  0x63   :  { %v5835_v23 = vld [vmem:[#allocation2 + $0xa8] ss:$16 sps:$4 sm:$0xff]   ;;  %v5836_v24 = vld [vmem:[#allocation2 + $0xc4] ss:$16 sps:$4 sm:$0xff]   ;;  %v5838_v25 = vld [vmem:[#allocation2 + $0xcc] ss:$16 sps:$4 sm:$0xff]  }
  0x64   :  { %v5840_v26 = vld [vmem:[#allocation2 + $0xc0] ss:$16 sps:$4 sm:$0xff]   ;;  %v5841_v27 = vld [vmem:[#allocation2 + $0xc8] ss:$16 sps:$4 sm:$0xff]   ;;  %v5842_v28 = vld [vmem:[#allocation2 + $0xe4] ss:$16 sps:$4 sm:$0xff]  }
  0x65   :  { %1517 = vmatpush1.bf16.msra.mxu0 %v5816_v10  ;;  %1681 = vmatpush1.bf16.msra.mxu1 %v5817_v11  ;;  %v5844_v29 = vld [vmem:[#allocation2 + $0xec] ss:$16 sps:$4 sm:$0xff]   ;;  %v5846_v30 = vld [vmem:[#allocation2 + $0xe0] ss:$16 sps:$4 sm:$0xff]   ;;  %v5847_v31 = vld [vmem:[#allocation2 + $0xe8] ss:$16 sps:$4 sm:$0xff]  }
  0x66   :  { %1518 = vmatprep.subr.bf16.mxu0 %v5818_v12  ;;  %1682 = vmatprep.subr.bf16.mxu1 %v5820_v13  ;;  %v5848_v32 = vld [vmem:[#allocation2 + $0x104] ss:$16 sps:$4 sm:$0xff]   ;;  %v5850_v33 = vld [vmem:[#allocation2 + $0x10c] ss:$16 sps:$4 sm:$0xff]   ;;  %v5852_v34 = vld [vmem:[#allocation2 + $0x100] ss:$16 sps:$4 sm:$0xff]  }
  0x67   :  { %v5853_v35 = vld [vmem:[#allocation2 + $0x108] ss:$16 sps:$4 sm:$0xff]   ;;  %v5854_v36 = vld [vmem:[#allocation2 + $0x124] ss:$16 sps:$4 sm:$0xff]   ;;  %v5856_v37 = vld [vmem:[#allocation2 + $0x12c] ss:$16 sps:$4 sm:$0xff]  }
  0x68   :  { %v5858_v38 = vld [vmem:[#allocation2 + $0x120] ss:$16 sps:$4 sm:$0xff]   ;;  %v5859_v39 = vld [vmem:[#allocation2 + $0x128] ss:$16 sps:$4 sm:$0xff]   ;;  %v5860_v40 = vld [vmem:[#allocation2 + $0x144] ss:$16 sps:$4 sm:$0xff]  }
  0x69   :  { %1519 = vmatpush1.bf16.msra.mxu0 %v5822_v14  ;;  %1683 = vmatpush1.bf16.msra.mxu1 %v5823_v15  ;;  %v5862_v41 = vld [vmem:[#allocation2 + $0x14c] ss:$16 sps:$4 sm:$0xff]   ;;  %v5864_v42 = vld [vmem:[#allocation2 + $0x140] ss:$16 sps:$4 sm:$0xff]   ;;  %v5865_v43 = vld [vmem:[#allocation2 + $0x148] ss:$16 sps:$4 sm:$0xff]  }
  0x6a   :  { %1520 = vmatprep.subr.bf16.mxu0 %v5824_v16  ;;  %1684 = vmatprep.subr.bf16.mxu1 %v5826_v17  ;;  %v5866_v44 = vld [vmem:[#allocation2 + $0x164] ss:$16 sps:$4 sm:$0xff]   ;;  %v5868_v45 = vld [vmem:[#allocation2 + $0x16c] ss:$16 sps:$4 sm:$0xff]   ;;  %v5870_v47 = vld [vmem:[#allocation2 + $0x160] ss:$16 sps:$4 sm:$0xff]  }
  0x6b   :  { %v117_v46 = vld [vmem:[%s7245_s0] sm:$0xff]  ;;  %v5871_v49 = vld [vmem:[#allocation2 + $0x168] ss:$16 sps:$4 sm:$0xff]   ;;  %v5874_v51 = vld [vmem:[#allocation2 + $0x18c] ss:$16 sps:$4 sm:$0xff]  }
  0x6c   :  { %v5061_v48 = vcombine.high %v117_v46, %v117_v46  ;;  %v5872_v50 = vld [vmem:[#allocation2 + $0x184] ss:$16 sps:$4 sm:$0xff]   ;;  %v5876_v52 = vld [vmem:[#allocation2 + $0x180] ss:$16 sps:$4 sm:$0xff]   ;;  %v5877_v53 = vld [vmem:[#allocation2 + $0x188] ss:$16 sps:$4 sm:$0xff]   ;;  %v5060_v4 = vcombine.low %v117_v46, %v117_v46 }
  0x6d   :  { %1521 = vmatpush1.bf16.msra.mxu0 %v5828_v18  ;;  %1685 = vmatpush1.bf16.msra.mxu1 %v5829_v19  ;;  %v5878_v54 = vld [vmem:[#allocation2 + $0x1a4] ss:$16 sps:$4 sm:$0xff]   ;;  %v5880_v55 = vld [vmem:[#allocation2 + $0x1ac] ss:$16 sps:$4 sm:$0xff]   ;;  %v5882_v56 = vld [vmem:[#allocation2 + $0x1a0] ss:$16 sps:$4 sm:$0xff]  }
  0x6e   :  { %1522 = vmatprep.subr.bf16.mxu0 %v5830_v20  ;;  %1686 = vmatprep.subr.bf16.mxu1 %v5832_v21  ;;  %v5883_v57 = vld [vmem:[#allocation2 + $0x1a8] ss:$16 sps:$4 sm:$0xff]   ;;  %v5884_v58 = vld [vmem:[#allocation2 + $0x1c4] ss:$16 sps:$4 sm:$0xff]   ;;  %v5886_v59 = vld [vmem:[#allocation2 + $0x1cc] ss:$16 sps:$4 sm:$0xff]  }
  0x6f   :  { %1544 = vmatprep.mubr.bf16.mxu0 %v5061_v48  ;;  %1708 = vmatprep.mubr.bf16.mxu1 %v5061_v48  ;;  %v5888_v60 = vld [vmem:[#allocation2 + $0x1c0] ss:$16 sps:$4 sm:$0xff]   ;;  %v5889_v61 = vld [vmem:[#allocation2 + $0x1c8] ss:$16 sps:$4 sm:$0xff]   ;;  %v5890_v62 = vld [vmem:[#allocation2 + $0x1e4] ss:$16 sps:$4 sm:$0xff]  }
  0x70   :  { %v5892_v63 = vld [vmem:[#allocation2 + $0x1ec] ss:$16 sps:$4 sm:$0xff]   ;;  %v5894_v0 = vld [vmem:[#allocation2 + $0x1e0] ss:$16 sps:$4 sm:$0xff]   ;;  %v5895_v1 = vld [vmem:[#allocation2 + $0x1e8] ss:$16 sps:$4 sm:$0xff]  }
  0x71   :  { %1523 = vmatpush1.bf16.msra.mxu0 %v5834_v22  ;;  %1687 = vmatpush1.bf16.msra.mxu1 %v5835_v23  ;;  %v5900_v2 = vld [vmem:[#allocation2 + $0x204] ss:$16 sps:$4 sm:$0xff]   ;;  %v5903_v3 = vld [vmem:[#allocation2 + $0x20c] ss:$16 sps:$4 sm:$0xff]   ;;  %v5898_v5 = vld [vmem:[#allocation2 + $0x200] ss:$16 sps:$4 sm:$0xff]  }
  0x72   :  { %1524 = vmatprep.subr.bf16.mxu0 %v5836_v24  ;;  %1688 = vmatprep.subr.bf16.mxu1 %v5838_v25  ;;  %v5901_v6 = vld [vmem:[#allocation2 + $0x208] ss:$16 sps:$4 sm:$0xff]   ;;  %v5906_v7 = vld [vmem:[#allocation2 + $0x224] ss:$16 sps:$4 sm:$0xff]   ;;  %v5909_v8 = vld [vmem:[#allocation2 + $0x22c] ss:$16 sps:$4 sm:$0xff]  }
  0x73   :  { %v5904_v9 = vld [vmem:[#allocation2 + $0x220] ss:$16 sps:$4 sm:$0xff]   ;;  %v5907_v10 = vld [vmem:[#allocation2 + $0x228] ss:$16 sps:$4 sm:$0xff]   ;;  %v5912_v11 = vld [vmem:[#allocation2 + $0x244] ss:$16 sps:$4 sm:$0xff]  }
  0x74   :  { %v5915_v12 = vld [vmem:[#allocation2 + $0x24c] ss:$16 sps:$4 sm:$0xff]   ;;  %v5910_v13 = vld [vmem:[#allocation2 + $0x240] ss:$16 sps:$4 sm:$0xff]   ;;  %v5913_v14 = vld [vmem:[#allocation2 + $0x248] ss:$16 sps:$4 sm:$0xff]  }
  0x75   :  { %1525 = vmatpush1.bf16.msra.mxu0 %v5840_v26  ;;  %1689 = vmatpush1.bf16.msra.mxu1 %v5841_v27  ;;  %v5918_v15 = vld [vmem:[#allocation2 + $0x264] ss:$16 sps:$4 sm:$0xff]   ;;  %v5921_v16 = vld [vmem:[#allocation2 + $0x26c] ss:$16 sps:$4 sm:$0xff]   ;;  %v5916_v17 = vld [vmem:[#allocation2 + $0x260] ss:$16 sps:$4 sm:$0xff]  }
  0x76   :  { %1526 = vmatprep.subr.bf16.mxu0 %v5842_v28  ;;  %1690 = vmatprep.subr.bf16.mxu1 %v5844_v29  ;;  %v5919_v18 = vld [vmem:[#allocation2 + $0x268] ss:$16 sps:$4 sm:$0xff]   ;;  %v5924_v19 = vld [vmem:[#allocation2 + $0x284] ss:$16 sps:$4 sm:$0xff]   ;;  %v5927_v20 = vld [vmem:[#allocation2 + $0x28c] ss:$16 sps:$4 sm:$0xff]  }
  0x77   :  { %v5922_v21 = vld [vmem:[#allocation2 + $0x280] ss:$16 sps:$4 sm:$0xff]   ;;  %v5925_v22 = vld [vmem:[#allocation2 + $0x288] ss:$16 sps:$4 sm:$0xff]   ;;  %v5930_v23 = vld [vmem:[#allocation2 + $0x2a4] ss:$16 sps:$4 sm:$0xff]  }
  0x78   :  { %v5933_v24 = vld [vmem:[#allocation2 + $0x2ac] ss:$16 sps:$4 sm:$0xff]   ;;  %v5928_v25 = vld [vmem:[#allocation2 + $0x2a0] ss:$16 sps:$4 sm:$0xff]   ;;  %v5931_v26 = vld [vmem:[#allocation2 + $0x2a8] ss:$16 sps:$4 sm:$0xff]  }
  0x79   :  { %1527 = vmatpush1.bf16.msra.mxu0 %v5846_v30  ;;  %1691 = vmatpush1.bf16.msra.mxu1 %v5847_v31  ;;  %v5936_v27 = vld [vmem:[#allocation2 + $0x2c4] ss:$16 sps:$4 sm:$0xff]   ;;  %v5939_v28 = vld [vmem:[#allocation2 + $0x2cc] ss:$16 sps:$4 sm:$0xff]   ;;  %v5934_v31 = vld [vmem:[#allocation2 + $0x2c0] ss:$16 sps:$4 sm:$0xff]  }
  0x7a   :  { %1528 = vmatprep.subr.bf16.mxu0 %v5848_v32  ;;  %1692 = vmatprep.subr.bf16.mxu1 %v5850_v33  ;;  %v7057_v29 = vld [vmem:[%s7245_s0 + $0x8] sm:$0xff]  ;;  %v5942_v33 = vld [vmem:[#allocation2 + $0x2e4] ss:$16 sps:$4 sm:$0xff]  }
  0x7b   :  { %v5063_v30 = vcombine.high %v7057_v29, %v7057_v29  ;;  %v5937_v32 = vld [vmem:[#allocation2 + $0x2c8] ss:$16 sps:$4 sm:$0xff]   ;;  %v5963_v46 = vld [vmem:[#allocation2 + $0x34c] ss:$16 sps:$4 sm:$0xff]  }
  0x7c   :  { %v5961_v48 = vld [vmem:[#allocation2 + $0x348] ss:$16 sps:$4 sm:$0xff]  }
  0x7d   :  { %1529 = vmatpush1.bf16.msra.mxu0 %v5852_v34  ;;  %1693 = vmatpush1.bf16.msra.mxu1 %v5853_v35  ;;  %v5945_v34 = vld [vmem:[#allocation2 + $0x2ec] ss:$16 sps:$4 sm:$0xff]   ;;  %v5940_v35 = vld [vmem:[#allocation2 + $0x2e0] ss:$16 sps:$4 sm:$0xff]  }
  0x7e   :  { %1530 = vmatprep.subr.bf16.mxu0 %v5854_v36  ;;  %1694 = vmatprep.subr.bf16.mxu1 %v5856_v37  ;;  %v5943_v36 = vld [vmem:[#allocation2 + $0x2e8] ss:$16 sps:$4 sm:$0xff]   ;;  %v5948_v37 = vld [vmem:[#allocation2 + $0x304] ss:$16 sps:$4 sm:$0xff]  }
  0x81   :  { %1531 = vmatpush1.bf16.msra.mxu0 %v5858_v38  ;;  %1695 = vmatpush1.bf16.msra.mxu1 %v5859_v39  ;;  %v5951_v38 = vld [vmem:[#allocation2 + $0x30c] ss:$16 sps:$4 sm:$0xff]   ;;  %v5946_v39 = vld [vmem:[#allocation2 + $0x300] ss:$16 sps:$4 sm:$0xff]  }
  0x82   :  { %1532 = vmatprep.subr.bf16.mxu0 %v5860_v40  ;;  %1696 = vmatprep.subr.bf16.mxu1 %v5862_v41  ;;  %v5949_v40 = vld [vmem:[#allocation2 + $0x308] ss:$16 sps:$4 sm:$0xff]   ;;  %v5954_v41 = vld [vmem:[#allocation2 + $0x324] ss:$16 sps:$4 sm:$0xff]  }
  0x85   :  { %1533 = vmatpush1.bf16.msra.mxu0 %v5864_v42  ;;  %1697 = vmatpush1.bf16.msra.mxu1 %v5865_v43  ;;  %v5957_v42 = vld [vmem:[#allocation2 + $0x32c] ss:$16 sps:$4 sm:$0xff]   ;;  %v5952_v43 = vld [vmem:[#allocation2 + $0x320] ss:$16 sps:$4 sm:$0xff]  }
  0x86   :  { %1534 = vmatprep.subr.bf16.mxu0 %v5866_v44  ;;  %1698 = vmatprep.subr.bf16.mxu1 %v5868_v45  ;;  %v5955_v44 = vld [vmem:[#allocation2 + $0x328] ss:$16 sps:$4 sm:$0xff]   ;;  %v5960_v45 = vld [vmem:[#allocation2 + $0x344] ss:$16 sps:$4 sm:$0xff]  }
  0x89   :  { %1535 = vmatpush1.bf16.msra.mxu0 %v5870_v47  ;;  %1699 = vmatpush1.bf16.msra.mxu1 %v5871_v49  ;;  %v5958_v47 = vld [vmem:[#allocation2 + $0x340] ss:$16 sps:$4 sm:$0xff]   ;;  %v5966_v49 = vld [vmem:[#allocation2 + $0x364] ss:$16 sps:$4 sm:$0xff]  }
  0x8a   :  { %1536 = vmatprep.subr.bf16.mxu0 %v5872_v50  ;;  %1700 = vmatprep.subr.bf16.mxu1 %v5874_v51  ;;  %v5969_v50 = vld [vmem:[#allocation2 + $0x36c] ss:$16 sps:$4 sm:$0xff]   ;;  %v5964_v51 = vld [vmem:[#allocation2 + $0x360] ss:$16 sps:$4 sm:$0xff]  }
  0x8d   :  { %1537 = vmatpush1.bf16.msra.mxu0 %v5876_v52  ;;  %1701 = vmatpush1.bf16.msra.mxu1 %v5877_v53  ;;  %v5967_v52 = vld [vmem:[#allocation2 + $0x368] ss:$16 sps:$4 sm:$0xff]   ;;  %v5972_v53 = vld [vmem:[#allocation2 + $0x384] ss:$16 sps:$4 sm:$0xff]  }
  0x8e   :  { %1538 = vmatprep.subr.bf16.mxu0 %v5878_v54  ;;  %1702 = vmatprep.subr.bf16.mxu1 %v5880_v55  ;;  %v5975_v54 = vld [vmem:[#allocation2 + $0x38c] ss:$16 sps:$4 sm:$0xff]   ;;  %v5970_v55 = vld [vmem:[#allocation2 + $0x380] ss:$16 sps:$4 sm:$0xff]  }
  0x91   :  { %1539 = vmatpush1.bf16.msra.mxu0 %v5882_v56  ;;  %1703 = vmatpush1.bf16.msra.mxu1 %v5883_v57  ;;  %v5973_v56 = vld [vmem:[#allocation2 + $0x388] ss:$16 sps:$4 sm:$0xff]   ;;  %v5978_v57 = vld [vmem:[#allocation2 + $0x3a4] ss:$16 sps:$4 sm:$0xff]  }
  0x92   :  { %1540 = vmatprep.subr.bf16.mxu0 %v5884_v58  ;;  %1704 = vmatprep.subr.bf16.mxu1 %v5886_v59  ;;  %v5981_v58 = vld [vmem:[#allocation2 + $0x3ac] ss:$16 sps:$4 sm:$0xff]   ;;  %v5976_v59 = vld [vmem:[#allocation2 + $0x3a0] ss:$16 sps:$4 sm:$0xff]  }
  0x95   :  { %1541 = vmatpush1.bf16.msra.mxu0 %v5888_v60  ;;  %1705 = vmatpush1.bf16.msra.mxu1 %v5889_v61  ;;  %v5979_v60 = vld [vmem:[#allocation2 + $0x3a8] ss:$16 sps:$4 sm:$0xff]   ;;  %v5984_v61 = vld [vmem:[#allocation2 + $0x3c4] ss:$16 sps:$4 sm:$0xff]  }
  0x96   :  { %1542 = vmatprep.subr.bf16.mxu0 %v5890_v62  ;;  %1706 = vmatprep.subr.bf16.mxu1 %v5892_v63  ;;  %v5987_v62 = vld [vmem:[#allocation2 + $0x3cc] ss:$16 sps:$4 sm:$0xff]   ;;  %v5982_v63 = vld [vmem:[#allocation2 + $0x3c0] ss:$16 sps:$4 sm:$0xff]  }
  0x99   :  { %1543 = vmatpush1.bf16.msra.mxu0 %v5894_v0  ;;  %1707 = vmatpush1.bf16.msra.mxu1 %v5895_v1  ;;  %v5985_v0 = vld [vmem:[#allocation2 + $0x3c8] ss:$16 sps:$4 sm:$0xff]   ;;  %v5990_v1 = vld [vmem:[#allocation2 + $0x3e4] ss:$16 sps:$4 sm:$0xff]  }
  0x9a   :  { %1553 = vmatprep.subr.bf16.mxu0 %v5900_v2  ;;  %1717 = vmatprep.subr.bf16.mxu1 %v5903_v3  ;;  %v5993_v2 = vld [vmem:[#allocation2 + $0x3ec] ss:$16 sps:$4 sm:$0xff]   ;;  %v5988_v3 = vld [vmem:[#allocation2 + $0x3e0] ss:$16 sps:$4 sm:$0xff]  }
  0x9c   :  { %1545 = vmatmul.mubr.bf16.vlgmr.msra.gmra.mrb[0].mxu0 %v5060_v4  ;;  %1709 = vmatmul.mubr.bf16.vlgmr.msra.gmra.mrb[0].mxu1 %v5060_v4  ;;  %v5991_v4 = vld [vmem:[#allocation2 + $0x3e8] ss:$16 sps:$4 sm:$0xff]  }
  0x9d   :  { %1554 = vmatpush1.bf16.msra.mxu0 %v5898_v5  ;;  %1718 = vmatpush1.bf16.msra.mxu1 %v5901_v6  ;;  %v5998_v5 = vld [vmem:[#allocation2 + $0x404] ss:$16 sps:$4 sm:$0xff]   ;;  %v6001_v6 = vld [vmem:[#allocation2 + $0x40c] ss:$16 sps:$4 sm:$0xff]  }
  0x9e   :  { %1555 = vmatprep.subr.bf16.mxu0 %v5906_v7  ;;  %1719 = vmatprep.subr.bf16.mxu1 %v5909_v8  ;;  %v5062_v7 = vcombine.low %v7057_v29, %v7057_v29  ;;  %v5996_v8 = vld [vmem:[#allocation2 + $0x400] ss:$16 sps:$4 sm:$0xff]   ;;  %v6031_v29 = vld [vmem:[#allocation2 + $0x4ac] ss:$16 sps:$4 sm:$0xff]  }
  0x9f   :  { %1585 = vmatprep.mubr.bf16.mxu0 %v5063_v30  ;;  %1749 = vmatprep.mubr.bf16.mxu1 %v5063_v30  ;;  %v6026_v30 = vld [vmem:[#allocation2 + $0x4a0] ss:$16 sps:$4 sm:$0xff]  }
  0xa1   :  { %1556 = vmatpush1.bf16.msra.mxu0 %v5904_v9  ;;  %1720 = vmatpush1.bf16.msra.mxu1 %v5907_v10  ;;  %v5999_v9 = vld [vmem:[#allocation2 + $0x408] ss:$16 sps:$4 sm:$0xff]   ;;  %v6004_v10 = vld [vmem:[#allocation2 + $0x424] ss:$16 sps:$4 sm:$0xff]  }
  0xa2   :  { %1557 = vmatprep.subr.bf16.mxu0 %v5912_v11  ;;  %1721 = vmatprep.subr.bf16.mxu1 %v5915_v12  ;;  %v7066_v11 = vld [vmem:[%s7245_s0 + $0x10] sm:$0xff]  ;;  %v6007_v12 = vld [vmem:[#allocation2 + $0x42c] ss:$16 sps:$4 sm:$0xff]  }
  0xa5   :  { %1558 = vmatpush1.bf16.msra.mxu0 %v5910_v13  ;;  %1722 = vmatpush1.bf16.msra.mxu1 %v5913_v14  ;;  %v5065_v13 = vcombine.high %v7066_v11, %v7066_v11  ;;  %v6002_v14 = vld [vmem:[#allocation2 + $0x420] ss:$16 sps:$4 sm:$0xff]  }
  0xa6   :  { %1559 = vmatprep.subr.bf16.mxu0 %v5918_v15  ;;  %1723 = vmatprep.subr.bf16.mxu1 %v5921_v16  ;;  %v6005_v15 = vld [vmem:[#allocation2 + $0x428] ss:$16 sps:$4 sm:$0xff]   ;;  %v6010_v16 = vld [vmem:[#allocation2 + $0x444] ss:$16 sps:$4 sm:$0xff]  }
  0xa9   :  { %1560 = vmatpush1.bf16.msra.mxu0 %v5916_v17  ;;  %1724 = vmatpush1.bf16.msra.mxu1 %v5919_v18  ;;  %v6013_v17 = vld [vmem:[#allocation2 + $0x44c] ss:$16 sps:$4 sm:$0xff]   ;;  %v6008_v18 = vld [vmem:[#allocation2 + $0x440] ss:$16 sps:$4 sm:$0xff]  }
  0xaa   :  { %1561 = vmatprep.subr.bf16.mxu0 %v5924_v19  ;;  %1725 = vmatprep.subr.bf16.mxu1 %v5927_v20  ;;  %v6011_v19 = vld [vmem:[#allocation2 + $0x448] ss:$16 sps:$4 sm:$0xff]   ;;  %v6016_v20 = vld [vmem:[#allocation2 + $0x464] ss:$16 sps:$4 sm:$0xff]  }
  0xad   :  { %1562 = vmatpush1.bf16.msra.mxu0 %v5922_v21  ;;  %1726 = vmatpush1.bf16.msra.mxu1 %v5925_v22  ;;  %v6019_v21 = vld [vmem:[#allocation2 + $0x46c] ss:$16 sps:$4 sm:$0xff]   ;;  %v6014_v22 = vld [vmem:[#allocation2 + $0x460] ss:$16 sps:$4 sm:$0xff]  }
  0xae   :  { %1563 = vmatprep.subr.bf16.mxu0 %v5930_v23  ;;  %1727 = vmatprep.subr.bf16.mxu1 %v5933_v24  ;;  %v6017_v23 = vld [vmem:[#allocation2 + $0x468] ss:$16 sps:$4 sm:$0xff]   ;;  %v6022_v24 = vld [vmem:[#allocation2 + $0x484] ss:$16 sps:$4 sm:$0xff]  }
  0xb1   :  { %1564 = vmatpush1.bf16.msra.mxu0 %v5928_v25  ;;  %1728 = vmatpush1.bf16.msra.mxu1 %v5931_v26  ;;  %v6025_v25 = vld [vmem:[#allocation2 + $0x48c] ss:$16 sps:$4 sm:$0xff]   ;;  %v6020_v26 = vld [vmem:[#allocation2 + $0x480] ss:$16 sps:$4 sm:$0xff]  }
  0xb2   :  { %1565 = vmatprep.subr.bf16.mxu0 %v5936_v27  ;;  %1729 = vmatprep.subr.bf16.mxu1 %v5939_v28  ;;  %v6023_v27 = vld [vmem:[#allocation2 + $0x488] ss:$16 sps:$4 sm:$0xff]   ;;  %v6028_v28 = vld [vmem:[#allocation2 + $0x4a4] ss:$16 sps:$4 sm:$0xff]  }
  0xb5   :  { %1566 = vmatpush1.bf16.msra.mxu0 %v5934_v31  ;;  %1730 = vmatpush1.bf16.msra.mxu1 %v5937_v32  ;;  %v6029_v31 = vld [vmem:[#allocation2 + $0x4a8] ss:$16 sps:$4 sm:$0xff]   ;;  %v6034_v32 = vld [vmem:[#allocation2 + $0x4c4] ss:$16 sps:$4 sm:$0xff]  }
  0xb6   :  { %1567 = vmatprep.subr.bf16.mxu0 %v5942_v33  ;;  %1731 = vmatprep.subr.bf16.mxu1 %v5945_v34  ;;  %v6037_v33 = vld [vmem:[#allocation2 + $0x4cc] ss:$16 sps:$4 sm:$0xff]   ;;  %v6032_v34 = vld [vmem:[#allocation2 + $0x4c0] ss:$16 sps:$4 sm:$0xff]  }
  0xb9   :  { %1568 = vmatpush1.bf16.msra.mxu0 %v5940_v35  ;;  %1732 = vmatpush1.bf16.msra.mxu1 %v5943_v36  ;;  %v6035_v35 = vld [vmem:[#allocation2 + $0x4c8] ss:$16 sps:$4 sm:$0xff]   ;;  %v6040_v36 = vld [vmem:[#allocation2 + $0x4e4] ss:$16 sps:$4 sm:$0xff]  }
  0xba   :  { %1569 = vmatprep.subr.bf16.mxu0 %v5948_v37  ;;  %1733 = vmatprep.subr.bf16.mxu1 %v5951_v38  ;;  %v6043_v37 = vld [vmem:[#allocation2 + $0x4ec] ss:$16 sps:$4 sm:$0xff]   ;;  %v6038_v38 = vld [vmem:[#allocation2 + $0x4e0] ss:$16 sps:$4 sm:$0xff]  }
  0xbd   :  { %1570 = vmatpush1.bf16.msra.mxu0 %v5946_v39  ;;  %1734 = vmatpush1.bf16.msra.mxu1 %v5949_v40  ;;  %v6041_v39 = vld [vmem:[#allocation2 + $0x4e8] ss:$16 sps:$4 sm:$0xff]   ;;  %v6046_v40 = vld [vmem:[#allocation2 + $0x504] ss:$16 sps:$4 sm:$0xff]  }
  0xbe   :  { %1571 = vmatprep.subr.bf16.mxu0 %v5954_v41  ;;  %1735 = vmatprep.subr.bf16.mxu1 %v5957_v42  ;;  %v6049_v41 = vld [vmem:[#allocation2 + $0x50c] ss:$16 sps:$4 sm:$0xff]   ;;  %v6044_v42 = vld [vmem:[#allocation2 + $0x500] ss:$16 sps:$4 sm:$0xff]  }
  0xc1   :  { %1572 = vmatpush1.bf16.msra.mxu0 %v5952_v43  ;;  %1736 = vmatpush1.bf16.msra.mxu1 %v5955_v44  ;;  %v6047_v43 = vld [vmem:[#allocation2 + $0x508] ss:$16 sps:$4 sm:$0xff]   ;;  %v6052_v44 = vld [vmem:[#allocation2 + $0x524] ss:$16 sps:$4 sm:$0xff]  }
  0xc2   :  { %1573 = vmatprep.subr.bf16.mxu0 %v5960_v45  ;;  %1737 = vmatprep.subr.bf16.mxu1 %v5963_v46  ;;  %v6055_v45 = vld [vmem:[#allocation2 + $0x52c] ss:$16 sps:$4 sm:$0xff]   ;;  %v6050_v46 = vld [vmem:[#allocation2 + $0x520] ss:$16 sps:$4 sm:$0xff]  }
  0xc5   :  { %1574 = vmatpush1.bf16.msra.mxu0 %v5958_v47  ;;  %1738 = vmatpush1.bf16.msra.mxu1 %v5961_v48  ;;  %v6053_v47 = vld [vmem:[#allocation2 + $0x528] ss:$16 sps:$4 sm:$0xff]   ;;  %v6058_v48 = vld [vmem:[#allocation2 + $0x544] ss:$16 sps:$4 sm:$0xff]  }
  0xc6   :  { %1575 = vmatprep.subr.bf16.mxu0 %v5966_v49  ;;  %1739 = vmatprep.subr.bf16.mxu1 %v5969_v50  ;;  %v6061_v49 = vld [vmem:[#allocation2 + $0x54c] ss:$16 sps:$4 sm:$0xff]   ;;  %v6056_v50 = vld [vmem:[#allocation2 + $0x540] ss:$16 sps:$4 sm:$0xff]  }
  0xc9   :  { %1576 = vmatpush1.bf16.msra.mxu0 %v5964_v51  ;;  %1740 = vmatpush1.bf16.msra.mxu1 %v5967_v52  ;;  %v6059_v51 = vld [vmem:[#allocation2 + $0x548] ss:$16 sps:$4 sm:$0xff]   ;;  %v6064_v52 = vld [vmem:[#allocation2 + $0x564] ss:$16 sps:$4 sm:$0xff]  }
  0xca   :  { %1577 = vmatprep.subr.bf16.mxu0 %v5972_v53  ;;  %1741 = vmatprep.subr.bf16.mxu1 %v5975_v54  ;;  %v6067_v53 = vld [vmem:[#allocation2 + $0x56c] ss:$16 sps:$4 sm:$0xff]   ;;  %v6062_v54 = vld [vmem:[#allocation2 + $0x560] ss:$16 sps:$4 sm:$0xff]  }
  0xcd   :  { %1578 = vmatpush1.bf16.msra.mxu0 %v5970_v55  ;;  %1742 = vmatpush1.bf16.msra.mxu1 %v5973_v56  ;;  %v6065_v55 = vld [vmem:[#allocation2 + $0x568] ss:$16 sps:$4 sm:$0xff]   ;;  %v6070_v56 = vld [vmem:[#allocation2 + $0x584] ss:$16 sps:$4 sm:$0xff]  }
  0xce   :  { %1579 = vmatprep.subr.bf16.mxu0 %v5978_v57  ;;  %1743 = vmatprep.subr.bf16.mxu1 %v5981_v58  ;;  %v6073_v57 = vld [vmem:[#allocation2 + $0x58c] ss:$16 sps:$4 sm:$0xff]   ;;  %v6068_v58 = vld [vmem:[#allocation2 + $0x580] ss:$16 sps:$4 sm:$0xff]  }
  0xd1   :  { %1580 = vmatpush1.bf16.msra.mxu0 %v5976_v59  ;;  %1744 = vmatpush1.bf16.msra.mxu1 %v5979_v60  ;;  %v6071_v59 = vld [vmem:[#allocation2 + $0x588] ss:$16 sps:$4 sm:$0xff]   ;;  %v6076_v60 = vld [vmem:[#allocation2 + $0x5a4] ss:$16 sps:$4 sm:$0xff]  }
  0xd2   :  { %1581 = vmatprep.subr.bf16.mxu0 %v5984_v61  ;;  %1745 = vmatprep.subr.bf16.mxu1 %v5987_v62  ;;  %v6079_v61 = vld [vmem:[#allocation2 + $0x5ac] ss:$16 sps:$4 sm:$0xff]   ;;  %v6074_v62 = vld [vmem:[#allocation2 + $0x5a0] ss:$16 sps:$4 sm:$0xff]  }
  0xd5   :  { %1582 = vmatpush1.bf16.msra.mxu0 %v5982_v63  ;;  %1746 = vmatpush1.bf16.msra.mxu1 %v5985_v0  ;;  %v6077_v63 = vld [vmem:[#allocation2 + $0x5a8] ss:$16 sps:$4 sm:$0xff]   ;;  %v6082_v0 = vld [vmem:[#allocation2 + $0x5c4] ss:$16 sps:$4 sm:$0xff]  }
  0xd6   :  { %1583 = vmatprep.subr.bf16.mxu0 %v5990_v1  ;;  %1747 = vmatprep.subr.bf16.mxu1 %v5993_v2  ;;  %v6085_v1 = vld [vmem:[#allocation2 + $0x5cc] ss:$16 sps:$4 sm:$0xff]   ;;  %v6080_v2 = vld [vmem:[#allocation2 + $0x5c0] ss:$16 sps:$4 sm:$0xff]  }
  0xd9   :  { %1584 = vmatpush1.bf16.msra.mxu0 %v5988_v3  ;;  %1748 = vmatpush1.bf16.msra.mxu1 %v5991_v4  ;;  %v6083_v3 = vld [vmem:[#allocation2 + $0x5c8] ss:$16 sps:$4 sm:$0xff]   ;;  %v6088_v4 = vld [vmem:[#allocation2 + $0x5e4] ss:$16 sps:$4 sm:$0xff]  }
  0xda   :  { %1594 = vmatprep.subr.bf16.mxu0 %v5998_v5  ;;  %1758 = vmatprep.subr.bf16.mxu1 %v6001_v6  ;;  %v6091_v5 = vld [vmem:[#allocation2 + $0x5ec] ss:$16 sps:$4 sm:$0xff]   ;;  %v6086_v6 = vld [vmem:[#allocation2 + $0x5e0] ss:$16 sps:$4 sm:$0xff]  }
  0xdc   :  { %1586 = vmatmul.mubr.bf16.vlgmr.msra.gmra.mrb[0].mxu0 %v5062_v7  ;;  %1750 = vmatmul.mubr.bf16.vlgmr.msra.gmra.mrb[0].mxu1 %v5062_v7  ;;  %v6089_v7 = vld [vmem:[#allocation2 + $0x5e8] ss:$16 sps:$4 sm:$0xff]  }
  0xdd   :  { %1595 = vmatpush1.bf16.msra.mxu0 %v5996_v8  ;;  %1759 = vmatpush1.bf16.msra.mxu1 %v5999_v9  ;;  %v6096_v8 = vld [vmem:[#allocation2 + $0x604] ss:$16 sps:$4 sm:$0xff]   ;;  %v6099_v9 = vld [vmem:[#allocation2 + $0x60c] ss:$16 sps:$4 sm:$0xff]  }
  0xde   :  { %1596 = vmatprep.subr.bf16.mxu0 %v6004_v10  ;;  %1760 = vmatprep.subr.bf16.mxu1 %v6007_v12  ;;  %v6094_v10 = vld [vmem:[#allocation2 + $0x600] ss:$16 sps:$4 sm:$0xff]   ;;  %v6097_v12 = vld [vmem:[#allocation2 + $0x608] ss:$16 sps:$4 sm:$0xff]  }
  0xdf   :  { %1626 = vmatprep.mubr.bf16.mxu0 %v5065_v13  ;;  %1790 = vmatprep.mubr.bf16.mxu1 %v5065_v13  ;;  %v5064_v13 = vcombine.low %v7066_v11, %v7066_v11  ;;  %v6114_v11 = vld [vmem:[#allocation2 + $0x664] ss:$16 sps:$4 sm:$0xff]  }
  0xe1   :  { %1597 = vmatpush1.bf16.msra.mxu0 %v6002_v14  ;;  %1761 = vmatpush1.bf16.msra.mxu1 %v6005_v15  ;;  %v6102_v14 = vld [vmem:[#allocation2 + $0x624] ss:$16 sps:$4 sm:$0xff]   ;;  %v6105_v15 = vld [vmem:[#allocation2 + $0x62c] ss:$16 sps:$4 sm:$0xff]  }
  0xe2   :  { %1598 = vmatprep.subr.bf16.mxu0 %v6010_v16  ;;  %1762 = vmatprep.subr.bf16.mxu1 %v6013_v17  ;;  %v6100_v16 = vld [vmem:[#allocation2 + $0x620] ss:$16 sps:$4 sm:$0xff]   ;;  %v6103_v17 = vld [vmem:[#allocation2 + $0x628] ss:$16 sps:$4 sm:$0xff]  }
  0xe5   :  { %1599 = vmatpush1.bf16.msra.mxu0 %v6008_v18  ;;  %1763 = vmatpush1.bf16.msra.mxu1 %v6011_v19  ;;  %v6108_v18 = vld [vmem:[#allocation2 + $0x644] ss:$16 sps:$4 sm:$0xff]   ;;  %v6111_v19 = vld [vmem:[#allocation2 + $0x64c] ss:$16 sps:$4 sm:$0xff]  }
  0xe6   :  { %1600 = vmatprep.subr.bf16.mxu0 %v6016_v20  ;;  %1764 = vmatprep.subr.bf16.mxu1 %v6019_v21  ;;  %v6106_v20 = vld [vmem:[#allocation2 + $0x640] ss:$16 sps:$4 sm:$0xff]   ;;  %v6109_v21 = vld [vmem:[#allocation2 + $0x648] ss:$16 sps:$4 sm:$0xff]  }
  0xe9   :  { %1601 = vmatpush1.bf16.msra.mxu0 %v6014_v22  ;;  %1765 = vmatpush1.bf16.msra.mxu1 %v6017_v23  ;;  %v6908_v22 = vmov 0   ;;  %v6117_v23 = vld [vmem:[#allocation2 + $0x66c] ss:$16 sps:$4 sm:$0xff]  }
  0xea   :  { %1602 = vmatprep.subr.bf16.mxu0 %v6022_v24  ;;  %1766 = vmatprep.subr.bf16.mxu1 %v6025_v25  ;;  %v6112_v24 = vld [vmem:[#allocation2 + $0x660] ss:$16 sps:$4 sm:$0xff]   ;;  %v6115_v25 = vld [vmem:[#allocation2 + $0x668] ss:$16 sps:$4 sm:$0xff]  }
  0xed   :  { %1603 = vmatpush1.bf16.msra.mxu0 %v6020_v26  ;;  %1767 = vmatpush1.bf16.msra.mxu1 %v6023_v27  ;;  %v6120_v26 = vld [vmem:[#allocation2 + $0x684] ss:$16 sps:$4 sm:$0xff]   ;;  %v6123_v27 = vld [vmem:[#allocation2 + $0x68c] ss:$16 sps:$4 sm:$0xff]  }
  0xee   :  { %1604 = vmatprep.subr.bf16.mxu0 %v6028_v28  ;;  %1768 = vmatprep.subr.bf16.mxu1 %v6031_v29  ;;  %v6118_v28 = vld [vmem:[#allocation2 + $0x680] ss:$16 sps:$4 sm:$0xff]   ;;  %v6121_v29 = vld [vmem:[#allocation2 + $0x688] ss:$16 sps:$4 sm:$0xff]  }
  0xf1   :  { %1605 = vmatpush1.bf16.msra.mxu0 %v6026_v30  ;;  %1769 = vmatpush1.bf16.msra.mxu1 %v6029_v31  ;;  %v6126_v30 = vld [vmem:[#allocation2 + $0x6a4] ss:$16 sps:$4 sm:$0xff]   ;;  %v6129_v31 = vld [vmem:[#allocation2 + $0x6ac] ss:$16 sps:$4 sm:$0xff]  }
  0xf2   :  { %1606 = vmatprep.subr.bf16.mxu0 %v6034_v32  ;;  %1770 = vmatprep.subr.bf16.mxu1 %v6037_v33  ;;  %v6124_v32 = vld [vmem:[#allocation2 + $0x6a0] ss:$16 sps:$4 sm:$0xff]   ;;  %v6127_v33 = vld [vmem:[#allocation2 + $0x6a8] ss:$16 sps:$4 sm:$0xff]  }
  0xf5   :  { %1607 = vmatpush1.bf16.msra.mxu0 %v6032_v34  ;;  %1771 = vmatpush1.bf16.msra.mxu1 %v6035_v35  ;;  %v6132_v34 = vld [vmem:[#allocation2 + $0x6c4] ss:$16 sps:$4 sm:$0xff]   ;;  %v6135_v35 = vld [vmem:[#allocation2 + $0x6cc] ss:$16 sps:$4 sm:$0xff]  }
  0xf6   :  { %1608 = vmatprep.subr.bf16.mxu0 %v6040_v36  ;;  %1772 = vmatprep.subr.bf16.mxu1 %v6043_v37  ;;  %v6130_v36 = vld [vmem:[#allocation2 + $0x6c0] ss:$16 sps:$4 sm:$0xff]   ;;  %v6133_v37 = vld [vmem:[#allocation2 + $0x6c8] ss:$16 sps:$4 sm:$0xff]  }
  0xf9   :  { %1609 = vmatpush1.bf16.msra.mxu0 %v6038_v38  ;;  %1773 = vmatpush1.bf16.msra.mxu1 %v6041_v39  ;;  %v6138_v38 = vld [vmem:[#allocation2 + $0x6e4] ss:$16 sps:$4 sm:$0xff]   ;;  %v6141_v39 = vld [vmem:[#allocation2 + $0x6ec] ss:$16 sps:$4 sm:$0xff]  }
  0xfa   :  { %1610 = vmatprep.subr.bf16.mxu0 %v6046_v40  ;;  %1774 = vmatprep.subr.bf16.mxu1 %v6049_v41  ;;  %v6136_v40 = vld [vmem:[#allocation2 + $0x6e0] ss:$16 sps:$4 sm:$0xff]   ;;  %v6139_v41 = vld [vmem:[#allocation2 + $0x6e8] ss:$16 sps:$4 sm:$0xff]  }
  0xfd   :  { %1611 = vmatpush1.bf16.msra.mxu0 %v6044_v42  ;;  %1775 = vmatpush1.bf16.msra.mxu1 %v6047_v43  ;;  %v6145_v42 = vld [vmem:[#allocation5 + $0x4] ss:$8 sps:$4 sm:$0xff]   ;;  %v6142_v43 = vld [vmem:[%s7245_s0 + $0x18] ss:$0 sps:$4 sm:$0xff]  }
  0xfe   :  { %1612 = vmatprep.subr.bf16.mxu0 %v6052_v44  ;;  %1776 = vmatprep.subr.bf16.mxu1 %v6055_v45  ;;  %v6143_v44 = vld [vmem:[#allocation5] ss:$8 sps:$4 sm:$0xff]   ;;  %v6148_v45 = vld [vmem:[#allocation5 + $0x14] ss:$8 sps:$4 sm:$0xff]  }
 0x101   :  { %1613 = vmatpush1.bf16.msra.mxu0 %v6050_v46  ;;  %1777 = vmatpush1.bf16.msra.mxu1 %v6053_v47  ;;  %v6146_v46 = vld [vmem:[#allocation5 + $0x10] ss:$8 sps:$4 sm:$0xff]   ;;  %v6151_v47 = vld [vmem:[#allocation5 + $0x24] ss:$8 sps:$4 sm:$0xff]  }
 0x102   :  { %1614 = vmatprep.subr.bf16.mxu0 %v6058_v48  ;;  %1778 = vmatprep.subr.bf16.mxu1 %v6061_v49  ;;  %v6149_v48 = vld [vmem:[#allocation5 + $0x20] ss:$8 sps:$4 sm:$0xff]   ;;  %v6154_v49 = vld [vmem:[#allocation5 + $0x34] ss:$8 sps:$4 sm:$0xff]  }
 0x105   :  { %1615 = vmatpush1.bf16.msra.mxu0 %v6056_v50  ;;  %1779 = vmatpush1.bf16.msra.mxu1 %v6059_v51  ;;  %v6152_v50 = vld [vmem:[#allocation5 + $0x30] ss:$8 sps:$4 sm:$0xff]   ;;  %v6157_v51 = vld [vmem:[#allocation5 + $0x44] ss:$8 sps:$4 sm:$0xff]  }
 0x106   :  { %1616 = vmatprep.subr.bf16.mxu0 %v6064_v52  ;;  %1780 = vmatprep.subr.bf16.mxu1 %v6067_v53  ;;  %v6155_v52 = vld [vmem:[#allocation5 + $0x40] ss:$8 sps:$4 sm:$0xff]   ;;  %v6160_v53 = vld [vmem:[#allocation5 + $0x54] ss:$8 sps:$4 sm:$0xff]  }
 0x109   :  { %1617 = vmatpush1.bf16.msra.mxu0 %v6062_v54  ;;  %1781 = vmatpush1.bf16.msra.mxu1 %v6065_v55  ;;  %v6158_v54 = vld [vmem:[#allocation5 + $0x50] ss:$8 sps:$4 sm:$0xff]   ;;  %v6163_v55 = vld [vmem:[#allocation5 + $0x64] ss:$8 sps:$4 sm:$0xff]  }
 0x10a   :  { %1618 = vmatprep.subr.bf16.mxu0 %v6070_v56  ;;  %1782 = vmatprep.subr.bf16.mxu1 %v6073_v57  ;;  %v6161_v56 = vld [vmem:[#allocation5 + $0x60] ss:$8 sps:$4 sm:$0xff]   ;;  %v6166_v57 = vld [vmem:[#allocation5 + $0x74] ss:$8 sps:$4 sm:$0xff]  }
 0x10d   :  { %1619 = vmatpush1.bf16.msra.mxu0 %v6068_v58  ;;  %1783 = vmatpush1.bf16.msra.mxu1 %v6071_v59  ;;  %v6164_v58 = vld [vmem:[#allocation5 + $0x70] ss:$8 sps:$4 sm:$0xff]   ;;  %v6169_v59 = vld [vmem:[#allocation5 + $0x84] ss:$8 sps:$4 sm:$0xff]  }
 0x10e   :  { %1620 = vmatprep.subr.bf16.mxu0 %v6076_v60  ;;  %1784 = vmatprep.subr.bf16.mxu1 %v6079_v61  ;;  %v6167_v60 = vld [vmem:[#allocation5 + $0x80] ss:$8 sps:$4 sm:$0xff]   ;;  %v6172_v61 = vld [vmem:[#allocation5 + $0x94] ss:$8 sps:$4 sm:$0xff]  }
 0x111   :  { %1621 = vmatpush1.bf16.msra.mxu0 %v6074_v62  ;;  %1785 = vmatpush1.bf16.msra.mxu1 %v6077_v63  ;;  %v6170_v62 = vld [vmem:[#allocation5 + $0x90] ss:$8 sps:$4 sm:$0xff]   ;;  %v6175_v63 = vld [vmem:[#allocation5 + $0xa4] ss:$8 sps:$4 sm:$0xff]  }
 0x112   :  { %1622 = vmatprep.subr.bf16.mxu0 %v6082_v0  ;;  %1786 = vmatprep.subr.bf16.mxu1 %v6085_v1  ;;  %v6173_v0 = vld [vmem:[#allocation5 + $0xa0] ss:$8 sps:$4 sm:$0xff]   ;;  %v6178_v1 = vld [vmem:[#allocation5 + $0xb4] ss:$8 sps:$4 sm:$0xff]  }
 0x115   :  { %1623 = vmatpush1.bf16.msra.mxu0 %v6080_v2  ;;  %1787 = vmatpush1.bf16.msra.mxu1 %v6083_v3  ;;  %v6176_v2 = vld [vmem:[#allocation5 + $0xb0] ss:$8 sps:$4 sm:$0xff]   ;;  %v6181_v3 = vld [vmem:[#allocation5 + $0xc4] ss:$8 sps:$4 sm:$0xff]  }
 0x116   :  { %1624 = vmatprep.subr.bf16.mxu0 %v6088_v4  ;;  %1788 = vmatprep.subr.bf16.mxu1 %v6091_v5  ;;  %v6179_v4 = vld [vmem:[#allocation5 + $0xc0] ss:$8 sps:$4 sm:$0xff]   ;;  %v6184_v5 = vld [vmem:[#allocation5 + $0xd4] ss:$8 sps:$4 sm:$0xff]  }
 0x119   :  { %1625 = vmatpush1.bf16.msra.mxu0 %v6086_v6  ;;  %1789 = vmatpush1.bf16.msra.mxu1 %v6089_v7  ;;  %v6182_v6 = vld [vmem:[#allocation5 + $0xd0] ss:$8 sps:$4 sm:$0xff]   ;;  %v6187_v7 = vld [vmem:[#allocation5 + $0xe4] ss:$8 sps:$4 sm:$0xff]  }
 0x11a   :  { %1635 = vmatprep.subr.bf16.mxu0 %v6096_v8  ;;  %1799 = vmatprep.subr.bf16.mxu1 %v6099_v9  ;;  %v6185_v8 = vld [vmem:[#allocation5 + $0xe0] ss:$8 sps:$4 sm:$0xff]   ;;  %v6190_v9 = vld [vmem:[#allocation5 + $0xf4] ss:$8 sps:$4 sm:$0xff]  }
 0x11c   :  { %1627 = vmatmul.mubr.bf16.vlgmr.msra.gmra.mrb[0].mxu0 %v5064_v13  ;;  %1791 = vmatmul.mubr.bf16.vlgmr.msra.gmra.mrb[0].mxu1 %v5064_v13  ;;  %v6239_v13 = vld [vmem:[#allocation7] ss:$8 sps:$4 sm:$0xff]  }
 0x11d   :  { %1636 = vmatpush1.bf16.msra.mxu0 %v6094_v10  ;;  %1800 = vmatpush1.bf16.msra.mxu1 %v6097_v12  ;;  %v6188_v10 = vld [vmem:[#allocation5 + $0xf0] ss:$8 sps:$4 sm:$0xff]   ;;  %v6193_v12 = vld [vmem:[#allocation5 + $0x104] ss:$8 sps:$4 sm:$0xff]  }
 0x11e   :  { %1637 = vmatprep.subr.bf16.mxu0 %v6102_v14  ;;  %1801 = vmatprep.subr.bf16.mxu1 %v6105_v15  ;;  %v6241_v14 = vld [vmem:[#allocation7 + $0x4] ss:$8 sps:$4 sm:$0xff]   ;;  %v6244_v15 = vld [vmem:[#allocation7 + $0x14] ss:$8 sps:$4 sm:$0xff]  }
 0x11f   :  { %1667 = vmatprep.mubr.bf16.mxu0 %v6908_v22  ;;  %1831 = vmatprep.mubr.bf16.mxu1 %v6908_v22 }
 0x121   :  { %1638 = vmatpush1.bf16.msra.mxu0 %v6100_v16  ;;  %1802 = vmatpush1.bf16.msra.mxu1 %v6103_v17  ;;  %v6242_v16 = vld [vmem:[#allocation7 + $0x10] ss:$8 sps:$4 sm:$0xff]   ;;  %v6247_v17 = vld [vmem:[#allocation7 + $0x24] ss:$8 sps:$4 sm:$0xff]  }
 0x122   :  { %1639 = vmatprep.subr.bf16.mxu0 %v6108_v18  ;;  %1803 = vmatprep.subr.bf16.mxu1 %v6111_v19  ;;  %v6245_v18 = vld [vmem:[#allocation7 + $0x20] ss:$8 sps:$4 sm:$0xff]   ;;  %v6250_v19 = vld [vmem:[#allocation7 + $0x34] ss:$8 sps:$4 sm:$0xff]  }
 0x125   :  { %1640 = vmatpush1.bf16.msra.mxu0 %v6106_v20  ;;  %1804 = vmatpush1.bf16.msra.mxu1 %v6109_v21  ;;  %v6248_v20 = vld [vmem:[#allocation7 + $0x30] ss:$8 sps:$4 sm:$0xff]   ;;  %v6253_v21 = vld [vmem:[#allocation7 + $0x44] ss:$8 sps:$4 sm:$0xff]  }
 0x126   :  { %1641 = vmatprep.subr.bf16.mxu0 %v6114_v11  ;;  %1805 = vmatprep.subr.bf16.mxu1 %v6117_v23  ;;  %v6251_v11 = vld [vmem:[#allocation7 + $0x40] ss:$8 sps:$4 sm:$0xff]   ;;  %v6256_v23 = vld [vmem:[#allocation7 + $0x54] ss:$8 sps:$4 sm:$0xff]  }
 0x129   :  { %1642 = vmatpush1.bf16.msra.mxu0 %v6112_v24  ;;  %1806 = vmatpush1.bf16.msra.mxu1 %v6115_v25  ;;  %v6254_v24 = vld [vmem:[#allocation7 + $0x50] ss:$8 sps:$4 sm:$0xff]   ;;  %v6259_v25 = vld [vmem:[#allocation7 + $0x64] ss:$8 sps:$4 sm:$0xff]  }
 0x12a   :  { %1643 = vmatprep.subr.bf16.mxu0 %v6120_v26  ;;  %1807 = vmatprep.subr.bf16.mxu1 %v6123_v27  ;;  %v6257_v26 = vld [vmem:[#allocation7 + $0x60] ss:$8 sps:$4 sm:$0xff]   ;;  %v6262_v27 = vld [vmem:[#allocation7 + $0x74] ss:$8 sps:$4 sm:$0xff]  }
 0x12d   :  { %1644 = vmatpush1.bf16.msra.mxu0 %v6118_v28  ;;  %1808 = vmatpush1.bf16.msra.mxu1 %v6121_v29  ;;  %v6260_v28 = vld [vmem:[#allocation7 + $0x70] ss:$8 sps:$4 sm:$0xff]   ;;  %v6265_v29 = vld [vmem:[#allocation7 + $0x84] ss:$8 sps:$4 sm:$0xff]  }
 0x12e   :  { %1645 = vmatprep.subr.bf16.mxu0 %v6126_v30  ;;  %1809 = vmatprep.subr.bf16.mxu1 %v6129_v31  ;;  %v6263_v30 = vld [vmem:[#allocation7 + $0x80] ss:$8 sps:$4 sm:$0xff]   ;;  %v6268_v31 = vld [vmem:[#allocation7 + $0x94] ss:$8 sps:$4 sm:$0xff]  }
 0x131   :  { %1646 = vmatpush1.bf16.msra.mxu0 %v6124_v32  ;;  %1810 = vmatpush1.bf16.msra.mxu1 %v6127_v33  ;;  %v6266_v32 = vld [vmem:[#allocation7 + $0x90] ss:$8 sps:$4 sm:$0xff]   ;;  %v6271_v33 = vld [vmem:[#allocation7 + $0xa4] ss:$8 sps:$4 sm:$0xff]  }
 0x132   :  { %1647 = vmatprep.subr.bf16.mxu0 %v6132_v34  ;;  %1811 = vmatprep.subr.bf16.mxu1 %v6135_v35  ;;  %v6269_v34 = vld [vmem:[#allocation7 + $0xa0] ss:$8 sps:$4 sm:$0xff]   ;;  %v347_v35 = vlaneseq }
 0x135   :  { %1648 = vmatpush1.bf16.msra.mxu0 %v6130_v36  ;;  %1812 = vmatpush1.bf16.msra.mxu1 %v6133_v37  ;;  %v6274_v36 = vld [vmem:[#allocation7 + $0xb4] ss:$8 sps:$4 sm:$0xff]   ;;  %v6272_v37 = vld [vmem:[#allocation7 + $0xb0] ss:$8 sps:$4 sm:$0xff]  }
 0x136   :  { %1649 = vmatprep.subr.bf16.mxu0 %v6138_v38  ;;  %1813 = vmatprep.subr.bf16.mxu1 %v6141_v39  ;;  %v7077_v38 = vshrl.u32 %v347_v35, 7  ;;  %v6277_v39 = vld [vmem:[#allocation7 + $0xc4] ss:$8 sps:$4 sm:$0xff]  }
 0x139   :  { %1650 = vmatpush1.bf16.msra.mxu0 %v6136_v40  ;;  %1814 = vmatpush1.bf16.msra.mxu1 %v6139_v41  ;;  %v6275_v40 = vld [vmem:[#allocation7 + $0xc0] ss:$8 sps:$4 sm:$0xff]   ;;  %v7080_v41 = vsub.s32 0, %v7077_v38 }
 0x13a   :  { %2244 = vmatprep.subr.bf16.mxu0 %v6145_v42  ;;  %2534 = vmatprep.subr.bf16.mxu1 %v6241_v14  ;;  %v6280_v42 = vld [vmem:[#allocation7 + $0xd4] ss:$8 sps:$4 sm:$0xff]   ;;  %v6206_v14 = vld [vmem:[#allocation5 + $0x150] ss:$8 sps:$4 sm:$0xff]  }
 0x13c   :  { %1668 = vmatmul.mubr.bf16.vlgmr.msra.gmra.mrb[0].mxu0 %v6142_v43  ;;  %1832 = vmatmul.mubr.bf16.vlgmr.msra.gmra.mrb[0].mxu1 %v6142_v43  ;;  %v7085_v43 = vld [vmem:[%s7248_s3] sm:$0xf] }
 0x13d   :  { %2245 = vmatpush1.bf16.msra.mxu0 %v6143_v44  ;;  %2535 = vmatpush1.bf16.msra.mxu1 %v6239_v13  ;;  %v7088_v44 = vsub.s32 1, %v7077_v38  ;;  %v6208_v13 = vld [vmem:[#allocation5 + $0x154] ss:$8 sps:$4 sm:$0xff]  }
 0x13e   :  { %2246 = vmatprep.subr.bf16.mxu0 %v6148_v45  ;;  %2536 = vmatprep.subr.bf16.mxu1 %v6244_v15  ;;  %v7091_v45 = vsub.s32 3, %v7077_v38  ;;  %v6211_v15 = vld [vmem:[#allocation5 + $0x164] ss:$8 sps:$4 sm:$0xff]  }
 0x141   :  { %2247 = vmatpush1.bf16.msra.mxu0 %v6146_v46  ;;  %2537 = vmatpush1.bf16.msra.mxu1 %v6242_v16  ;;  %v6278_v46 = vld [vmem:[#allocation7 + $0xd0] ss:$8 sps:$4 sm:$0xff]   ;;  %v6209_v16 = vld [vmem:[#allocation5 + $0x160] ss:$8 sps:$4 sm:$0xff]  }
 0x142   :  { %2248 = vmatprep.subr.bf16.mxu0 %v6151_v47  ;;  %2538 = vmatprep.subr.bf16.mxu1 %v6247_v17  ;;  %v350_v47 = vrot.slane %v7085_v43, %v7080_v41  ;;  %v6214_v17 = vld [vmem:[#allocation5 + $0x174] ss:$8 sps:$4 sm:$0xff]  }
 0x145   :  { %2249 = vmatpush1.bf16.msra.mxu0 %v6149_v48  ;;  %2539 = vmatpush1.bf16.msra.mxu1 %v6245_v18  ;;  %v354_v48 = vrot.slane %v7085_v43, %v7088_v44  ;;  %v6212_v18 = vld [vmem:[#allocation5 + $0x170] ss:$8 sps:$4 sm:$0xff]  }
 0x146   :  { %2250 = vmatprep.subr.bf16.mxu0 %v6154_v49  ;;  %2540 = vmatprep.subr.bf16.mxu1 %v6250_v19  ;;  %v362_v49 = vrot.slane %v7085_v43, %v7091_v45  ;;  %v6217_v19 = vld [vmem:[#allocation5 + $0x184] ss:$8 sps:$4 sm:$0xff]  }
 0x149   :  { %2251 = vmatpush1.bf16.msra.mxu0 %v6152_v50  ;;  %2541 = vmatpush1.bf16.msra.mxu1 %v6248_v20  ;;  %v6215_v20 = vld [vmem:[#allocation5 + $0x180] ss:$8 sps:$4 sm:$0xff]  }
 0x14a   :  { %2252 = vmatprep.subr.bf16.mxu0 %v6157_v51  ;;  %2542 = vmatprep.subr.bf16.mxu1 %v6253_v21  ;;  %v6220_v21 = vld [vmem:[#allocation5 + $0x194] ss:$8 sps:$4 sm:$0xff]  }
 0x14d   :  { %2253 = vmatpush1.bf16.msra.mxu0 %v6155_v52  ;;  %2543 = vmatpush1.bf16.msra.mxu1 %v6251_v11  ;;  %v6218_v11 = vld [vmem:[#allocation5 + $0x190] ss:$8 sps:$4 sm:$0xff]  }
 0x14e   :  { %2254 = vmatprep.subr.bf16.mxu0 %v6160_v53  ;;  %2544 = vmatprep.subr.bf16.mxu1 %v6256_v23  ;;  %v6223_v23 = vld [vmem:[#allocation5 + $0x1a4] ss:$8 sps:$4 sm:$0xff]  }
 0x151   :  { %2255 = vmatpush1.bf16.msra.mxu0 %v6158_v54  ;;  %2545 = vmatpush1.bf16.msra.mxu1 %v6254_v24  ;;  %v6221_v24 = vld [vmem:[#allocation5 + $0x1a0] ss:$8 sps:$4 sm:$0xff]  }
 0x152   :  { %2256 = vmatprep.subr.bf16.mxu0 %v6163_v55  ;;  %2546 = vmatprep.subr.bf16.mxu1 %v6259_v25  ;;  %v6226_v25 = vld [vmem:[#allocation5 + $0x1b4] ss:$8 sps:$4 sm:$0xff]  }
 0x155   :  { %2257 = vmatpush1.bf16.msra.mxu0 %v6161_v56  ;;  %2547 = vmatpush1.bf16.msra.mxu1 %v6257_v26  ;;  %v6224_v26 = vld [vmem:[#allocation5 + $0x1b0] ss:$8 sps:$4 sm:$0xff]  }
 0x156   :  { %2258 = vmatprep.subr.bf16.mxu0 %v6166_v57  ;;  %2548 = vmatprep.subr.bf16.mxu1 %v6262_v27  ;;  %v6229_v27 = vld [vmem:[#allocation5 + $0x1c4] ss:$8 sps:$4 sm:$0xff]  }
 0x159   :  { %2259 = vmatpush1.bf16.msra.mxu0 %v6164_v58  ;;  %2549 = vmatpush1.bf16.msra.mxu1 %v6260_v28  ;;  %v6227_v28 = vld [vmem:[#allocation5 + $0x1c0] ss:$8 sps:$4 sm:$0xff]  }
 0x15a   :  { %2260 = vmatprep.subr.bf16.mxu0 %v6169_v59  ;;  %2550 = vmatprep.subr.bf16.mxu1 %v6265_v29  ;;  %v7102_v29 = vsub.s32 2, %v7077_v38 }
 0x15d   :  { %2261 = vmatpush1.bf16.msra.mxu0 %v6167_v60  ;;  %2551 = vmatpush1.bf16.msra.mxu1 %v6263_v30  ;;  %v6232_v30 = vld [vmem:[#allocation5 + $0x1d4] ss:$8 sps:$4 sm:$0xff]  }
 0x15e   :  { %2262 = vmatprep.subr.bf16.mxu0 %v6172_v61  ;;  %2552 = vmatprep.subr.bf16.mxu1 %v6268_v31  ;;  %v6230_v31 = vld [vmem:[#allocation5 + $0x1d0] ss:$8 sps:$4 sm:$0xff]  }
 0x161   :  { %2263 = vmatpush1.bf16.msra.mxu0 %v6170_v62  ;;  %2553 = vmatpush1.bf16.msra.mxu1 %v6266_v32  ;;  %v358_v32 = vrot.slane %v7085_v43, %v7102_v29  ;;  %v6286_v43 = vld [vmem:[#allocation7 + $0xf4] ss:$8 sps:$4 sm:$0xff]  }
 0x162   :  { %2264 = vmatprep.subr.bf16.mxu0 %v6175_v63  ;;  %2554 = vmatprep.subr.bf16.mxu1 %v6271_v33  ;;  %v6235_v33 = vld [vmem:[#allocation5 + $0x1e4] ss:$8 sps:$4 sm:$0xff]  }
 0x165   :  { %2265 = vmatpush1.bf16.msra.mxu0 %v6173_v0  ;;  %2555 = vmatpush1.bf16.msra.mxu1 %v6269_v34  ;;  %v6233_v34 = vld [vmem:[#allocation5 + $0x1e0] ss:$8 sps:$4 sm:$0xff]  }
 0x166   :  { %2266 = vmatprep.subr.bf16.mxu0 %v6178_v1  ;;  %2556 = vmatprep.subr.bf16.mxu1 %v6274_v36  ;;  %v6191_v1 = vld [vmem:[#allocation5 + $0x100] ss:$8 sps:$4 sm:$0xff]   ;;  %v6238_v36 = vld [vmem:[#allocation5 + $0x1f4] ss:$8 sps:$4 sm:$0xff]  }
 0x169   :  { %2267 = vmatpush1.bf16.msra.mxu0 %v6176_v2  ;;  %2557 = vmatpush1.bf16.msra.mxu1 %v6272_v37  ;;  %v6236_v37 = vld [vmem:[#allocation5 + $0x1f0] ss:$8 sps:$4 sm:$0xff]  }
 0x16a   :  { %2268 = vmatprep.subr.bf16.mxu0 %v6181_v3  ;;  %2558 = vmatprep.subr.bf16.mxu1 %v6277_v39  ;;  %v6196_v3 = vld [vmem:[#allocation5 + $0x114] ss:$8 sps:$4 sm:$0xff]  }
 0x16d   :  { %2269 = vmatpush1.bf16.msra.mxu0 %v6179_v4  ;;  %2559 = vmatpush1.bf16.msra.mxu1 %v6275_v40 }
 0x16e   :  { %2270 = vmatprep.subr.bf16.mxu0 %v6184_v5  ;;  %2560 = vmatprep.subr.bf16.mxu1 %v6280_v42  ;;  %v6194_v5 = vld [vmem:[#allocation5 + $0x110] ss:$8 sps:$4 sm:$0xff]   ;;  %v6283_v42 = vld [vmem:[#allocation7 + $0xe4] ss:$8 sps:$4 sm:$0xff]  }
 0x171   :  { %2271 = vmatpush1.bf16.msra.mxu0 %v6182_v6  ;;  %2561 = vmatpush1.bf16.msra.mxu1 %v6278_v46  ;;  %v6199_v6 = vld [vmem:[#allocation5 + $0x124] ss:$8 sps:$4 sm:$0xff]   ;;  %v6281_v46 = vld [vmem:[#allocation7 + $0xe0] ss:$8 sps:$4 sm:$0xff]  }
 0x172   :  { %2272 = vmatprep.subr.bf16.mxu0 %v6187_v7  ;;  %v6197_v7 = vld [vmem:[#allocation5 + $0x120] ss:$8 sps:$4 sm:$0xff]   ;;  %2562 = vmatprep.subr.bf16.mxu1 %v6283_v42 }
 0x173   :  { %v6386_v42 = vld [vmem:[#allocation8 + $0x188] ss:$16 sps:$4 sm:$0xff]  }
 0x175   :  { %2273 = vmatpush1.bf16.msra.mxu0 %v6185_v8  ;;  %v6202_v8 = vld [vmem:[#allocation5 + $0x134] ss:$8 sps:$4 sm:$0xff]   ;;  %2563 = vmatpush1.bf16.msra.mxu1 %v6281_v46 }
 0x176   :  { %2274 = vmatprep.subr.bf16.mxu0 %v6190_v9  ;;  %v6200_v9 = vld [vmem:[#allocation5 + $0x130] ss:$8 sps:$4 sm:$0xff]   ;;  %2564 = vmatprep.subr.bf16.mxu1 %v6286_v43  ;;  %v6394_v46 = vld [vmem:[#allocation8 + $0x1ac] ss:$16 sps:$4 sm:$0xff]  }
 0x177   :  { %v6392_v43 = vld [vmem:[#allocation8 + $0x1a8] ss:$16 sps:$4 sm:$0xff]  }
 0x179   :  { %2275 = vmatpush1.bf16.msra.mxu0 %v6188_v10  ;;  %v6205_v10 = vld [vmem:[#allocation5 + $0x144] ss:$8 sps:$4 sm:$0xff]  }
 0x17a   :  { %2285 = vmatprep.subr.bf16.mxu0 %v6193_v12  ;;  %v6203_v12 = vld [vmem:[#allocation5 + $0x140] ss:$8 sps:$4 sm:$0xff]  }
 0x20f   :  { %v1669_v50 = vpop.f32.mrb[0].mxu0  ;;  %v7099_v51 = vpop.f32.mrb[0].mxu1 }
 0x210   :  { %v5735_v52 = vadd.f32 %v1669_v50, %v350_v47  ;;  %v1671_v53 = vpop.f32.mrb[1].mxu0  ;;  %v1835_v54 = vpop.f32.mrb[1].mxu1  ;;  %v5737_v35 = vadd.f32 %v7099_v51, %v358_v32  ;;  %v6284_v47 = vld [vmem:[#allocation7 + $0xf0] ss:$8 sps:$4 sm:$0xff]  }
 0x211   :  { %v5736_v55 = vadd.f32 %v1671_v53, %v354_v48  ;;  %v5738_v56 = vadd.f32 %v1835_v54, %v362_v49  ;;  %v1673_v57 = vpop.f32.mrb[2].mxu0  ;;  %v1837_v58 = vpop.f32.mrb[2].mxu1  ;;  %2565 = vmatpush1.bf16.msra.mxu1 %v6284_v47  ;;  %v6289_v48 = vld [vmem:[%s7253_s8 + $0x4] ss:$8 sps:$4 sm:$0xff]   ;;  %v1912_v49 = vld [vmem:[%s7250_s5] sm:$0x3] }
 0x212   :  { %v1840_v59 = vmax.f32 %v5735_v52, 0.0  ;;  %v1674_v60 = vpop.f32.mrb[3].mxu0  ;;  %v1838_v61 = vpop.f32.mrb[3].mxu1  ;;  %v1842_v39 = vmax.f32 %v5737_v35, 0.0  ;;  %2689 = vmatprep.subr.bf16.mxu1 %v6289_v48  ;;  %v1917_v50 = vrot.slane %v1912_v49, %v7080_v41  ;;  %v1921_v51 = vrot.slane %v1912_v49, %v7088_v44  ;;  %v6362_v32 = vld [vmem:[#allocation8 + $0x108] ss:$16 sps:$4 sm:$0xff]  }
 0x213   :  { %v1841_v62 = vmax.f32 %v5736_v55, 0.0  ;;  %v1843_v63 = vmax.f32 %v5738_v56, 0.0  ;;  %v6287_v61 = vld [vmem:[%s7253_s8] ss:$8 sps:$4 sm:$0xff]   ;;  %v6376_v35 = vld [vmem:[#allocation8 + $0x14c] ss:$16 sps:$4 sm:$0xff]  }
 0x214   :  { %v1844_v2 = vpack.c.bf16 %v1840_v59, %v1840_v59  ;;  %v1846_v40 = vpack.c.bf16 %v1842_v39, %v1842_v39  ;;  %v6380_v39 = vld [vmem:[#allocation8 + $0x168] ss:$16 sps:$4 sm:$0xff]   ;;  %v2362_v47 = vld [vmem:[%s7252_s7] sm:$0x3] }
 0x215   :  { %v1845_v0 = vpack.c.bf16 %v1841_v62, %v1841_v62  ;;  %v1847_v4 = vpack.c.bf16 %v1843_v63, %v1843_v63  ;;  %v6292_v63 = vld [vmem:[%s7253_s8 + $0x14] ss:$8 sps:$4 sm:$0xff]   ;;  %v2371_v48 = vrot.slane %v2362_v47, %v7088_v44 }
 0x217   :  { %2276 = vmatprep.mubr.bf16.mxu0 %v1845_v0  ;;  %v6290_v0 = vld [vmem:[%s7253_s8 + $0x10] ss:$8 sps:$4 sm:$0xff]  }
 0x218   :  { %2277 = vmatmul.mubr.bf16.vlgmr.msra.gmra.mrb[4].mxu0 %v1844_v2  ;;  %v6293_v2 = vld [vmem:[%s7253_s8 + $0x20] ss:$8 sps:$4 sm:$0xff]  }
 0x219   :  { %2286 = vmatpush1.bf16.msra.mxu0 %v6191_v1  ;;  %2317 = vmatprep.mubr.bf16.mxu0 %v1847_v4  ;;  %v6295_v1 = vld [vmem:[%s7253_s8 + $0x24] ss:$8 sps:$4 sm:$0xff]  }
 0x21a   :  { %2287 = vmatprep.subr.bf16.mxu0 %v6196_v3  ;;  %v6298_v3 = vld [vmem:[%s7253_s8 + $0x34] ss:$8 sps:$4 sm:$0xff]   ;;  %v6301_v4 = vld [vmem:[%s7253_s8 + $0x44] ss:$8 sps:$4 sm:$0xff]  }
 0x21d   :  { %2288 = vmatpush1.bf16.msra.mxu0 %v6194_v5  ;;  %v6299_v5 = vld [vmem:[%s7253_s8 + $0x40] ss:$8 sps:$4 sm:$0xff]  }
 0x21e   :  { %2289 = vmatprep.subr.bf16.mxu0 %v6199_v6  ;;  %v6304_v6 = vld [vmem:[%s7253_s8 + $0x54] ss:$8 sps:$4 sm:$0xff]  }
 0x221   :  { %2290 = vmatpush1.bf16.msra.mxu0 %v6197_v7  ;;  %v6302_v7 = vld [vmem:[%s7253_s8 + $0x50] ss:$8 sps:$4 sm:$0xff]  }
 0x222   :  { %2291 = vmatprep.subr.bf16.mxu0 %v6202_v8  ;;  %v6307_v8 = vld [vmem:[%s7253_s8 + $0x64] ss:$8 sps:$4 sm:$0xff]  }
 0x225   :  { %2292 = vmatpush1.bf16.msra.mxu0 %v6200_v9  ;;  %v6305_v9 = vld [vmem:[%s7253_s8 + $0x60] ss:$8 sps:$4 sm:$0xff]  }
 0x226   :  { %2293 = vmatprep.subr.bf16.mxu0 %v6205_v10  ;;  %v6310_v10 = vld [vmem:[%s7253_s8 + $0x74] ss:$8 sps:$4 sm:$0xff]  }
 0x229   :  { %2294 = vmatpush1.bf16.msra.mxu0 %v6203_v12  ;;  %v6308_v12 = vld [vmem:[%s7253_s8 + $0x70] ss:$8 sps:$4 sm:$0xff]  }
 0x22a   :  { %2295 = vmatprep.subr.bf16.mxu0 %v6208_v13  ;;  %v6313_v13 = vld [vmem:[#allocation8 + $0x4] ss:$16 sps:$4 sm:$0xff]  }
 0x22d   :  { %2296 = vmatpush1.bf16.msra.mxu0 %v6206_v14  ;;  %v6314_v14 = vld [vmem:[#allocation8 + $0x8] ss:$16 sps:$4 sm:$0xff]  }
 0x22e   :  { %2297 = vmatprep.subr.bf16.mxu0 %v6211_v15  ;;  %v6316_v15 = vld [vmem:[#allocation8 + $0xc] ss:$16 sps:$4 sm:$0xff]  }
 0x231   :  { %2298 = vmatpush1.bf16.msra.mxu0 %v6209_v16  ;;  %v6322_v16 = vld [vmem:[#allocation8 + $0x2c] ss:$16 sps:$4 sm:$0xff]  }
 0x232   :  { %2299 = vmatprep.subr.bf16.mxu0 %v6214_v17  ;;  %v6320_v17 = vld [vmem:[#allocation8 + $0x28] ss:$16 sps:$4 sm:$0xff]  }
 0x235   :  { %2300 = vmatpush1.bf16.msra.mxu0 %v6212_v18  ;;  %v6328_v18 = vld [vmem:[#allocation8 + $0x4c] ss:$16 sps:$4 sm:$0xff]  }
 0x236   :  { %2301 = vmatprep.subr.bf16.mxu0 %v6217_v19  ;;  %v6326_v19 = vld [vmem:[#allocation8 + $0x48] ss:$16 sps:$4 sm:$0xff]  }
 0x239   :  { %2302 = vmatpush1.bf16.msra.mxu0 %v6215_v20  ;;  %v6334_v20 = vld [vmem:[#allocation8 + $0x6c] ss:$16 sps:$4 sm:$0xff]  }
 0x23a   :  { %2303 = vmatprep.subr.bf16.mxu0 %v6220_v21  ;;  %v6332_v21 = vld [vmem:[#allocation8 + $0x68] ss:$16 sps:$4 sm:$0xff]  }
 0x23d   :  { %2304 = vmatpush1.bf16.msra.mxu0 %v6218_v11  ;;  %v6340_v11 = vld [vmem:[#allocation8 + $0x8c] ss:$16 sps:$4 sm:$0xff]  }
 0x23e   :  { %2305 = vmatprep.subr.bf16.mxu0 %v6223_v23  ;;  %v6338_v23 = vld [vmem:[#allocation8 + $0x88] ss:$16 sps:$4 sm:$0xff]  }
 0x241   :  { %2306 = vmatpush1.bf16.msra.mxu0 %v6221_v24  ;;  %v6346_v24 = vld [vmem:[#allocation8 + $0xac] ss:$16 sps:$4 sm:$0xff]  }
 0x242   :  { %2307 = vmatprep.subr.bf16.mxu0 %v6226_v25  ;;  %v6344_v25 = vld [vmem:[#allocation8 + $0xa8] ss:$16 sps:$4 sm:$0xff]  }
 0x245   :  { %2308 = vmatpush1.bf16.msra.mxu0 %v6224_v26  ;;  %v6352_v26 = vld [vmem:[#allocation8 + $0xcc] ss:$16 sps:$4 sm:$0xff]  }
 0x246   :  { %2309 = vmatprep.subr.bf16.mxu0 %v6229_v27  ;;  %v6350_v27 = vld [vmem:[#allocation8 + $0xc8] ss:$16 sps:$4 sm:$0xff]  }
 0x249   :  { %2310 = vmatpush1.bf16.msra.mxu0 %v6227_v28  ;;  %v6358_v28 = vld [vmem:[#allocation8 + $0xec] ss:$16 sps:$4 sm:$0xff]  }
 0x24a   :  { %2311 = vmatprep.subr.bf16.mxu0 %v6232_v30  ;;  %v6356_v30 = vld [vmem:[#allocation8 + $0xe8] ss:$16 sps:$4 sm:$0xff]  }
 0x24d   :  { %2312 = vmatpush1.bf16.msra.mxu0 %v6230_v31  ;;  %v6364_v31 = vld [vmem:[#allocation8 + $0x10c] ss:$16 sps:$4 sm:$0xff]  }
 0x24e   :  { %2313 = vmatprep.subr.bf16.mxu0 %v6235_v33  ;;  %v6370_v33 = vld [vmem:[#allocation8 + $0x12c] ss:$16 sps:$4 sm:$0xff]  }
 0x251   :  { %2314 = vmatpush1.bf16.msra.mxu0 %v6233_v34  ;;  %v6368_v34 = vld [vmem:[#allocation8 + $0x128] ss:$16 sps:$4 sm:$0xff]  }
 0x252   :  { %2315 = vmatprep.subr.bf16.mxu0 %v6238_v36  ;;  %v6374_v36 = vld [vmem:[#allocation8 + $0x148] ss:$16 sps:$4 sm:$0xff]  }
 0x255   :  { %2316 = vmatpush1.bf16.msra.mxu0 %v6236_v37  ;;  %v6382_v37 = vld [vmem:[#allocation8 + $0x16c] ss:$16 sps:$4 sm:$0xff]  }
 0x256   :  { %3181 = vmatprep.subr.bf16.mxu0 %v6316_v15  ;;  %v6367_v15 = vld [vmem:[#allocation8 + $0x124] ss:$16 sps:$4 sm:$0xff]  }
 0x258   :  { %2318 = vmatmul.mubr.bf16.vlgmr.msra.gmra.mrb[4].mxu0 %v1846_v40  ;;  %v6388_v40 = vld [vmem:[#allocation8 + $0x18c] ss:$16 sps:$4 sm:$0xff]  }
 0x259   :  { %3182 = vmatpush1.bf16.msra.mxu0 %v6314_v14  ;;  %v6359_v14 = vld [vmem:[#allocation8 + $0x100] ss:$16 sps:$4 sm:$0xff]  }
 0x25a   :  { %3183 = vmatprep.subr.bf16.mxu0 %v6322_v16  ;;  %v6365_v16 = vld [vmem:[#allocation8 + $0x120] ss:$16 sps:$4 sm:$0xff]  }
 0x25d   :  { %3184 = vmatpush1.bf16.msra.mxu0 %v6320_v17  ;;  %v6373_v17 = vld [vmem:[#allocation8 + $0x144] ss:$16 sps:$4 sm:$0xff]  }
 0x25e   :  { %3185 = vmatprep.subr.bf16.mxu0 %v6328_v18  ;;  %v6371_v18 = vld [vmem:[#allocation8 + $0x140] ss:$16 sps:$4 sm:$0xff]  }
 0x261   :  { %3186 = vmatpush1.bf16.msra.mxu0 %v6326_v19  ;;  %v6379_v19 = vld [vmem:[#allocation8 + $0x164] ss:$16 sps:$4 sm:$0xff]  }
 0x262   :  { %3187 = vmatprep.subr.bf16.mxu0 %v6334_v20  ;;  %v6377_v20 = vld [vmem:[#allocation8 + $0x160] ss:$16 sps:$4 sm:$0xff]  }
 0x265   :  { %3188 = vmatpush1.bf16.msra.mxu0 %v6332_v21  ;;  %v6385_v21 = vld [vmem:[#allocation8 + $0x184] ss:$16 sps:$4 sm:$0xff]  }
 0x266   :  { %3189 = vmatprep.subr.bf16.mxu0 %v6340_v11  ;;  %v6383_v11 = vld [vmem:[#allocation8 + $0x180] ss:$16 sps:$4 sm:$0xff]  }
 0x269   :  { %3190 = vmatpush1.bf16.msra.mxu0 %v6338_v23  ;;  %v6391_v23 = vld [vmem:[#allocation8 + $0x1a4] ss:$16 sps:$4 sm:$0xff]  }
 0x26a   :  { %3191 = vmatprep.subr.bf16.mxu0 %v6346_v24  ;;  %v6389_v24 = vld [vmem:[#allocation8 + $0x1a0] ss:$16 sps:$4 sm:$0xff]  }
 0x26d   :  { %3192 = vmatpush1.bf16.msra.mxu0 %v6344_v25  ;;  %v6397_v25 = vld [vmem:[#allocation8 + $0x1c4] ss:$16 sps:$4 sm:$0xff]  }
 0x26e   :  { %3193 = vmatprep.subr.bf16.mxu0 %v6352_v26  ;;  %v6400_v26 = vld [vmem:[#allocation8 + $0x1cc] ss:$16 sps:$4 sm:$0xff]  }
 0x271   :  { %3194 = vmatpush1.bf16.msra.mxu0 %v6350_v27  ;;  %v6395_v27 = vld [vmem:[#allocation8 + $0x1c0] ss:$16 sps:$4 sm:$0xff]  }
 0x272   :  { %3195 = vmatprep.subr.bf16.mxu0 %v6358_v28  ;;  %v6398_v28 = vld [vmem:[#allocation8 + $0x1c8] ss:$16 sps:$4 sm:$0xff]  }
 0x275   :  { %3196 = vmatpush1.bf16.msra.mxu0 %v6356_v30  ;;  %v6403_v30 = vld [vmem:[#allocation8 + $0x1e4] ss:$16 sps:$4 sm:$0xff]  }
 0x276   :  { %3197 = vmatprep.subr.bf16.mxu0 %v6364_v31  ;;  %v6406_v31 = vld [vmem:[#allocation8 + $0x1ec] ss:$16 sps:$4 sm:$0xff]  }
 0x279   :  { %3198 = vmatpush1.bf16.msra.mxu0 %v6362_v32  ;;  %v6401_v32 = vld [vmem:[#allocation8 + $0x1e0] ss:$16 sps:$4 sm:$0xff]  }
 0x27a   :  { %3199 = vmatprep.subr.bf16.mxu0 %v6370_v33  ;;  %v6404_v33 = vld [vmem:[#allocation8 + $0x1e8] ss:$16 sps:$4 sm:$0xff]  }
 0x27d   :  { %3200 = vmatpush1.bf16.msra.mxu0 %v6368_v34  ;;  %v6409_v34 = vld [vmem:[#allocation10 + $0x4] ss:$28 sps:$4 sm:$0xff]  }
 0x27e   :  { %3201 = vmatprep.subr.bf16.mxu0 %v6376_v35  ;;  %v6412_v35 = vld [vmem:[#allocation10 + $0xc] ss:$28 sps:$4 sm:$0xff]  }
 0x281   :  { %3202 = vmatpush1.bf16.msra.mxu0 %v6374_v36  ;;  %v2597_v36 = vld [vmem:[%s7254_s9] sm:$0x3] }
 0x282   :  { %3203 = vmatprep.subr.bf16.mxu0 %v6382_v37  ;;  %v2602_v37 = vrot.slane %v2597_v36, %v7080_v41 }
 0x285   :  { %3204 = vmatpush1.bf16.msra.mxu0 %v6380_v39  ;;  %v2606_v39 = vrot.slane %v2597_v36, %v7088_v44  ;;  %v6481_v36 = vld [vmem:[#allocation10 + $0x2a4] ss:$28 sps:$4 sm:$0xff]  }
 0x286   :  { %3205 = vmatprep.subr.bf16.mxu0 %v6388_v40 }
 0x289   :  { %3206 = vmatpush1.bf16.msra.mxu0 %v6386_v42 }
 0x28a   :  { %3207 = vmatprep.subr.bf16.mxu0 %v6394_v46 }
 0x28d   :  { %3208 = vmatpush1.bf16.msra.mxu0 %v6392_v43 }
 0x28e   :  { %3209 = vmatprep.subr.bf16.mxu0 %v6400_v26  ;;  %v6464_v26 = vld [vmem:[#allocation10 + $0x200] ss:$28 sps:$4 sm:$0xff]  }
 0x291   :  { %3210 = vmatpush1.bf16.msra.mxu0 %v6398_v28  ;;  %v6472_v28 = vld [vmem:[#allocation10 + $0x23c] ss:$28 sps:$4 sm:$0xff]  }
 0x292   :  { %3211 = vmatprep.subr.bf16.mxu0 %v6406_v31  ;;  %v6470_v31 = vld [vmem:[#allocation10 + $0x238] ss:$28 sps:$4 sm:$0xff]  }
 0x295   :  { %3212 = vmatpush1.bf16.msra.mxu0 %v6404_v33  ;;  %v6478_v33 = vld [vmem:[#allocation10 + $0x274] ss:$28 sps:$4 sm:$0xff]  }
 0x296   :  { %4757 = vmatprep.subr.bf16.mxu0 %v6412_v35  ;;  %v6476_v35 = vld [vmem:[#allocation10 + $0x270] ss:$28 sps:$4 sm:$0xff]  }
 0x32b   :  { %v2319_v52 = vpop.f32.mrb[4].mxu0 }
 0x32c   :  { %v5739_v53 = vadd.f32 %v2319_v52, %v1917_v50  ;;  %v2321_v54 = vpop.f32.mrb[5].mxu0 }
 0x32d   :  { %v5740_v55 = vadd.f32 %v2321_v54, %v1921_v51  ;;  %v2323_v56 = vpop.f32.mrb[6].mxu0 }
 0x32e   :  { %v2326_v57 = vmax.f32 %v5739_v53, 0.0  ;;  %v2324_v58 = vpop.f32.mrb[7].mxu0  ;;  %v2577_v56 = vld [vmem:[%s7246_s1] sm:$0xff] }
 0x32f   :  { %v2327_v59 = vmax.f32 %v5740_v55, 0.0  ;;  %v2367_v55 = vrot.slane %v2362_v47, %v7080_v41 }
 0x330   :  { %v2328_v62 = vpack.c.bf16 %v2326_v57, %v2326_v57 }
 0x331   :  { %v2329_v60 = vpack.c.bf16 %v2327_v59, %v2327_v59 }
 0x333   :  { %2566 = vmatprep.mubr.bf16.mxu1 %v2329_v60 }
 0x334   :  { %2567 = vmatmul.mubr.bf16.vlgmr.msra.gmra.mrb[4].mxu1 %v2328_v62 }
 0x335   :  { %2690 = vmatpush1.bf16.msra.mxu1 %v6287_v61  ;;  %2721 = vmatprep.mubr.bf16.mxu1 %v6908_v22  ;;  %v6296_v22 = vld [vmem:[%s7253_s8 + $0x30] ss:$8 sps:$4 sm:$0xff]  }
 0x336   :  { %2691 = vmatprep.subr.bf16.mxu1 %v6292_v63  ;;  %v6311_v61 = vld [vmem:[#allocation8] ss:$16 sps:$4 sm:$0xff]   ;;  %v6319_v63 = vld [vmem:[#allocation8 + $0x24] ss:$16 sps:$4 sm:$0xff]  }
 0x339   :  { %2692 = vmatpush1.bf16.msra.mxu1 %v6290_v0  ;;  %v6317_v0 = vld [vmem:[#allocation8 + $0x20] ss:$16 sps:$4 sm:$0xff]  }
 0x33a   :  { %2693 = vmatprep.subr.bf16.mxu1 %v6295_v1  ;;  %v6325_v1 = vld [vmem:[#allocation8 + $0x44] ss:$16 sps:$4 sm:$0xff]  }
 0x33d   :  { %2694 = vmatpush1.bf16.msra.mxu1 %v6293_v2  ;;  %v6323_v2 = vld [vmem:[#allocation8 + $0x40] ss:$16 sps:$4 sm:$0xff]  }
 0x33e   :  { %2695 = vmatprep.subr.bf16.mxu1 %v6298_v3  ;;  %v6331_v3 = vld [vmem:[#allocation8 + $0x64] ss:$16 sps:$4 sm:$0xff]  }
 0x341   :  { %2696 = vmatpush1.bf16.msra.mxu1 %v6296_v22  ;;  %v6329_v22 = vld [vmem:[#allocation8 + $0x60] ss:$16 sps:$4 sm:$0xff]  }
 0x342   :  { %2697 = vmatprep.subr.bf16.mxu1 %v6301_v4  ;;  %v6337_v4 = vld [vmem:[#allocation8 + $0x84] ss:$16 sps:$4 sm:$0xff]  }
 0x345   :  { %2698 = vmatpush1.bf16.msra.mxu1 %v6299_v5  ;;  %v6335_v5 = vld [vmem:[#allocation8 + $0x80] ss:$16 sps:$4 sm:$0xff]  }
 0x346   :  { %2699 = vmatprep.subr.bf16.mxu1 %v6304_v6  ;;  %v6343_v6 = vld [vmem:[#allocation8 + $0xa4] ss:$16 sps:$4 sm:$0xff]  }
 0x349   :  { %2700 = vmatpush1.bf16.msra.mxu1 %v6302_v7  ;;  %v6341_v7 = vld [vmem:[#allocation8 + $0xa0] ss:$16 sps:$4 sm:$0xff]  }
 0x34a   :  { %2701 = vmatprep.subr.bf16.mxu1 %v6307_v8  ;;  %v6349_v8 = vld [vmem:[#allocation8 + $0xc4] ss:$16 sps:$4 sm:$0xff]  }
 0x34d   :  { %2702 = vmatpush1.bf16.msra.mxu1 %v6305_v9  ;;  %v6347_v9 = vld [vmem:[#allocation8 + $0xc0] ss:$16 sps:$4 sm:$0xff]  }
 0x34e   :  { %2703 = vmatprep.subr.bf16.mxu1 %v6310_v10  ;;  %v6355_v10 = vld [vmem:[#allocation8 + $0xe4] ss:$16 sps:$4 sm:$0xff]  }
 0x351   :  { %2704 = vmatpush1.bf16.msra.mxu1 %v6308_v12  ;;  %v6353_v12 = vld [vmem:[#allocation8 + $0xe0] ss:$16 sps:$4 sm:$0xff]  }
 0x352   :  { %3140 = vmatprep.subr.bf16.mxu1 %v6313_v13  ;;  %v6361_v13 = vld [vmem:[#allocation8 + $0x104] ss:$16 sps:$4 sm:$0xff]  }
 0x407   :  { %v2568_v49 = vpop.f32.mrb[4].mxu1 }
 0x408   :  { %v2570_v50 = vpop.f32.mrb[5].mxu1  ;;  %v2569_v58 = vadd.f32 %v2568_v49, %v2367_v55  ;;  %v6415_v55 = vld [vmem:[#allocation10 + $0x3c] ss:$28 sps:$4 sm:$0xff]  }
 0x409   :  { %v2571_v51 = vadd.f32 %v2570_v50, %v2371_v48  ;;  %v2572_v52 = vpop.f32.mrb[6].mxu1 }
 0x40a   :  { %v2573_v53 = vpop.f32.mrb[7].mxu1  ;;  %v6407_v52 = vld [vmem:[#allocation10] ss:$28 sps:$4 sm:$0xff]  }
 0x40b   :  { %v2575_v54 = vmul.f32 1.442695, %v2571_v51  ;;  %v6410_v53 = vld [vmem:[#allocation10 + $0x8] ss:$28 sps:$4 sm:$0xff]  }
 0x40d   :  { %6727 = vpow2.f32 %v2575_v54 }
 0x417   :  { %v6728_v57 = vpop.eup %6727 }
 0x418   :  { %v2578_v59 = vmul.f32 %v6728_v57, %v2577_v56  ;;  %v6418_v56 = vld [vmem:[#allocation10 + $0x44] ss:$28 sps:$4 sm:$0xff]   ;;  %v6413_v57 = vld [vmem:[#allocation10 + $0x38] ss:$28 sps:$4 sm:$0xff]  }
 0x41a   :  { %v2579_v60 = vadd.f32 %v2578_v59, %v2569_v58  ;;  %v6416_v58 = vld [vmem:[#allocation10 + $0x40] ss:$28 sps:$4 sm:$0xff]   ;;  %v6421_v59 = vld [vmem:[#allocation10 + $0x74] ss:$28 sps:$4 sm:$0xff]  }
 0x41c   :  { %v2580_v62 = vpack.c.bf16 %v2579_v60, %v2579_v60  ;;  %v6424_v60 = vld [vmem:[#allocation10 + $0x7c] ss:$28 sps:$4 sm:$0xff]  }
 0x41e   :  { %2722 = vmatmul.mubr.bf16.vlgmr.msra.gmra.mrb[8].mxu1 %v2580_v62  ;;  %v6422_v62 = vld [vmem:[#allocation10 + $0x78] ss:$28 sps:$4 sm:$0xff]  }
 0x41f   :  { %3141 = vmatpush1.bf16.msra.mxu1 %v6311_v61  ;;  %v6419_v61 = vld [vmem:[#allocation10 + $0x70] ss:$28 sps:$4 sm:$0xff]  }
 0x420   :  { %3142 = vmatprep.subr.bf16.mxu1 %v6319_v63  ;;  %v6427_v63 = vld [vmem:[#allocation10 + $0xac] ss:$28 sps:$4 sm:$0xff]  }
 0x423   :  { %3143 = vmatpush1.bf16.msra.mxu1 %v6317_v0  ;;  %v6430_v0 = vld [vmem:[#allocation10 + $0xb4] ss:$28 sps:$4 sm:$0xff]  }
 0x424   :  { %3144 = vmatprep.subr.bf16.mxu1 %v6325_v1  ;;  %v6425_v1 = vld [vmem:[#allocation10 + $0xa8] ss:$28 sps:$4 sm:$0xff]  }
 0x427   :  { %3145 = vmatpush1.bf16.msra.mxu1 %v6323_v2  ;;  %v6428_v2 = vld [vmem:[#allocation10 + $0xb0] ss:$28 sps:$4 sm:$0xff]  }
 0x428   :  { %3146 = vmatprep.subr.bf16.mxu1 %v6331_v3  ;;  %v6433_v3 = vld [vmem:[#allocation10 + $0xe4] ss:$28 sps:$4 sm:$0xff]  }
 0x42b   :  { %3147 = vmatpush1.bf16.msra.mxu1 %v6329_v22  ;;  %v6436_v22 = vld [vmem:[#allocation10 + $0xec] ss:$28 sps:$4 sm:$0xff]  }
 0x42c   :  { %3148 = vmatprep.subr.bf16.mxu1 %v6337_v4  ;;  %v6431_v4 = vld [vmem:[#allocation10 + $0xe0] ss:$28 sps:$4 sm:$0xff]  }
 0x42f   :  { %3149 = vmatpush1.bf16.msra.mxu1 %v6335_v5  ;;  %v6434_v5 = vld [vmem:[#allocation10 + $0xe8] ss:$28 sps:$4 sm:$0xff]  }
 0x430   :  { %3150 = vmatprep.subr.bf16.mxu1 %v6343_v6  ;;  %v6439_v6 = vld [vmem:[#allocation10 + $0x11c] ss:$28 sps:$4 sm:$0xff]  }
 0x433   :  { %3151 = vmatpush1.bf16.msra.mxu1 %v6341_v7  ;;  %v6442_v7 = vld [vmem:[#allocation10 + $0x124] ss:$28 sps:$4 sm:$0xff]  }
 0x434   :  { %3152 = vmatprep.subr.bf16.mxu1 %v6349_v8  ;;  %v6437_v8 = vld [vmem:[#allocation10 + $0x118] ss:$28 sps:$4 sm:$0xff]  }
 0x437   :  { %3153 = vmatpush1.bf16.msra.mxu1 %v6347_v9  ;;  %v6440_v9 = vld [vmem:[#allocation10 + $0x120] ss:$28 sps:$4 sm:$0xff]  }
 0x438   :  { %3154 = vmatprep.subr.bf16.mxu1 %v6355_v10  ;;  %v6445_v10 = vld [vmem:[#allocation10 + $0x154] ss:$28 sps:$4 sm:$0xff]  }
 0x43b   :  { %3155 = vmatpush1.bf16.msra.mxu1 %v6353_v12  ;;  %v6448_v12 = vld [vmem:[#allocation10 + $0x15c] ss:$28 sps:$4 sm:$0xff]  }
 0x43c   :  { %3156 = vmatprep.subr.bf16.mxu1 %v6361_v13  ;;  %v6443_v13 = vld [vmem:[#allocation10 + $0x150] ss:$28 sps:$4 sm:$0xff]  }
 0x43f   :  { %3157 = vmatpush1.bf16.msra.mxu1 %v6359_v14  ;;  %v6446_v14 = vld [vmem:[#allocation10 + $0x158] ss:$28 sps:$4 sm:$0xff]  }
 0x440   :  { %3158 = vmatprep.subr.bf16.mxu1 %v6367_v15  ;;  %v6451_v15 = vld [vmem:[#allocation10 + $0x18c] ss:$28 sps:$4 sm:$0xff]  }
 0x443   :  { %3159 = vmatpush1.bf16.msra.mxu1 %v6365_v16  ;;  %v6454_v16 = vld [vmem:[#allocation10 + $0x194] ss:$28 sps:$4 sm:$0xff]  }
 0x444   :  { %3160 = vmatprep.subr.bf16.mxu1 %v6373_v17  ;;  %v6449_v17 = vld [vmem:[#allocation10 + $0x188] ss:$28 sps:$4 sm:$0xff]  }
 0x447   :  { %3161 = vmatpush1.bf16.msra.mxu1 %v6371_v18  ;;  %v6452_v18 = vld [vmem:[#allocation10 + $0x190] ss:$28 sps:$4 sm:$0xff]  }
 0x448   :  { %3162 = vmatprep.subr.bf16.mxu1 %v6379_v19  ;;  %v6457_v19 = vld [vmem:[#allocation10 + $0x1c4] ss:$28 sps:$4 sm:$0xff]  }
 0x44b   :  { %3163 = vmatpush1.bf16.msra.mxu1 %v6377_v20  ;;  %v6460_v20 = vld [vmem:[#allocation10 + $0x1cc] ss:$28 sps:$4 sm:$0xff]  }
 0x44c   :  { %3164 = vmatprep.subr.bf16.mxu1 %v6385_v21  ;;  %v6455_v21 = vld [vmem:[#allocation10 + $0x1c0] ss:$28 sps:$4 sm:$0xff]  }
 0x44f   :  { %3165 = vmatpush1.bf16.msra.mxu1 %v6383_v11  ;;  %v6458_v11 = vld [vmem:[#allocation10 + $0x1c8] ss:$28 sps:$4 sm:$0xff]  }
 0x450   :  { %3166 = vmatprep.subr.bf16.mxu1 %v6391_v23  ;;  %v6463_v23 = vld [vmem:[#allocation10 + $0x1fc] ss:$28 sps:$4 sm:$0xff]  }
 0x453   :  { %3167 = vmatpush1.bf16.msra.mxu1 %v6389_v24  ;;  %v6466_v24 = vld [vmem:[#allocation10 + $0x204] ss:$28 sps:$4 sm:$0xff]  }
 0x454   :  { %3168 = vmatprep.subr.bf16.mxu1 %v6397_v25  ;;  %v6461_v25 = vld [vmem:[#allocation10 + $0x1f8] ss:$28 sps:$4 sm:$0xff]  }
 0x457   :  { %3169 = vmatpush1.bf16.msra.mxu1 %v6395_v27  ;;  %v6469_v27 = vld [vmem:[#allocation10 + $0x234] ss:$28 sps:$4 sm:$0xff]  }
 0x458   :  { %3170 = vmatprep.subr.bf16.mxu1 %v6403_v30  ;;  %v6467_v30 = vld [vmem:[#allocation10 + $0x230] ss:$28 sps:$4 sm:$0xff]  }
 0x45b   :  { %3171 = vmatpush1.bf16.msra.mxu1 %v6401_v32  ;;  %v6475_v32 = vld [vmem:[#allocation10 + $0x26c] ss:$28 sps:$4 sm:$0xff]  }
 0x45c   :  { %4675 = vmatprep.subr.bf16.mxu1 %v6409_v34  ;;  %v6473_v34 = vld [vmem:[#allocation10 + $0x268] ss:$28 sps:$4 sm:$0xff]  }
 0x4f1   :  { %v2723_v40 = vpop.f32.mrb[8].mxu1 }
 0x4f2   :  { %v2724_v42 = vadd.f32 %v2723_v40, %v2602_v37  ;;  %v2725_v46 = vpop.f32.mrb[9].mxu1  ;;  %v6484_v37 = vld [vmem:[#allocation10 + $0x2ac] ss:$28 sps:$4 sm:$0xff]  }
 0x4f3   :  { %v2726_v43 = vadd.f32 %v2725_v46, %v2606_v39  ;;  %v2727_v47 = vpop.f32.mrb[10].mxu1  ;;  %v6479_v39 = vld [vmem:[#allocation10 + $0x2a0] ss:$28 sps:$4 sm:$0xff]   ;;  %v6482_v40 = vld [vmem:[#allocation10 + $0x2a8] ss:$28 sps:$4 sm:$0xff]  }
 0x4f4   :  { %v2730_v48 = vmax.f32 %v2724_v42, 0.0  ;;  %v2728_v49 = vpop.f32.mrb[11].mxu1  ;;  %v6487_v42 = vld [vmem:[#allocation10 + $0x2dc] ss:$28 sps:$4 sm:$0xff]   ;;  %v6490_v46 = vld [vmem:[#allocation10 + $0x2e4] ss:$28 sps:$4 sm:$0xff]  }
 0x4f5   :  { %v2731_v50 = vmax.f32 %v2726_v43, 0.0  ;;  %v6485_v43 = vld [vmem:[#allocation10 + $0x2d8] ss:$28 sps:$4 sm:$0xff]   ;;  %v6488_v47 = vld [vmem:[#allocation10 + $0x2e0] ss:$28 sps:$4 sm:$0xff]  }
 0x4f6   :  { %v2732_v54 = vpack.c.bf16 %v2730_v48, %v2730_v48  ;;  %v6493_v48 = vld [vmem:[#allocation10 + $0x314] ss:$28 sps:$4 sm:$0xff]   ;;  %v6496_v49 = vld [vmem:[#allocation10 + $0x31c] ss:$28 sps:$4 sm:$0xff]  }
 0x4f7   :  { %v2733_v51 = vpack.c.bf16 %v2731_v50, %v2731_v50  ;;  %v6491_v50 = vld [vmem:[#allocation10 + $0x310] ss:$28 sps:$4 sm:$0xff]  }
 0x4f9   :  { %3172 = vmatprep.mubr.bf16.mxu1 %v2733_v51  ;;  %3213 = vmatprep.mubr.bf16.mxu0 %v2733_v51  ;;  %v6494_v51 = vld [vmem:[#allocation10 + $0x318] ss:$28 sps:$4 sm:$0xff]  }
 0x4fa   :  { %3173 = vmatmul.mubr.bf16.vlgmr.msra.gmra.mrb[12].mxu1 %v2732_v54  ;;  %3214 = vmatmul.mubr.bf16.vlgmr.msra.gmra.mrb[8].mxu0 %v2732_v54  ;;  %v6497_v54 = vld [vmem:[#allocation10 + $0x348] ss:$28 sps:$4 sm:$0xff]  }
 0x4fb   :  { %4676 = vmatpush1.bf16.msra.mxu1 %v6407_v52  ;;  %4758 = vmatpush1.bf16.msra.mxu0 %v6410_v53  ;;  %v6499_v52 = vld [vmem:[#allocation10 + $0x34c] ss:$28 sps:$4 sm:$0xff]   ;;  %v6502_v53 = vld [vmem:[#allocation10 + $0x354] ss:$28 sps:$4 sm:$0xff]  }
 0x4fc   :  { %4677 = vmatprep.subr.bf16.mxu1 %v6415_v55  ;;  %4759 = vmatprep.subr.bf16.mxu0 %v6418_v56  ;;  %v6500_v55 = vld [vmem:[#allocation10 + $0x350] ss:$28 sps:$4 sm:$0xff]   ;;  %v6505_v56 = vld [vmem:[#allocation10 + $0x384] ss:$28 sps:$4 sm:$0xff]  }
 0x4ff   :  { %4678 = vmatpush1.bf16.msra.mxu1 %v6413_v57  ;;  %4760 = vmatpush1.bf16.msra.mxu0 %v6416_v58  ;;  %v6508_v57 = vld [vmem:[#allocation10 + $0x38c] ss:$28 sps:$4 sm:$0xff]   ;;  %v7177_v58 = vld [vmem:[%s7256_s11] sm:$0xf] }
 0x500   :  { %4679 = vmatprep.subr.bf16.mxu1 %v6421_v59  ;;  %4761 = vmatprep.subr.bf16.mxu0 %v6424_v60  ;;  %v2803_v59 = vrot.slane %v7177_v58, %v7080_v41  ;;  %v2807_v60 = vrot.slane %v7177_v58, %v7088_v44 }
 0x503   :  { %4680 = vmatpush1.bf16.msra.mxu1 %v6419_v61  ;;  %4762 = vmatpush1.bf16.msra.mxu0 %v6422_v62  ;;  %v2815_v61 = vrot.slane %v7177_v58, %v7091_v45 }
 0x504   :  { %4681 = vmatprep.subr.bf16.mxu1 %v6427_v63  ;;  %4763 = vmatprep.subr.bf16.mxu0 %v6430_v0 }
 0x507   :  { %4682 = vmatpush1.bf16.msra.mxu1 %v6425_v1  ;;  %4764 = vmatpush1.bf16.msra.mxu0 %v6428_v2 }
 0x508   :  { %4683 = vmatprep.subr.bf16.mxu1 %v6433_v3  ;;  %4765 = vmatprep.subr.bf16.mxu0 %v6436_v22 }
 0x50b   :  { %4684 = vmatpush1.bf16.msra.mxu1 %v6431_v4  ;;  %4766 = vmatpush1.bf16.msra.mxu0 %v6434_v5 }
 0x50c   :  { %4685 = vmatprep.subr.bf16.mxu1 %v6439_v6  ;;  %4767 = vmatprep.subr.bf16.mxu0 %v6442_v7 }
 0x50f   :  { %4686 = vmatpush1.bf16.msra.mxu1 %v6437_v8  ;;  %4768 = vmatpush1.bf16.msra.mxu0 %v6440_v9 }
 0x510   :  { %4687 = vmatprep.subr.bf16.mxu1 %v6445_v10  ;;  %4769 = vmatprep.subr.bf16.mxu0 %v6448_v12 }
 0x513   :  { %4688 = vmatpush1.bf16.msra.mxu1 %v6443_v13  ;;  %4770 = vmatpush1.bf16.msra.mxu0 %v6446_v14  ;;  %v6503_v13 = vld [vmem:[#allocation10 + $0x380] ss:$28 sps:$4 sm:$0xff]   ;;  %v6506_v14 = vld [vmem:[#allocation10 + $0x388] ss:$28 sps:$4 sm:$0xff]  }
 0x514   :  { %4689 = vmatprep.subr.bf16.mxu1 %v6451_v15  ;;  %4771 = vmatprep.subr.bf16.mxu0 %v6454_v16  ;;  %v6511_v16 = vld [vmem:[#allocation10 + $0x3bc] ss:$28 sps:$4 sm:$0xff]  }
 0x517   :  { %4690 = vmatpush1.bf16.msra.mxu1 %v6449_v17  ;;  %4772 = vmatpush1.bf16.msra.mxu0 %v6452_v18  ;;  %v6514_v17 = vld [vmem:[#allocation10 + $0x3c4] ss:$28 sps:$4 sm:$0xff]  }
 0x518   :  { %4691 = vmatprep.subr.bf16.mxu1 %v6457_v19  ;;  %4773 = vmatprep.subr.bf16.mxu0 %v6460_v20  ;;  %v6509_v19 = vld [vmem:[#allocation10 + $0x3b8] ss:$28 sps:$4 sm:$0xff]   ;;  %v6512_v20 = vld [vmem:[#allocation10 + $0x3c0] ss:$28 sps:$4 sm:$0xff]  }
 0x51b   :  { %4692 = vmatpush1.bf16.msra.mxu1 %v6455_v21  ;;  %4774 = vmatpush1.bf16.msra.mxu0 %v6458_v11  ;;  %v6517_v21 = vld [vmem:[#allocation10 + $0x3f4] ss:$28 sps:$4 sm:$0xff]   ;;  %v6520_v11 = vld [vmem:[#allocation10 + $0x3fc] ss:$28 sps:$4 sm:$0xff]  }
 0x51c   :  { %4693 = vmatprep.subr.bf16.mxu1 %v6463_v23  ;;  %4775 = vmatprep.subr.bf16.mxu0 %v6466_v24  ;;  %v6515_v23 = vld [vmem:[#allocation10 + $0x3f0] ss:$28 sps:$4 sm:$0xff]   ;;  %v6518_v24 = vld [vmem:[#allocation10 + $0x3f8] ss:$28 sps:$4 sm:$0xff]  }
 0x51f   :  { %4694 = vmatpush1.bf16.msra.mxu1 %v6461_v25  ;;  %4776 = vmatpush1.bf16.msra.mxu0 %v6464_v26  ;;  %v6523_v25 = vld [vmem:[#allocation10 + $0x42c] ss:$28 sps:$4 sm:$0xff]   ;;  %v6526_v26 = vld [vmem:[#allocation10 + $0x434] ss:$28 sps:$4 sm:$0xff]  }
 0x520   :  { %4695 = vmatprep.subr.bf16.mxu1 %v6469_v27  ;;  %4777 = vmatprep.subr.bf16.mxu0 %v6472_v28  ;;  %v6521_v27 = vld [vmem:[#allocation10 + $0x428] ss:$28 sps:$4 sm:$0xff]   ;;  %v6524_v28 = vld [vmem:[#allocation10 + $0x430] ss:$28 sps:$4 sm:$0xff]  }
 0x523   :  { %4696 = vmatpush1.bf16.msra.mxu1 %v6467_v30  ;;  %4778 = vmatpush1.bf16.msra.mxu0 %v6470_v31  ;;  %v6529_v30 = vld [vmem:[#allocation10 + $0x464] ss:$28 sps:$4 sm:$0xff]   ;;  %v6532_v31 = vld [vmem:[#allocation10 + $0x46c] ss:$28 sps:$4 sm:$0xff]  }
 0x524   :  { %4697 = vmatprep.subr.bf16.mxu1 %v6475_v32  ;;  %4779 = vmatprep.subr.bf16.mxu0 %v6478_v33  ;;  %v6527_v32 = vld [vmem:[#allocation10 + $0x460] ss:$28 sps:$4 sm:$0xff]   ;;  %v6530_v33 = vld [vmem:[#allocation10 + $0x468] ss:$28 sps:$4 sm:$0xff]  }
 0x527   :  { %4698 = vmatpush1.bf16.msra.mxu1 %v6473_v34  ;;  %4780 = vmatpush1.bf16.msra.mxu0 %v6476_v35  ;;  %v6535_v34 = vld [vmem:[#allocation10 + $0x49c] ss:$28 sps:$4 sm:$0xff]   ;;  %v6538_v35 = vld [vmem:[#allocation10 + $0x4a4] ss:$28 sps:$4 sm:$0xff]  }
 0x528   :  { %4699 = vmatprep.subr.bf16.mxu1 %v6481_v36  ;;  %4781 = vmatprep.subr.bf16.mxu0 %v6484_v37  ;;  %v6533_v36 = vld [vmem:[#allocation10 + $0x498] ss:$28 sps:$4 sm:$0xff]   ;;  %v6536_v37 = vld [vmem:[#allocation10 + $0x4a0] ss:$28 sps:$4 sm:$0xff]  }
 0x52b   :  { %4700 = vmatpush1.bf16.msra.mxu1 %v6479_v39  ;;  %4782 = vmatpush1.bf16.msra.mxu0 %v6482_v40  ;;  %v6541_v39 = vld [vmem:[#allocation10 + $0x4d4] ss:$28 sps:$4 sm:$0xff]   ;;  %v6544_v40 = vld [vmem:[#allocation10 + $0x4dc] ss:$28 sps:$4 sm:$0xff]  }
 0x52c   :  { %4701 = vmatprep.subr.bf16.mxu1 %v6487_v42  ;;  %4783 = vmatprep.subr.bf16.mxu0 %v6490_v46  ;;  %v6539_v42 = vld [vmem:[#allocation10 + $0x4d0] ss:$28 sps:$4 sm:$0xff]   ;;  %v6542_v46 = vld [vmem:[#allocation10 + $0x4d8] ss:$28 sps:$4 sm:$0xff]  }
 0x52f   :  { %4702 = vmatpush1.bf16.msra.mxu1 %v6485_v43  ;;  %4784 = vmatpush1.bf16.msra.mxu0 %v6488_v47  ;;  %v6547_v43 = vld [vmem:[#allocation10 + $0x50c] ss:$28 sps:$4 sm:$0xff]   ;;  %v6550_v47 = vld [vmem:[#allocation10 + $0x514] ss:$28 sps:$4 sm:$0xff]  }
 0x530   :  { %4703 = vmatprep.subr.bf16.mxu1 %v6493_v48  ;;  %4785 = vmatprep.subr.bf16.mxu0 %v6496_v49  ;;  %v6545_v48 = vld [vmem:[#allocation10 + $0x508] ss:$28 sps:$4 sm:$0xff]   ;;  %v6548_v49 = vld [vmem:[#allocation10 + $0x510] ss:$28 sps:$4 sm:$0xff]  }
 0x533   :  { %4704 = vmatpush1.bf16.msra.mxu1 %v6491_v50  ;;  %4786 = vmatpush1.bf16.msra.mxu0 %v6494_v51  ;;  %v6553_v50 = vld [vmem:[#allocation10 + $0x544] ss:$28 sps:$4 sm:$0xff]   ;;  %v6556_v51 = vld [vmem:[#allocation10 + $0x54c] ss:$28 sps:$4 sm:$0xff]  }
 0x534   :  { %4705 = vmatprep.subr.bf16.mxu1 %v6499_v52  ;;  %4787 = vmatprep.subr.bf16.mxu0 %v6502_v53  ;;  %v6551_v52 = vld [vmem:[#allocation10 + $0x540] ss:$28 sps:$4 sm:$0xff]   ;;  %v6554_v53 = vld [vmem:[#allocation10 + $0x548] ss:$28 sps:$4 sm:$0xff]  }
 0x537   :  { %4706 = vmatpush1.bf16.msra.mxu1 %v6497_v54  ;;  %4788 = vmatpush1.bf16.msra.mxu0 %v6500_v55  ;;  %v6559_v54 = vld [vmem:[#allocation10 + $0x57c] ss:$28 sps:$4 sm:$0xff]   ;;  %v6562_v55 = vld [vmem:[#allocation10 + $0x584] ss:$28 sps:$4 sm:$0xff]  }
 0x538   :  { %4716 = vmatprep.subr.bf16.mxu1 %v6505_v56  ;;  %4798 = vmatprep.subr.bf16.mxu0 %v6508_v57  ;;  %v6557_v56 = vld [vmem:[#allocation10 + $0x578] ss:$28 sps:$4 sm:$0xff]   ;;  %v6560_v57 = vld [vmem:[#allocation10 + $0x580] ss:$28 sps:$4 sm:$0xff]  }
 0x5cd   :  { %v3174_v62 = vpop.f32.mrb[12].mxu1  ;;  %v7185_v63 = vpop.f32.mrb[8].mxu0 }
 0x5ce   :  { %v3175_v0 = vadd.f32 %v3174_v62, %v2803_v59  ;;  %v3176_v1 = vpop.f32.mrb[13].mxu1  ;;  %v3217_v2 = vpop.f32.mrb[9].mxu0  ;;  %v6565_v59 = vld [vmem:[#allocation10 + $0x5b4] ss:$28 sps:$4 sm:$0xff]  }
 0x5cf   :  { %v3177_v3 = vadd.f32 %v3176_v1, %v2807_v60  ;;  %v3218_v22 = vadd.f32 %v3217_v2, %v2815_v61  ;;  %v3178_v4 = vpop.f32.mrb[14].mxu1  ;;  %v3219_v5 = vpop.f32.mrb[10].mxu0  ;;  %v6568_v60 = vld [vmem:[#allocation10 + $0x5bc] ss:$28 sps:$4 sm:$0xff]   ;;  %v6563_v61 = vld [vmem:[#allocation10 + $0x5b0] ss:$28 sps:$4 sm:$0xff]  }
 0x5d0   :  { %v3222_v6 = vmax.f32 %v3175_v0, 0.0  ;;  %v3179_v7 = vpop.f32.mrb[15].mxu1  ;;  %v3220_v8 = vpop.f32.mrb[11].mxu0  ;;  %v6566_v62 = vld [vmem:[#allocation10 + $0x5b8] ss:$28 sps:$4 sm:$0xff]  }
 0x5d1   :  { %v3223_v9 = vmax.f32 %v3177_v3, 0.0  ;;  %v3225_v10 = vmax.f32 %v3218_v22, 0.0  ;;  %v6571_v0 = vld [vmem:[#allocation10 + $0x5ec] ss:$28 sps:$4 sm:$0xff]   ;;  %v6574_v1 = vld [vmem:[#allocation10 + $0x5f4] ss:$28 sps:$4 sm:$0xff]  }
 0x5d2   :  { %v7189_v15 = vpack.c.bf16 %v3222_v6, %v3222_v6  ;;  %v6569_v2 = vld [vmem:[#allocation10 + $0x5e8] ss:$28 sps:$4 sm:$0xff]   ;;  %v6572_v3 = vld [vmem:[#allocation10 + $0x5f0] ss:$28 sps:$4 sm:$0xff]   ;;  %v6575_v5 = vld [vmem:[#allocation10 + $0x620] ss:$28 sps:$4 sm:$0xff]  }
 0x5d3   :  { %v7187_v12 = vpack.c.bf16 %v3223_v9, %v3223_v9  ;;  %v7193_v18 = vpack.c.bf16 %v3225_v10, %v3225_v10  ;;  %v6577_v22 = vld [vmem:[#allocation10 + $0x624] ss:$28 sps:$4 sm:$0xff]   ;;  %v6580_v4 = vld [vmem:[#allocation10 + $0x62c] ss:$28 sps:$4 sm:$0xff]   ;;  %v6583_v7 = vld [vmem:[#allocation10 + $0x65c] ss:$28 sps:$4 sm:$0xff]  }
 0x5d4   :  { %v6578_v6 = vld [vmem:[#allocation10 + $0x628] ss:$28 sps:$4 sm:$0xff]   ;;  %v6581_v9 = vld [vmem:[#allocation10 + $0x658] ss:$28 sps:$4 sm:$0xff]   ;;  %v6584_v10 = vld [vmem:[#allocation10 + $0x660] ss:$28 sps:$4 sm:$0xff]  }
 0x5d5   :  { %4707 = vmatprep.mubr.bf16.mxu1 %v7187_v12  ;;  %4789 = vmatprep.mubr.bf16.mxu0 %v7187_v12  ;;  %v6586_v8 = vld [vmem:[#allocation10 + $0x664] ss:$28 sps:$4 sm:$0xff]  }
 0x5d6   :  { %4708 = vmatmul.mubr.bf16.vlgmr.msra.gmra.mrb[16].mxu1 %v7189_v15  ;;  %4790 = vmatmul.mubr.bf16.vlgmr.msra.gmra.mrb[12].mxu0 %v7189_v15 }
 0x5d7   :  { %4717 = vmatpush1.bf16.msra.mxu1 %v6503_v13  ;;  %4799 = vmatpush1.bf16.msra.mxu0 %v6506_v14  ;;  %v2811_v13 = vrot.slane %v7177_v58, %v7102_v29  ;;  %v6589_v14 = vld [vmem:[#allocation10 + $0x694] ss:$28 sps:$4 sm:$0xff]  }
 0x5d8   :  { %4748 = vmatprep.mubr.bf16.mxu1 %v7193_v18  ;;  %4830 = vmatprep.mubr.bf16.mxu0 %v7193_v18  ;;  %v6601_v58 = vld [vmem:[#allocation10 + $0x14] ss:$28 sps:$4 sm:$0xff]  }
 0x5d9   :  { %4718 = vmatprep.subr.bf16.mxu1 %v6511_v16  ;;  %4800 = vmatprep.subr.bf16.mxu0 %v6514_v17  ;;  %v6592_v16 = vld [vmem:[#allocation10 + $0x69c] ss:$28 sps:$4 sm:$0xff]   ;;  %v6587_v17 = vld [vmem:[#allocation10 + $0x690] ss:$28 sps:$4 sm:$0xff]  }
 0x5db   :  { %4719 = vmatpush1.bf16.msra.mxu1 %v6509_v19  ;;  %4801 = vmatpush1.bf16.msra.mxu0 %v6512_v20  ;;  %v6590_v19 = vld [vmem:[#allocation10 + $0x698] ss:$28 sps:$4 sm:$0xff]   ;;  %v3216_v20 = vadd.f32 %v7185_v63, %v2811_v13  ;;  %v6657_v13 = vld [vmem:[#allocation10 + $0x600] ss:$28 sps:$4 sm:$0xff]  }
 0x5dc   :  { %4720 = vmatprep.subr.bf16.mxu1 %v6517_v21  ;;  %4802 = vmatprep.subr.bf16.mxu0 %v6520_v11  ;;  %v6595_v21 = vld [vmem:[#allocation10 + $0x6cc] ss:$28 sps:$4 sm:$0xff]   ;;  %v6598_v11 = vld [vmem:[#allocation10 + $0x6d4] ss:$28 sps:$4 sm:$0xff]  }
 0x5dd   :  { %v6603_v63 = vld [vmem:[#allocation10 + $0x18] ss:$28 sps:$4 sm:$0xff]  }
 0x5df   :  { %4721 = vmatpush1.bf16.msra.mxu1 %v6515_v23  ;;  %4803 = vmatpush1.bf16.msra.mxu0 %v6518_v24  ;;  %v6593_v23 = vld [vmem:[#allocation10 + $0x6c8] ss:$28 sps:$4 sm:$0xff]   ;;  %v6596_v24 = vld [vmem:[#allocation10 + $0x6d0] ss:$28 sps:$4 sm:$0xff]  }
 0x5e0   :  { %4722 = vmatprep.subr.bf16.mxu1 %v6523_v25  ;;  %4804 = vmatprep.subr.bf16.mxu0 %v6526_v26  ;;  %v3224_v25 = vmax.f32 %v3216_v20, 0.0  ;;  %v6602_v26 = vld [vmem:[#allocation10 + $0x1d8] ss:$28 sps:$4 sm:$0xff]   ;;  %v6659_v20 = vld [vmem:[#allocation10 + $0x2b0] ss:$28 sps:$4 sm:$0xff]  }
 0x5e3   :  { %4723 = vmatpush1.bf16.msra.mxu1 %v6521_v27  ;;  %4805 = vmatpush1.bf16.msra.mxu0 %v6524_v28  ;;  %v6599_v27 = vld [vmem:[#allocation10 + $0x10] ss:$28 sps:$4 sm:$0xff]   ;;  %v7202_v28 = vpack.c.bf16 %v3224_v25, %v3224_v25 }
 0x5e4   :  { %4724 = vmatprep.subr.bf16.mxu1 %v6529_v30  ;;  %4806 = vmatprep.subr.bf16.mxu0 %v6532_v31  ;;  %v6606_v30 = vld [vmem:[#allocation10 + $0x4c] ss:$28 sps:$4 sm:$0xff]  }
 0x5e5   :  { %v6607_v31 = vld [vmem:[#allocation10 + $0x210] ss:$28 sps:$4 sm:$0xff]  }
 0x5e6   :  { %v6668_v25 = vld [vmem:[#allocation10 + $0x4b0] ss:$28 sps:$4 sm:$0xff]  }
 0x5e7   :  { %4725 = vmatpush1.bf16.msra.mxu1 %v6527_v32  ;;  %4807 = vmatpush1.bf16.msra.mxu0 %v6530_v33  ;;  %v6604_v32 = vld [vmem:[#allocation10 + $0x48] ss:$28 sps:$4 sm:$0xff]   ;;  %v6608_v33 = vld [vmem:[#allocation10 + $0x50] ss:$28 sps:$4 sm:$0xff]  }
 0x5e8   :  { %4726 = vmatprep.subr.bf16.mxu1 %v6535_v34  ;;  %4808 = vmatprep.subr.bf16.mxu0 %v6538_v35  ;;  %v6611_v34 = vld [vmem:[#allocation10 + $0x84] ss:$28 sps:$4 sm:$0xff]  }
 0x5e9   :  { %v6612_v35 = vld [vmem:[#allocation10 + $0x248] ss:$28 sps:$4 sm:$0xff]  }
 0x5eb   :  { %4727 = vmatpush1.bf16.msra.mxu1 %v6533_v36  ;;  %4809 = vmatpush1.bf16.msra.mxu0 %v6536_v37  ;;  %v6609_v36 = vld [vmem:[#allocation10 + $0x80] ss:$28 sps:$4 sm:$0xff]   ;;  %v6613_v37 = vld [vmem:[#allocation10 + $0x88] ss:$28 sps:$4 sm:$0xff]  }
 0x5ec   :  { %4728 = vmatprep.subr.bf16.mxu1 %v6541_v39  ;;  %4810 = vmatprep.subr.bf16.mxu0 %v6544_v40  ;;  %v6616_v39 = vld [vmem:[#allocation10 + $0xbc] ss:$28 sps:$4 sm:$0xff]  }
 0x5ed   :  { %v6617_v40 = vld [vmem:[#allocation10 + $0x280] ss:$28 sps:$4 sm:$0xff]  }
 0x5ef   :  { %4729 = vmatpush1.bf16.msra.mxu1 %v6539_v42  ;;  %4811 = vmatpush1.bf16.msra.mxu0 %v6542_v46  ;;  %v6614_v42 = vld [vmem:[#allocation10 + $0xb8] ss:$28 sps:$4 sm:$0xff]   ;;  %v6618_v46 = vld [vmem:[#allocation10 + $0xc0] ss:$28 sps:$4 sm:$0xff]  }
 0x5f0   :  { %4730 = vmatprep.subr.bf16.mxu1 %v6547_v43  ;;  %4812 = vmatprep.subr.bf16.mxu0 %v6550_v47  ;;  %v6621_v43 = vld [vmem:[#allocation10 + $0xf4] ss:$28 sps:$4 sm:$0xff]  }
 0x5f1   :  { %v6619_v47 = vld [vmem:[#allocation10 + $0xf0] ss:$28 sps:$4 sm:$0xff]  }
 0x5f3   :  { %4731 = vmatpush1.bf16.msra.mxu1 %v6545_v48  ;;  %4813 = vmatpush1.bf16.msra.mxu0 %v6548_v49  ;;  %v6623_v48 = vld [vmem:[#allocation10 + $0xf8] ss:$28 sps:$4 sm:$0xff]   ;;  %v6626_v49 = vld [vmem:[#allocation10 + $0x12c] ss:$28 sps:$4 sm:$0xff]  }
 0x5f4   :  { %4732 = vmatprep.subr.bf16.mxu1 %v6553_v50  ;;  %4814 = vmatprep.subr.bf16.mxu0 %v6556_v51  ;;  %v6627_v50 = vld [vmem:[#allocation10 + $0x2f0] ss:$28 sps:$4 sm:$0xff]   ;;  %v6624_v51 = vld [vmem:[#allocation10 + $0x128] ss:$28 sps:$4 sm:$0xff]  }
 0x5f7   :  { %4733 = vmatpush1.bf16.msra.mxu1 %v6551_v52  ;;  %4815 = vmatpush1.bf16.msra.mxu0 %v6554_v53  ;;  %v6628_v52 = vld [vmem:[#allocation10 + $0x130] ss:$28 sps:$4 sm:$0xff]   ;;  %v6631_v53 = vld [vmem:[#allocation10 + $0x164] ss:$28 sps:$4 sm:$0xff]  }
 0x5f8   :  { %4734 = vmatprep.subr.bf16.mxu1 %v6559_v54  ;;  %4816 = vmatprep.subr.bf16.mxu0 %v6562_v55  ;;  %v6632_v54 = vld [vmem:[#allocation10 + $0x328] ss:$28 sps:$4 sm:$0xff]   ;;  %v6629_v55 = vld [vmem:[#allocation10 + $0x160] ss:$28 sps:$4 sm:$0xff]  }
 0x5fb   :  { %4735 = vmatpush1.bf16.msra.mxu1 %v6557_v56  ;;  %4817 = vmatpush1.bf16.msra.mxu0 %v6560_v57  ;;  %v6633_v56 = vld [vmem:[#allocation10 + $0x168] ss:$28 sps:$4 sm:$0xff]   ;;  %v6636_v57 = vld [vmem:[#allocation10 + $0x19c] ss:$28 sps:$4 sm:$0xff]  }
 0x5fc   :  { %4736 = vmatprep.subr.bf16.mxu1 %v6565_v59  ;;  %4818 = vmatprep.subr.bf16.mxu0 %v6568_v60  ;;  %v6637_v59 = vld [vmem:[#allocation10 + $0x360] ss:$28 sps:$4 sm:$0xff]   ;;  %v6634_v60 = vld [vmem:[#allocation10 + $0x198] ss:$28 sps:$4 sm:$0xff]  }
 0x5ff   :  { %4737 = vmatpush1.bf16.msra.mxu1 %v6563_v61  ;;  %4819 = vmatpush1.bf16.msra.mxu0 %v6566_v62  ;;  %v6638_v61 = vld [vmem:[#allocation10 + $0x1a0] ss:$28 sps:$4 sm:$0xff]   ;;  %v6641_v62 = vld [vmem:[#allocation10 + $0x1d4] ss:$28 sps:$4 sm:$0xff]  }
 0x600   :  { %4738 = vmatprep.subr.bf16.mxu1 %v6571_v0  ;;  %4820 = vmatprep.subr.bf16.mxu0 %v6574_v1  ;;  %v6642_v0 = vld [vmem:[#allocation10 + $0x558] ss:$28 sps:$4 sm:$0xff]   ;;  %v6639_v1 = vld [vmem:[#allocation10 + $0x1d0] ss:$28 sps:$4 sm:$0xff]  }
 0x603   :  { %4739 = vmatpush1.bf16.msra.mxu1 %v6569_v2  ;;  %4821 = vmatpush1.bf16.msra.mxu0 %v6572_v3  ;;  %v6643_v2 = vld [vmem:[#allocation10 + $0x398] ss:$28 sps:$4 sm:$0xff]   ;;  %v6646_v3 = vld [vmem:[#allocation10 + $0x20c] ss:$28 sps:$4 sm:$0xff]  }
 0x604   :  { %4740 = vmatprep.subr.bf16.mxu1 %v6577_v22  ;;  %4822 = vmatprep.subr.bf16.mxu0 %v6580_v4  ;;  %v6647_v22 = vld [vmem:[#allocation10 + $0x590] ss:$28 sps:$4 sm:$0xff]   ;;  %v6644_v4 = vld [vmem:[#allocation10 + $0x208] ss:$28 sps:$4 sm:$0xff]  }
 0x607   :  { %4741 = vmatpush1.bf16.msra.mxu1 %v6575_v5  ;;  %4823 = vmatpush1.bf16.msra.mxu0 %v6578_v6  ;;  %v6648_v5 = vld [vmem:[#allocation10 + $0x3d0] ss:$28 sps:$4 sm:$0xff]   ;;  %v6651_v6 = vld [vmem:[#allocation10 + $0x244] ss:$28 sps:$4 sm:$0xff]  }
 0x608   :  { %4742 = vmatprep.subr.bf16.mxu1 %v6583_v7  ;;  %4824 = vmatprep.subr.bf16.mxu0 %v6586_v8  ;;  %v6652_v7 = vld [vmem:[#allocation10 + $0x5c8] ss:$28 sps:$4 sm:$0xff]   ;;  %v6649_v8 = vld [vmem:[#allocation10 + $0x240] ss:$28 sps:$4 sm:$0xff]  }
 0x60b   :  { %4743 = vmatpush1.bf16.msra.mxu1 %v6581_v9  ;;  %4825 = vmatpush1.bf16.msra.mxu0 %v6584_v10  ;;  %v6653_v9 = vld [vmem:[#allocation10 + $0x408] ss:$28 sps:$4 sm:$0xff]   ;;  %v6656_v10 = vld [vmem:[#allocation10 + $0x27c] ss:$28 sps:$4 sm:$0xff]  }
 0x60c   :  { %4744 = vmatprep.subr.bf16.mxu1 %v6589_v14  ;;  %4826 = vmatprep.subr.bf16.mxu0 %v6592_v16  ;;  %v6654_v14 = vld [vmem:[#allocation10 + $0x278] ss:$28 sps:$4 sm:$0xff]   ;;  %v6658_v16 = vld [vmem:[#allocation10 + $0x440] ss:$28 sps:$4 sm:$0xff]  }
 0x60f   :  { %4745 = vmatpush1.bf16.msra.mxu1 %v6587_v17  ;;  %4827 = vmatpush1.bf16.msra.mxu0 %v6590_v19  ;;  %v6661_v17 = vld [vmem:[#allocation10 + $0x2b4] ss:$28 sps:$4 sm:$0xff]  }
 0x610   :  { %4746 = vmatprep.subr.bf16.mxu1 %v6595_v21  ;;  %4828 = vmatprep.subr.bf16.mxu0 %v6598_v11  ;;  %v6662_v19 = vld [vmem:[#allocation10 + $0x638] ss:$28 sps:$4 sm:$0xff]   ;;  %v6666_v11 = vld [vmem:[#allocation10 + $0x2ec] ss:$28 sps:$4 sm:$0xff]  }
 0x611   :  { %v6663_v21 = vld [vmem:[#allocation10 + $0x478] ss:$28 sps:$4 sm:$0xff]  }
 0x613   :  { %4747 = vmatpush1.bf16.msra.mxu1 %v6593_v23  ;;  %4829 = vmatpush1.bf16.msra.mxu0 %v6596_v24  ;;  %v6667_v23 = vld [vmem:[#allocation10 + $0x670] ss:$28 sps:$4 sm:$0xff]   ;;  %v6664_v24 = vld [vmem:[#allocation10 + $0x2e8] ss:$28 sps:$4 sm:$0xff]  }
 0x614   :  { %4839 = vmatprep.subr.bf16.mxu1 %v6601_v58  ;;  %5691 = vmatprep.subr.bf16.mxu0 %v6602_v26  ;;  %v6671_v58 = vld [vmem:[#allocation10 + $0x324] ss:$28 sps:$4 sm:$0xff]  }
 0x615   :  { %v6672_v26 = vld [vmem:[#allocation10 + $0x6a8] ss:$28 sps:$4 sm:$0xff]  }
 0x616   :  { %4749 = vmatmul.mubr.bf16.vlgmr.msra.gmra.mrb[16].mxu1 %v7202_v28  ;;  %4831 = vmatmul.mubr.bf16.vlgmr.msra.gmra.mrb[12].mxu0 %v7202_v28 }
 0x617   :  { %4840 = vmatpush1.bf16.msra.mxu1 %v6599_v27  ;;  %4871 = vmatprep.mubr.bf16.mxu1 %v7187_v12  ;;  %v6669_v27 = vld [vmem:[#allocation10 + $0x320] ss:$28 sps:$4 sm:$0xff]  }
 0x618   :  { %5692 = vmatpush3.bf16.msra.mxu0 %v6603_v63  ;;  %4953 = vmatprep.mubr.bf16.mxu0 %v7187_v12  ;;  %v6622_v12 = vld [vmem:[#allocation10 + $0x2b8] ss:$28 sps:$4 sm:$0xff]   ;;  %v6673_v63 = vld [vmem:[#allocation10 + $0x4e8] ss:$28 sps:$4 sm:$0xff]  }
 0x619   :  { %4841 = vmatprep.subr.bf16.mxu1 %v6606_v30  ;;  %5693 = vmatprep.subr.bf16.mxu0 %v6607_v31  ;;  %v6676_v30 = vld [vmem:[#allocation10 + $0x35c] ss:$28 sps:$4 sm:$0xff]  }
 0x61a   :  { %v6677_v31 = vld [vmem:[#allocation10 + $0x6e0] ss:$28 sps:$4 sm:$0xff]  }
 0x61b   :  { %4842 = vmatpush1.bf16.msra.mxu1 %v6604_v32  ;;  %v6674_v32 = vld [vmem:[#allocation10 + $0x358] ss:$28 sps:$4 sm:$0xff]  }
 0x61c   :  { %5694 = vmatpush3.bf16.msra.mxu0 %v6608_v33  ;;  %4843 = vmatprep.subr.bf16.mxu1 %v6611_v34  ;;  %v6678_v33 = vld [vmem:[#allocation10 + $0x520] ss:$28 sps:$4 sm:$0xff]   ;;  %v6681_v34 = vld [vmem:[#allocation10 + $0x394] ss:$28 sps:$4 sm:$0xff]  }
 0x61d   :  { %5695 = vmatprep.subr.bf16.mxu0 %v6612_v35  ;;  %v6679_v35 = vld [vmem:[#allocation10 + $0x390] ss:$28 sps:$4 sm:$0xff]  }
 0x61f   :  { %4844 = vmatpush1.bf16.msra.mxu1 %v6609_v36  ;;  %v6684_v36 = vld [vmem:[#allocation10 + $0x3cc] ss:$28 sps:$4 sm:$0xff]  }
 0x620   :  { %5696 = vmatpush3.bf16.msra.mxu0 %v6613_v37  ;;  %4845 = vmatprep.subr.bf16.mxu1 %v6616_v39  ;;  %v6682_v37 = vld [vmem:[#allocation10 + $0x3c8] ss:$28 sps:$4 sm:$0xff]  }
 0x621   :  { %5697 = vmatprep.subr.bf16.mxu0 %v6617_v40  ;;  %v6687_v39 = vld [vmem:[#allocation10 + $0x404] ss:$28 sps:$4 sm:$0xff]  }
 0x622   :  { %v6685_v40 = vld [vmem:[#allocation10 + $0x400] ss:$28 sps:$4 sm:$0xff]  }
 0x623   :  { %4846 = vmatpush1.bf16.msra.mxu1 %v6614_v42  ;;  %v6690_v42 = vld [vmem:[#allocation10 + $0x43c] ss:$28 sps:$4 sm:$0xff]  }
 0x624   :  { %5698 = vmatpush3.bf16.msra.mxu0 %v6618_v46  ;;  %4847 = vmatprep.subr.bf16.mxu1 %v6621_v43  ;;  %v6688_v46 = vld [vmem:[#allocation10 + $0x438] ss:$28 sps:$4 sm:$0xff]  }
 0x625   :  { %5699 = vmatprep.subr.bf16.mxu0 %v6622_v12  ;;  %v6693_v43 = vld [vmem:[#allocation10 + $0x474] ss:$28 sps:$4 sm:$0xff]  }
 0x626   :  { %v6691_v12 = vld [vmem:[#allocation10 + $0x470] ss:$28 sps:$4 sm:$0xff]  }
 0x627   :  { %4848 = vmatpush1.bf16.msra.mxu1 %v6619_v47  ;;  %v6694_v47 = vld [vmem:[#allocation10 + $0x4a8] ss:$28 sps:$4 sm:$0xff]  }
 0x628   :  { %5700 = vmatpush3.bf16.msra.mxu0 %v6623_v48  ;;  %4849 = vmatprep.subr.bf16.mxu1 %v6626_v49  ;;  %v6699_v48 = vld [vmem:[#allocation10 + $0x4e4] ss:$28 sps:$4 sm:$0xff]   ;;  %v6702_v49 = vld [vmem:[#allocation10 + $0x51c] ss:$28 sps:$4 sm:$0xff]  }
 0x629   :  { %5701 = vmatprep.subr.bf16.mxu0 %v6627_v50  ;;  %v6700_v50 = vld [vmem:[#allocation10 + $0x518] ss:$28 sps:$4 sm:$0xff]  }
 0x62b   :  { %4850 = vmatpush1.bf16.msra.mxu1 %v6624_v51  ;;  %v6705_v51 = vld [vmem:[#allocation10 + $0x554] ss:$28 sps:$4 sm:$0xff]  }
 0x62c   :  { %5702 = vmatpush3.bf16.msra.mxu0 %v6628_v52  ;;  %4851 = vmatprep.subr.bf16.mxu1 %v6631_v53  ;;  %v6703_v52 = vld [vmem:[#allocation10 + $0x550] ss:$28 sps:$4 sm:$0xff]  }
 0x62d   :  { %5703 = vmatprep.subr.bf16.mxu0 %v6632_v54  ;;  %v6708_v53 = vld [vmem:[#allocation10 + $0x58c] ss:$28 sps:$4 sm:$0xff]  }
 0x62e   :  { %v6706_v54 = vld [vmem:[#allocation10 + $0x588] ss:$28 sps:$4 sm:$0xff]  }
 0x62f   :  { %4852 = vmatpush1.bf16.msra.mxu1 %v6629_v55  ;;  %v6711_v55 = vld [vmem:[#allocation10 + $0x5c4] ss:$28 sps:$4 sm:$0xff]  }
 0x630   :  { %5704 = vmatpush3.bf16.msra.mxu0 %v6633_v56  ;;  %4853 = vmatprep.subr.bf16.mxu1 %v6636_v57  ;;  %v6709_v56 = vld [vmem:[#allocation10 + $0x5c0] ss:$28 sps:$4 sm:$0xff]  }
 0x631   :  { %5705 = vmatprep.subr.bf16.mxu0 %v6637_v59  ;;  %v6714_v57 = vld [vmem:[#allocation10 + $0x5fc] ss:$28 sps:$4 sm:$0xff]  }
 0x632   :  { %v6712_v59 = vld [vmem:[#allocation10 + $0x5f8] ss:$28 sps:$4 sm:$0xff]  }
 0x633   :  { %4854 = vmatpush1.bf16.msra.mxu1 %v6634_v60  ;;  %v6717_v60 = vld [vmem:[#allocation10 + $0x634] ss:$28 sps:$4 sm:$0xff]  }
 0x634   :  { %5706 = vmatpush3.bf16.msra.mxu0 %v6638_v61  ;;  %4855 = vmatprep.subr.bf16.mxu1 %v6641_v62  ;;  %v6715_v61 = vld [vmem:[#allocation10 + $0x630] ss:$28 sps:$4 sm:$0xff]  }
 0x635   :  { %5713 = vmatprep.subr.bf16.mxu0 %v6642_v0  ;;  %v6720_v62 = vld [vmem:[#allocation10 + $0x66c] ss:$28 sps:$4 sm:$0xff]  }
 0x636   :  { %v6718_v0 = vld [vmem:[#allocation10 + $0x668] ss:$28 sps:$4 sm:$0xff]  }
 0x637   :  { %4954 = vmatmul.mubr.bf16.vlgmr.msra.gmra.mrb[16].mxu0 %v7189_v15  ;;  %4856 = vmatpush1.bf16.msra.mxu1 %v6639_v1  ;;  %v6723_v1 = vld [vmem:[#allocation10 + $0x6a4] ss:$28 sps:$4 sm:$0xff]  }
 0x638   :  { %5714 = vmatpush3.bf16.msra.mxu0 %v6643_v2  ;;  %4993 = vmatprep.mubr.bf16.mxu0 %v7193_v18  ;;  %v6721_v2 = vld [vmem:[#allocation10 + $0x6a0] ss:$28 sps:$4 sm:$0xff]  }
 0x639   :  { %4857 = vmatprep.subr.bf16.mxu1 %v6646_v3  ;;  %5715 = vmatprep.subr.bf16.mxu0 %v6647_v22  ;;  %v6726_v3 = vld [vmem:[#allocation10 + $0x6dc] ss:$28 sps:$4 sm:$0xff]  }
 0x63a   :  { %v6724_v22 = vld [vmem:[#allocation10 + $0x6d8] ss:$28 sps:$4 sm:$0xff]  }
 0x63b   :  { %4858 = vmatpush1.bf16.msra.mxu1 %v6644_v4  ;;  %v7217_v4 = vld [vmem:[%s7258_s13] sm:$0xff]  ;;  %s6909_s13 = smov [#allocation11]  }
 0x63c   :  { %5716 = vmatpush3.bf16.msra.mxu0 %v6648_v5  ;;  %4859 = vmatprep.subr.bf16.mxu1 %v6651_v6  ;;  %v3491_v5 = vrot.slane %v7217_v4, %v7080_v41  ;;  %v3499_v6 = vrot.slane %v7217_v4, %v7102_v29  ;;  %s5049_s29 = sshll.u32 %s6909_s13, 4  ;;  %s5050_s29 = int_to_ptr.vmem [resolvable:$true] %s5049_s29 }
 0x63d   :  { %5717 = vmatprep.subr.bf16.mxu0 %v6652_v7  ;;  %v3495_v7 = vrot.slane %v7217_v4, %v7088_v44  ;;  %s6867_s19 = scalar_lea.vmem %s5050_s29, 896  ;;  %p6872_p13 = scmp.lt.s32.totalorder %s5050_s29, %s5050_s29 }
 0x63e   :  { %p6868_p12 = scmp.ne.s32.totalorder %s5050_s29, %s6867_s19  ;;  %p6873_p0 = scmp.lt.s32.totalorder %s6867_s19, %s6867_s19 }
 0x63f   :  { %4860 = vmatpush1.bf16.msra.mxu1 %v6649_v8  ;;  %v3503_v8 = vrot.slane %v7217_v4, %v7091_v45 }
 0x640   :  { %5718 = vmatpush3.bf16.msra.mxu0 %v6653_v9  ;;  %4861 = vmatprep.subr.bf16.mxu1 %v6656_v10  ;;  %p6874_p1 = por %p6873_p0, %p6872_p13 }
 0x641   :  { %5719 = vmatprep.subr.bf16.mxu0 %v6657_v13 }
 0x642   :  { %p6875_p2 = pnand %p6874_p1, %p6868_p12 }
 0x643   :  { %4862 = vmatpush1.bf16.msra.mxu1 %v6654_v14 }
 0x644   :  { %5720 = vmatpush3.bf16.msra.mxu0 %v6658_v16  ;;  %4863 = vmatprep.subr.bf16.mxu1 %v6661_v17 }
 0x645   :  { %5721 = vmatprep.subr.bf16.mxu0 %v6662_v19 }
 0x647   :  { %4864 = vmatpush1.bf16.msra.mxu1 %v6659_v20 }
 0x648   :  { %5722 = vmatpush3.bf16.msra.mxu0 %v6663_v21  ;;  %4865 = vmatprep.subr.bf16.mxu1 %v6666_v11 }
 0x649   :  { %5723 = vmatprep.subr.bf16.mxu0 %v6667_v23 }
 0x64b   :  { %4866 = vmatpush1.bf16.msra.mxu1 %v6664_v24 }
 0x64c   :  { %5724 = vmatpush3.bf16.msra.mxu0 %v6668_v25  ;;  %4867 = vmatprep.subr.bf16.mxu1 %v6671_v58 }
 0x64d   :  { %5725 = vmatprep.subr.bf16.mxu0 %v6672_v26 }
 0x64f   :  { %4868 = vmatpush1.bf16.msra.mxu1 %v6669_v27 }
 0x650   :  { %5726 = vmatpush3.bf16.msra.mxu0 %v6673_v63  ;;  %4869 = vmatprep.subr.bf16.mxu1 %v6676_v30 }
 0x651   :  { %5727 = vmatprep.subr.bf16.mxu0 %v6677_v31 }
 0x653   :  { %4870 = vmatpush1.bf16.msra.mxu1 %v6674_v32 }
 0x654   :  { %5728 = vmatpush3.bf16.msra.mxu0 %v6678_v33  ;;  %4880 = vmatprep.subr.bf16.mxu1 %v6681_v34 }
 0x656   :  { %4872 = vmatmul.mubr.bf16.vlgmr.msra.gmra.mrb[20].mxu1 %v7189_v15  ;;  %v6696_v15 = vld [vmem:[#allocation10 + $0x4ac] ss:$28 sps:$4 sm:$0xff]  }
 0x657   :  { %4994 = vmatmul.mubr.bf16.vlgmr.msra.gmra.mrb[20].mxu0 %v7202_v28  ;;  %4881 = vmatpush1.bf16.msra.mxu1 %v6679_v35 }
 0x658   :  { %4912 = vmatprep.mubr.bf16.mxu1 %v7193_v18  ;;  %4882 = vmatprep.subr.bf16.mxu1 %v6684_v36  ;;  %v6697_v18 = vld [vmem:[#allocation10 + $0x4e0] ss:$28 sps:$4 sm:$0xff]  }
 0x65b   :  { %4883 = vmatpush1.bf16.msra.mxu1 %v6682_v37 }
 0x65c   :  { %4884 = vmatprep.subr.bf16.mxu1 %v6687_v39 }
 0x65f   :  { %4885 = vmatpush1.bf16.msra.mxu1 %v6685_v40 }
 0x660   :  { %4886 = vmatprep.subr.bf16.mxu1 %v6690_v42 }
 0x663   :  { %4887 = vmatpush1.bf16.msra.mxu1 %v6688_v46 }
 0x664   :  { %4888 = vmatprep.subr.bf16.mxu1 %v6693_v43 }
 0x667   :  { %4889 = vmatpush1.bf16.msra.mxu1 %v6691_v12 }
 0x668   :  { %4890 = vmatprep.subr.bf16.mxu1 %v6696_v15 }
 0x66b   :  { %4891 = vmatpush1.bf16.msra.mxu1 %v6694_v47  ;;  %v3514_v47 = vsub.s32 6, %v7077_v38 }
 0x66c   :  { %4892 = vmatprep.subr.bf16.mxu1 %v6699_v48 }
 0x66d   :  { %v3515_v48 = vrot.slane %v7217_v4, %v3514_v47 }
 0x66f   :  { %4893 = vmatpush1.bf16.msra.mxu1 %v6697_v18 }
 0x670   :  { %4894 = vmatprep.subr.bf16.mxu1 %v6702_v49 }
 0x673   :  { %4895 = vmatpush1.bf16.msra.mxu1 %v6700_v50 }
 0x674   :  { %4896 = vmatprep.subr.bf16.mxu1 %v6705_v51 }
 0x677   :  { %4897 = vmatpush1.bf16.msra.mxu1 %v6703_v52 }
 0x678   :  { %4898 = vmatprep.subr.bf16.mxu1 %v6708_v53 }
 0x67b   :  { %4899 = vmatpush1.bf16.msra.mxu1 %v6706_v54 }
 0x67c   :  { %4900 = vmatprep.subr.bf16.mxu1 %v6711_v55 }
 0x67f   :  { %4901 = vmatpush1.bf16.msra.mxu1 %v6709_v56 }
 0x680   :  { %4902 = vmatprep.subr.bf16.mxu1 %v6714_v57 }
 0x683   :  { %4903 = vmatpush1.bf16.msra.mxu1 %v6712_v59 }
 0x684   :  { %4904 = vmatprep.subr.bf16.mxu1 %v6717_v60 }
 0x687   :  { %4905 = vmatpush1.bf16.msra.mxu1 %v6715_v61  ;;  %v3506_v61 = vsub.s32 4, %v7077_v38 }
 0x688   :  { %4906 = vmatprep.subr.bf16.mxu1 %v6720_v62  ;;  %v3510_v62 = vsub.s32 5, %v7077_v38 }
 0x68b   :  { %4907 = vmatpush1.bf16.msra.mxu1 %v6718_v0  ;;  %v3507_v0 = vrot.slane %v7217_v4, %v3506_v61 }
 0x68c   :  { %4908 = vmatprep.subr.bf16.mxu1 %v6723_v1  ;;  %v3511_v1 = vrot.slane %v7217_v4, %v3510_v62 }
 0x68f   :  { %4909 = vmatpush1.bf16.msra.mxu1 %v6721_v2 }
 0x690   :  { %4910 = vmatprep.subr.bf16.mxu1 %v6726_v3 }
 0x693   :  { %4911 = vmatpush1.bf16.msra.mxu1 %v6724_v22 }
 0x696   :  { %4913 = vmatmul.mubr.bf16.vlgmr.msra.gmra.mrb[20].mxu1 %v7202_v28 }
 0x6e9   :  { %v4750_v9 = vpop.f32.mrb[16].mxu1  ;;  %v4832_v10 = vpop.f32.mrb[12].mxu0 }
 0x6ea   :  { %v5741_v28 = vadd.f32 %v4750_v9, %v3491_v5  ;;  %v5743_v13 = vadd.f32 %v4832_v10, %v3499_v6  ;;  %v4752_v14 = vpop.f32.mrb[17].mxu1  ;;  %v4834_v16 = vpop.f32.mrb[13].mxu0 }
 0x6eb   :  { %v5742_v17 = vadd.f32 %v4752_v14, %v3495_v7  ;;  %v5744_v19 = vadd.f32 %v4834_v16, %v3503_v8  ;;  %v4754_v20 = vpop.f32.mrb[18].mxu1  ;;  %v4836_v21 = vpop.f32.mrb[14].mxu0 }
 0x6ec   :  { %v5001_v41 = vsub.f32 0.0, %v5741_v28  ;;  %v5003_v11 = vsub.f32 0.0, %v5743_v13  ;;  %v4755_v23 = vpop.f32.mrb[19].mxu1  ;;  %v4837_v29 = vpop.f32.mrb[15].mxu0 }
 0x6ed   :  { %v5002_v24 = vsub.f32 0.0, %v5742_v17  ;;  %v5004_v25 = vsub.f32 0.0, %v5744_v19 }
 0x6ee   :  { %v5008_v44 = vmul.f32 1.442695, %v5001_v41  ;;  %v5012_v58 = vmul.f32 1.442695, %v5003_v11 }
 0x6ef   :  { %v5010_v26 = vmul.f32 1.442695, %v5002_v24  ;;  %v5014_v45 = vmul.f32 1.442695, %v5004_v25 }
 0x6f0   :  { %6729 = vpow2.f32 %v5008_v44 }
 0x6f1   :  { %6731 = vpow2.f32 %v5012_v58 }
 0x6f2   :  { %6733 = vpow2.f32 %v5010_v26 }
 0x6f3   :  { %6735 = vpow2.f32 %v5014_v45 }
 0x6fa   :  { %v6730_v27 = vpop.eup %6729 }
 0x6fb   :  { %v6732_v63 = vpop.eup %6731  ;;  %v5022_v30 = vadd.f32 1.0, %v6730_v27 }
 0x6fc   :  { %v6734_v31 = vpop.eup %6733  ;;  %v5024_v32 = vadd.f32 1.0, %v6732_v63 }
 0x6fd   :  { %v6736_v33 = vpop.eup %6735  ;;  %6737 = vrcp.f32 %v5022_v30  ;;  %v5023_v34 = vadd.f32 1.0, %v6734_v31 }
 0x6fe   :  { %6739 = vrcp.f32 %v5024_v32  ;;  %v5025_v35 = vadd.f32 1.0, %v6736_v33 }
 0x6ff   :  { %6741 = vrcp.f32 %v5023_v34 }
 0x700   :  { %6743 = vrcp.f32 %v5025_v35 }
 0x707   :  { %v6738_v36 = vpop.eup %6737 }
 0x708   :  { %v6740_v37 = vpop.eup %6739  ;;  %5036 = vst [vmem:[#allocation11] sm:$0xff] %v6738_v36 }
 0x709   :  { %v6742_v39 = vpop.eup %6741  ;;  %5038 = vst [vmem:[#allocation11 + $0x10] sm:$0xff] %v6740_v37 }
 0x70a   :  { %v6744_v40 = vpop.eup %6743  ;;  %5037 = vst [vmem:[#allocation11 + $0x8] sm:$0xff] %v6742_v39  ;;  %v5707_v42 = vpop.f32.mrb[16].mxu0 }
 0x70b   :  { %5039 = vst [vmem:[#allocation11 + $0x18] sm:$0xff] %v6744_v40  ;;  %v5708_v46 = vpop.f32.mrb[17].mxu0 }
 0x70c   :  { %v5709_v43 = vadd.f32 %v5708_v46, %v5707_v42  ;;  %v5710_v12 = vpop.f32.mrb[18].mxu0 }
 0x70d   :  { %v5711_v15 = vpop.f32.mrb[19].mxu0 }
 0x70e   :  { %v4956_v50 = vadd.f32 %v5709_v43, %v3515_v48 }
 0x72a   :  { %v5729_v18 = vpop.f32.mrb[20].mxu0 }
 0x72b   :  { %v5730_v49 = vpop.f32.mrb[21].mxu0 }
 0x72c   :  { %v5731_v51 = vadd.f32 %v5730_v49, %v5729_v18  ;;  %v5732_v52 = vpop.f32.mrb[22].mxu0 }
 0x72d   :  { %v5733_v53 = vpop.f32.mrb[23].mxu0 }
 0x72e   :  { %v4996_v54 = vadd.f32 %v5731_v51, %v4956_v50 }
 0x730   :  { %v5007_v55 = vsub.f32 0.0, %v4996_v54 }
 0x732   :  { %v5020_v56 = vmul.f32 1.442695, %v5007_v55 }
 0x734   :  { %6745 = vpow2.f32 %v5020_v56 }
 0x73e   :  { %v6746_v57 = vpop.eup %6745 }
 0x73f   :  { %v5028_v59 = vadd.f32 1.0, %v6746_v57 }
 0x741   :  { %6747 = vrcp.f32 %v5028_v59 }
 0x74b   :  { %v6748_v60 = vpop.eup %6747 }
 0x74c   :  { %5042 = vst [vmem:[#allocation11 + $0x30] sm:$0xff] %v6748_v60 }
 0x769   :  { %v4914_v2 = vpop.f32.mrb[20].mxu1 }
 0x76a   :  { %v5745_v3 = vadd.f32 %v4914_v2, %v3507_v0  ;;  %v4916_v22 = vpop.f32.mrb[21].mxu1 }
 0x76b   :  { %v5746_v5 = vadd.f32 %v4916_v22, %v3511_v1  ;;  %v4918_v6 = vpop.f32.mrb[22].mxu1 }
 0x76c   :  { %v5005_v7 = vsub.f32 0.0, %v5745_v3  ;;  %v4919_v8 = vpop.f32.mrb[23].mxu1 }
 0x76d   :  { %v5006_v9 = vsub.f32 0.0, %v5746_v5 }
 0x76e   :  { %v5016_v10 = vmul.f32 1.442695, %v5005_v7 }
 0x76f   :  { %v5018_v28 = vmul.f32 1.442695, %v5006_v9 }
 0x770   :  { %6749 = vpow2.f32 %v5016_v10 }
 0x771   :  { %6751 = vpow2.f32 %v5018_v28 }
 0x77a   :  { %v6750_v13 = vpop.eup %6749 }
 0x77b   :  { %v6752_v14 = vpop.eup %6751  ;;  %v5026_v16 = vadd.f32 1.0, %v6750_v13 }
 0x77c   :  { %v5027_v38 = vadd.f32 1.0, %v6752_v14 }
 0x77d   :  { %6753 = vrcp.f32 %v5026_v16 }
 0x77e   :  { %6755 = vrcp.f32 %v5027_v38 }
 0x787   :  { %v6754_v4 = vpop.eup %6753 }
 0x788   :  { %v6756_v17 = vpop.eup %6755  ;;  %5040 = vst [vmem:[#allocation11 + $0x20] sm:$0xff] %v6754_v4 }
 0x789   :  { %5041 = vst [vmem:[#allocation11 + $0x28] sm:$0xff] %v6756_v17 }
 0x78a   :  { %6878 = shalt.err (!%p6875_p2)
}
 0x78b   :  { %s6879_s22 = scalar_lea.hbm %s7259_s14, 896 }
 0x78c   :  { %p6880_p3 = scmp.ne.s32.totalorder %s7259_s14, %s6879_s22  ;;  %p6883_p4 = scmp.lt.u32.totalorder %s6879_s22, %s7259_s14 }
 0x78e   :  { %p6885_p5 = pnand %p6883_p4, %p6880_p3 }
 0x790   :  { %6888 = shalt.err (!%p6885_p5)
}
 0x791   :  { %5052 = dma.vmem_to_hbm [thread:$0]  %s5050_s29, 896, %s7259_s14, [#allocation4]  }
 0x792   :  { %6895 = dma.done.wait [#allocation4], 896  }
 0x793   :  { %6896 = vsyncadd [#allocation4], 4294966400 }
 0x794   :  { %5056 = vsyncpa [#allocation3], 1 }
 0x795   :  { %5057 = vsyncpa [#allocation6], 1 }
 0x796   :  { %5058 = vsyncpa [#allocation9], 1 }
 0x797   :  { %5059 = vsyncpa [#allocation4], 1 }

</bundles_post_ra>
